<compile_context>
chip_gen: v5e
topology: v5e:2x2
jax: 0.10.0
libtpu: 0.0.40
codegen_flags: <defaults>
</compile_context>

<pallas_src>
from functools import partial

import jax
import jax.numpy as jnp
from jax import lax
from jax.experimental import pallas as pl
from jax.experimental.pallas import tpu as pltpu

NUM_ITERATIONS = 8
CIN1_PAD = 8  # conv1 input channels padded 3 -> 8 (sublane-aligned blocks)


def _conv3x3_im2col(act_bf16, w_ref, b_ref, masks, H, W):
    """3x3 SAME conv of a (cin, H*W) bf16 activation as one MXU matmul.

    w_ref: (cout, 9*cin) bf16, column order (ky*3 + kx)*cin + c.
    b_ref: (cout, 1) f32.
    Returns (cout, H*W) f32 (bias added, no activation fn).

    The flat activation is zero-extended by (W+1) lanes on each side, so
    every out-of-image *row* access already reads zeros; only the dx=-1/+1
    taps need a column mask (wrap across row boundaries).
    """
    cin, L = act_bf16.shape
    zpad = jnp.zeros((cin, W + 1), act_bf16.dtype)
    padded = jnp.concatenate([zpad, act_bf16, zpad], axis=1)   # (cin, L+2W+2)

    blocks = []
    for ky in range(3):
        for kx in range(3):
            start = ky * W + kx                 # == p + (ky-1)*W + (kx-1)
            sl = padded[:, start:start + L]     # (cin, L)
            m = masks[kx]
            if m is not None:
                sl = sl * m                     # zero invalid columns
            blocks.append(sl)
    patch = jnp.concatenate(blocks, axis=0)     # (9*cin, L), lane-dense

    out = jnp.dot(w_ref[...], patch, preferred_element_type=jnp.float32)
    return out + b_ref[...]                     # (cout, 1) broadcast


def _zero_dce_kernel(x_ref,
                     w1_ref, b1_ref, w2_ref, b2_ref, w3_ref, b3_ref,
                     w4_ref, b4_ref, w5_ref, b5_ref,
                     enh_ref, curves_ref,
                     *, H, W, num_iterations):
    L = H * W

    # Column-validity masks for dx = -1 (kx=0) and dx = +1 (kx=2) taps.
    ww = lax.broadcasted_iota(jnp.int32, (1, L), 1) % W
    mask_l = (ww >= 1).astype(jnp.bfloat16)
    mask_r = (ww <= W - 2).astype(jnp.bfloat16)
    masks = (mask_l, None, mask_r)

    x = x_ref[0]                                           # (CIN1_PAD, L) f32

    def conv(act_f32, w_ref, b_ref):
        return _conv3x3_im2col(act_f32.astype(jnp.bfloat16), w_ref, b_ref,
                               masks, H, W)

    # conv1..conv4 + ReLU, conv5 + tanh
    f = jnp.maximum(conv(x, w1_ref, b1_ref), 0.0)          # (32, L) f32
    f = jnp.maximum(conv(f, w2_ref, b2_ref), 0.0)
    f = jnp.maximum(conv(f, w3_ref, b3_ref), 0.0)
    f = jnp.maximum(conv(f, w4_ref, b4_ref), 0.0)
    curves = jnp.tanh(conv(f, w5_ref, b5_ref))             # (3*iters, L) f32

    # Iterative curve enhancement: e <- e + c * (e^2 - e), lane-dense (3, L).
    enhanced = x[0:3, :]
    for i in range(num_iterations):
        c = curves[3 * i:3 * i + 3, :]
        enhanced = enhanced + c * (enhanced * enhanced - enhanced)

    enh_ref[...] = enhanced.reshape(1, 3, L).astype(enh_ref.dtype)
    curves_ref[...] = curves.reshape(1, 3 * num_iterations, L).astype(
        curves_ref.dtype)


def zero_dce_plus_forward(x_nchw, params, num_iterations=NUM_ITERATIONS):
    """params: list of 5 (weight_OIHW, bias_O) tuples (PyTorch layout)."""
    N, C, H, W = x_nchw.shape
    assert C == 3
    L = H * W
    n_curve = 3 * num_iterations

    # NCHW -> channels-first flat (N, C, H*W) (free reshape); pad conv1
    # input channels 3 -> CIN1_PAD with zeros.
    x = x_nchw.reshape(N, C, L).astype(jnp.float32)
    x = jnp.pad(x, ((0, 0), (0, CIN1_PAD - C), (0, 0)))

    def prep_w(w, cin_pad):
        cin = w.shape[1]
        wt = jnp.transpose(w, (0, 2, 3, 1))                # (cout, ky, kx, cin)
        wt = jnp.pad(wt, ((0, 0), (0, 0), (0, 0), (0, cin_pad - cin)))
        return wt.reshape(wt.shape[0], 9 * cin_pad).astype(jnp.bfloat16)

    cin_pads = (CIN1_PAD, 32, 32, 32, 32)
    kern_args = []
    for (w, b), cp in zip(params, cin_pads):
        kern_args.append(prep_w(w, cp))
        kern_args.append(b.reshape(-1, 1).astype(jnp.float32))

    def const_spec(shape):
        nd = len(shape)
        return pl.BlockSpec(shape, lambda n, _nd=nd: (0,) * _nd)

    in_specs = [pl.BlockSpec((1, CIN1_PAD, L), lambda n: (n, 0, 0))]
    for a in kern_args:
        in_specs.append(const_spec(a.shape))

    out_specs = [
        pl.BlockSpec((1, 3, L), lambda n: (n, 0, 0)),
        pl.BlockSpec((1, n_curve, L), lambda n: (n, 0, 0)),
    ]

    kernel = partial(_zero_dce_kernel, H=H, W=W,
                     num_iterations=num_iterations)

    enh, curves = pl.pallas_call(
        kernel,
        out_shape=(
            jax.ShapeDtypeStruct((N, 3, L), jnp.float32),
            jax.ShapeDtypeStruct((N, n_curve, L), jnp.float32),
        ),
        grid_spec=pltpu.PrefetchScalarGridSpec(
            num_scalar_prefetch=0,
            grid=(N,),
            in_specs=in_specs,
            out_specs=out_specs,
        ),
        compiler_params=pltpu.CompilerParams(
            dimension_semantics=("parallel",),
            vmem_limit_bytes=64 * 1024 * 1024),
    )(x, *kern_args)

    # (N, C, H*W) -> NCHW is a free reshape (no transposes needed).
    return enh.reshape(N, 3, H, W), curves.reshape(N, n_curve, H, W)


def _init_conv_params(key, cin, cout):
    """Deterministic init, PyTorch Conv2d-style uniform bounds."""
    k_w, k_b = jax.random.split(key)
    fan_in = cin * 3 * 3
    bound = 1.0 / (fan_in ** 0.5)
    w = jax.random.uniform(k_w, (cout, cin, 3, 3), jnp.float32, -bound, bound)
    b = jax.random.uniform(k_b, (cout,), jnp.float32, -bound, bound)
    return w, b


def _reference_forward(x_nchw, params, num_iterations=NUM_ITERATIONS):
    """Pure-JAX (XLA) reference for validation."""
    dn = ("NCHW", "OIHW", "NCHW")

    def conv(h, w, b):
        y = lax.conv_general_dilated(h, w, (1, 1), "SAME",
                                     dimension_numbers=dn,
                                     precision=lax.Precision.HIGHEST)
        return y + b[None, :, None, None]

    h = jax.nn.relu(conv(x_nchw, *params[0]))
    h = jax.nn.relu(conv(h, *params[1]))
    h = jax.nn.relu(conv(h, *params[2]))
    h = jax.nn.relu(conv(h, *params[3]))
    curves = jnp.tanh(conv(h, *params[4]))
    enhanced = x_nchw
    for i in range(num_iterations):
        curve = curves[:, i * 3:(i + 1) * 3, :, :]
        enhanced = enhanced + curve * (enhanced * enhanced - enhanced)
    return enhanced, curves


if __name__ == "__main__":
    key = jax.random.PRNGKey(0)
    k_x, k1, k2, k3, k4, k5 = jax.random.split(key, 6)

    N, H, W = 2, 16, 16
    x = jax.random.uniform(k_x, (N, 3, H, W), jnp.float32)  # image-like [0,1]

    params = [
        _init_conv_params(k1, 3, 32),
        _init_conv_params(k2, 32, 32),
        _init_conv_params(k3, 32, 32),
        _init_conv_params(k4, 32, 32),
        _init_conv_params(k5, 32, 3 * NUM_ITERATIONS),
    ]

    enh, curves = zero_dce_plus_forward(x, params)
    jax.block_until_ready((enh, curves))

    # sanity check against a pure-JAX reference (bf16 MXU operands with f32
    # accumulation -> tolerance loosened vs. the Precision.HIGHEST reference)
    enh_ref, curves_ref = _reference_forward(x, params)
    assert enh.shape == (N, 3, H, W)
    assert curves.shape == (N, 3 * NUM_ITERATIONS, H, W)
    assert jnp.allclose(curves, curves_ref, atol=2e-2, rtol=2e-2)
    assert jnp.allclose(enh, enh_ref, atol=2e-2, rtol=2e-2)

    print("KERNEL_OK")
</pallas_src>

<mosaic_0001>
module attributes {stable_mosaic.version = 11 : i64} {
  func.func @_zero_dce_kernel(%arg0: i32, %arg1: memref<1x8x256xf32, #tpu.memory_space<vmem>>, %arg2: memref<32x72xbf16, #tpu.memory_space<vmem>>, %arg3: memref<32x1xf32, #tpu.memory_space<vmem>>, %arg4: memref<32x288xbf16, #tpu.memory_space<vmem>>, %arg5: memref<32x1xf32, #tpu.memory_space<vmem>>, %arg6: memref<32x288xbf16, #tpu.memory_space<vmem>>, %arg7: memref<32x1xf32, #tpu.memory_space<vmem>>, %arg8: memref<32x288xbf16, #tpu.memory_space<vmem>>, %arg9: memref<32x1xf32, #tpu.memory_space<vmem>>, %arg10: memref<24x288xbf16, #tpu.memory_space<vmem>>, %arg11: memref<24x1xf32, #tpu.memory_space<vmem>>, %arg12: memref<1x3x256xf32, #tpu.memory_space<vmem>>, %arg13: memref<1x24x256xf32, #tpu.memory_space<vmem>>) attributes {dimension_semantics = [#tpu.dimension_semantics<parallel>], iteration_bounds = array<i64: 2>, scalar_prefetch = 0 : i64, scratch_operands = 0 : i64, tpu.core_type = #tpu.core_type<tc>, window_params = [{transform_indices = @transform_0, window_bounds = array<i64: 1, 8, 256>}, {pipeline_mode = #tpu.pipeline_mode<synchronous>, transform_indices = @transform_1, window_bounds = array<i64: 32, 72>}, {pipeline_mode = #tpu.pipeline_mode<synchronous>, transform_indices = @transform_2, window_bounds = array<i64: 32, 1>}, {pipeline_mode = #tpu.pipeline_mode<synchronous>, transform_indices = @transform_3, window_bounds = array<i64: 32, 288>}, {pipeline_mode = #tpu.pipeline_mode<synchronous>, transform_indices = @transform_4, window_bounds = array<i64: 32, 1>}, {pipeline_mode = #tpu.pipeline_mode<synchronous>, transform_indices = @transform_5, window_bounds = array<i64: 32, 288>}, {pipeline_mode = #tpu.pipeline_mode<synchronous>, transform_indices = @transform_6, window_bounds = array<i64: 32, 1>}, {pipeline_mode = #tpu.pipeline_mode<synchronous>, transform_indices = @transform_7, window_bounds = array<i64: 32, 288>}, {pipeline_mode = #tpu.pipeline_mode<synchronous>, transform_indices = @transform_8, window_bounds = array<i64: 32, 1>}, {pipeline_mode = #tpu.pipeline_mode<synchronous>, transform_indices = @transform_9, window_bounds = array<i64: 24, 288>}, {pipeline_mode = #tpu.pipeline_mode<synchronous>, transform_indices = @transform_10, window_bounds = array<i64: 24, 1>}, {transform_indices = @transform_11, window_bounds = array<i64: 1, 3, 256>}, {transform_indices = @transform_12, window_bounds = array<i64: 1, 24, 256>}]} {
    %0 = tpu.iota {dimensions = array<i32: 1>} : vector<1x256xi32>
    %c16_i32 = arith.constant 16 : i32
    %c0_i32 = arith.constant 0 : i32
    %1 = arith.cmpi eq, %c16_i32, %c0_i32 : i32
    %c1_i32 = arith.constant 1 : i32
    %2 = arith.select %1, %c1_i32, %c16_i32 : i32
    %3 = vector.broadcast %2 : i32 to vector<1x256xi32>
    %4 = arith.remsi %0, %3 : vector<1x256xi32>
    %c0_i32_0 = arith.constant 0 : i32
    %5 = vector.broadcast %c0_i32_0 : i32 to vector<1x256xi32>
    %6 = arith.cmpi ne, %4, %5 : vector<1x256xi32>
    %c0_i32_1 = arith.constant 0 : i32
    %7 = vector.broadcast %c0_i32_1 : i32 to vector<1x256xi32>
    %8 = arith.cmpi slt, %4, %7 : vector<1x256xi32>
    %c0_i32_2 = arith.constant 0 : i32
    %9 = arith.cmpi slt, %2, %c0_i32_2 : i32
    %10 = vector.broadcast %9 : i1 to vector<1x256xi1>
    %11 = vector.broadcast %10 : vector<1x256xi1> to vector<1x256xi1>
    %12 = arith.xori %8, %11 : vector<1x256xi1>
    %13 = arith.andi %12, %6 : vector<1x256xi1>
    %14 = vector.broadcast %2 : i32 to vector<1x256xi32>
    %15 = arith.addi %4, %14 : vector<1x256xi32>
    %16 = arith.select %13, %15, %4 : vector<1x256xi1>, vector<1x256xi32>
    %c1_i32_3 = arith.constant 1 : i32
    %17 = vector.broadcast %c1_i32_3 : i32 to vector<1x256xi32>
    %18 = arith.cmpi sge, %16, %17 : vector<1x256xi32>
    %19 = arith.extui %18 : vector<1x256xi1> to vector<1x256xi32>
    %20 = arith.sitofp %19 : vector<1x256xi32> to vector<1x256xf32>
    %21 = arith.truncf %20 : vector<1x256xf32> to vector<1x256xbf16>
    %c14_i32 = arith.constant 14 : i32
    %22 = vector.broadcast %c14_i32 : i32 to vector<1x256xi32>
    %23 = arith.cmpi sle, %16, %22 : vector<1x256xi32>
    %24 = arith.extui %23 : vector<1x256xi1> to vector<1x256xi32>
    %25 = arith.sitofp %24 : vector<1x256xi32> to vector<1x256xf32>
    %26 = arith.truncf %25 : vector<1x256xf32> to vector<1x256xbf16>
    %c0 = arith.constant 0 : index
    %c0_4 = arith.constant 0 : index
    %c0_5 = arith.constant 0 : index
    %27 = vector.load %arg1[%c0, %c0_4, %c0_5] : memref<1x8x256xf32, #tpu.memory_space<vmem>>, vector<1x8x256xf32>
    %28 = vector.shape_cast %27 : vector<1x8x256xf32> to vector<8x256xf32>
    %29 = arith.truncf %28 : vector<8x256xf32> to vector<8x256xbf16>
    %cst = arith.constant 0.000000e+00 : bf16
    %30 = vector.broadcast %cst : bf16 to vector<8x17xbf16>
    %31 = tpu.concatenate %30, %29, %30 in 1 : vector<8x17xbf16>, vector<8x256xbf16>, vector<8x17xbf16> -> vector<8x290xbf16>
    %32 = vector.extract_strided_slice %31 {offsets = [0, 0], sizes = [8, 256], strides = [1, 1]} : vector<8x290xbf16> to vector<8x256xbf16>
    %33 = vector.broadcast %21 : vector<1x256xbf16> to vector<8x256xbf16>
    %34 = arith.mulf %32, %33 : vector<8x256xbf16>
    %35 = vector.extract_strided_slice %31 {offsets = [0, 1], sizes = [8, 256], strides = [1, 1]} : vector<8x290xbf16> to vector<8x256xbf16>
    %36 = vector.extract_strided_slice %31 {offsets = [0, 2], sizes = [8, 256], strides = [1, 1]} : vector<8x290xbf16> to vector<8x256xbf16>
    %37 = vector.broadcast %26 : vector<1x256xbf16> to vector<8x256xbf16>
    %38 = arith.mulf %36, %37 : vector<8x256xbf16>
    %39 = vector.extract_strided_slice %31 {offsets = [0, 16], sizes = [8, 256], strides = [1, 1]} : vector<8x290xbf16> to vector<8x256xbf16>
    %40 = vector.broadcast %21 : vector<1x256xbf16> to vector<8x256xbf16>
    %41 = arith.mulf %39, %40 : vector<8x256xbf16>
    %42 = vector.extract_strided_slice %31 {offsets = [0, 17], sizes = [8, 256], strides = [1, 1]} : vector<8x290xbf16> to vector<8x256xbf16>
    %43 = vector.extract_strided_slice %31 {offsets = [0, 18], sizes = [8, 256], strides = [1, 1]} : vector<8x290xbf16> to vector<8x256xbf16>
    %44 = vector.broadcast %26 : vector<1x256xbf16> to vector<8x256xbf16>
    %45 = arith.mulf %43, %44 : vector<8x256xbf16>
    %46 = vector.extract_strided_slice %31 {offsets = [0, 32], sizes = [8, 256], strides = [1, 1]} : vector<8x290xbf16> to vector<8x256xbf16>
    %47 = vector.broadcast %21 : vector<1x256xbf16> to vector<8x256xbf16>
    %48 = arith.mulf %46, %47 : vector<8x256xbf16>
    %49 = vector.extract_strided_slice %31 {offsets = [0, 33], sizes = [8, 256], strides = [1, 1]} : vector<8x290xbf16> to vector<8x256xbf16>
    %50 = vector.extract_strided_slice %31 {offsets = [0, 34], sizes = [8, 256], strides = [1, 1]} : vector<8x290xbf16> to vector<8x256xbf16>
    %51 = vector.broadcast %26 : vector<1x256xbf16> to vector<8x256xbf16>
    %52 = arith.mulf %50, %51 : vector<8x256xbf16>
    %53 = tpu.concatenate %34, %35, %38, %41, %42, %45, %48, %49, %52 in 0 : vector<8x256xbf16>, vector<8x256xbf16>, vector<8x256xbf16>, vector<8x256xbf16>, vector<8x256xbf16>, vector<8x256xbf16>, vector<8x256xbf16>, vector<8x256xbf16>, vector<8x256xbf16> -> vector<72x256xbf16>
    %c0_6 = arith.constant 0 : index
    %c0_7 = arith.constant 0 : index
    %54 = vector.load %arg2[%c0_6, %c0_7] : memref<32x72xbf16, #tpu.memory_space<vmem>>, vector<32x72xbf16>
    %cst_8 = arith.constant dense<0.000000e+00> : vector<32x256xf32>
    %55 = tpu.matmul %54, %53, %cst_8 {dimension_numbers = #tpu.dot_dimension_numbers<[1], [0], [0], [1], [0, 0, 1, 1], [], []>} : vector<32x72xbf16>, vector<72x256xbf16>, vector<32x256xf32> -> vector<32x256xf32>
    %c0_9 = arith.constant 0 : index
    %c0_10 = arith.constant 0 : index
    %56 = vector.load %arg3[%c0_9, %c0_10] : memref<32x1xf32, #tpu.memory_space<vmem>>, vector<32x1xf32>
    %57 = vector.broadcast %56 : vector<32x1xf32> to vector<32x256xf32>
    %58 = arith.addf %55, %57 : vector<32x256xf32>
    %cst_11 = arith.constant 0.000000e+00 : f32
    %59 = vector.broadcast %cst_11 : f32 to vector<32x256xf32>
    %60 = arith.maximumf %58, %59 : vector<32x256xf32>
    %61 = arith.truncf %60 : vector<32x256xf32> to vector<32x256xbf16>
    %cst_12 = arith.constant 0.000000e+00 : bf16
    %62 = vector.broadcast %cst_12 : bf16 to vector<32x17xbf16>
    %63 = tpu.concatenate %62, %61, %62 in 1 : vector<32x17xbf16>, vector<32x256xbf16>, vector<32x17xbf16> -> vector<32x290xbf16>
    %64 = vector.extract_strided_slice %63 {offsets = [0, 0], sizes = [32, 256], strides = [1, 1]} : vector<32x290xbf16> to vector<32x256xbf16>
    %65 = vector.broadcast %21 : vector<1x256xbf16> to vector<32x256xbf16>
    %66 = arith.mulf %64, %65 : vector<32x256xbf16>
    %67 = vector.extract_strided_slice %63 {offsets = [0, 1], sizes = [32, 256], strides = [1, 1]} : vector<32x290xbf16> to vector<32x256xbf16>
    %68 = vector.extract_strided_slice %63 {offsets = [0, 2], sizes = [32, 256], strides = [1, 1]} : vector<32x290xbf16> to vector<32x256xbf16>
    %69 = vector.broadcast %26 : vector<1x256xbf16> to vector<32x256xbf16>
    %70 = arith.mulf %68, %69 : vector<32x256xbf16>
    %71 = vector.extract_strided_slice %63 {offsets = [0, 16], sizes = [32, 256], strides = [1, 1]} : vector<32x290xbf16> to vector<32x256xbf16>
    %72 = vector.broadcast %21 : vector<1x256xbf16> to vector<32x256xbf16>
    %73 = arith.mulf %71, %72 : vector<32x256xbf16>
    %74 = vector.extract_strided_slice %63 {offsets = [0, 17], sizes = [32, 256], strides = [1, 1]} : vector<32x290xbf16> to vector<32x256xbf16>
    %75 = vector.extract_strided_slice %63 {offsets = [0, 18], sizes = [32, 256], strides = [1, 1]} : vector<32x290xbf16> to vector<32x256xbf16>
    %76 = vector.broadcast %26 : vector<1x256xbf16> to vector<32x256xbf16>
    %77 = arith.mulf %75, %76 : vector<32x256xbf16>
    %78 = vector.extract_strided_slice %63 {offsets = [0, 32], sizes = [32, 256], strides = [1, 1]} : vector<32x290xbf16> to vector<32x256xbf16>
    %79 = vector.broadcast %21 : vector<1x256xbf16> to vector<32x256xbf16>
    %80 = arith.mulf %78, %79 : vector<32x256xbf16>
    %81 = vector.extract_strided_slice %63 {offsets = [0, 33], sizes = [32, 256], strides = [1, 1]} : vector<32x290xbf16> to vector<32x256xbf16>
    %82 = vector.extract_strided_slice %63 {offsets = [0, 34], sizes = [32, 256], strides = [1, 1]} : vector<32x290xbf16> to vector<32x256xbf16>
    %83 = vector.broadcast %26 : vector<1x256xbf16> to vector<32x256xbf16>
    %84 = arith.mulf %82, %83 : vector<32x256xbf16>
    %85 = tpu.concatenate %66, %67, %70, %73, %74, %77, %80, %81, %84 in 0 : vector<32x256xbf16>, vector<32x256xbf16>, vector<32x256xbf16>, vector<32x256xbf16>, vector<32x256xbf16>, vector<32x256xbf16>, vector<32x256xbf16>, vector<32x256xbf16>, vector<32x256xbf16> -> vector<288x256xbf16>
    %c0_13 = arith.constant 0 : index
    %c0_14 = arith.constant 0 : index
    %86 = vector.load %arg4[%c0_13, %c0_14] : memref<32x288xbf16, #tpu.memory_space<vmem>>, vector<32x288xbf16>
    %cst_15 = arith.constant dense<0.000000e+00> : vector<32x256xf32>
    %87 = tpu.matmul %86, %85, %cst_15 {dimension_numbers = #tpu.dot_dimension_numbers<[1], [0], [0], [1], [0, 0, 1, 1], [], []>} : vector<32x288xbf16>, vector<288x256xbf16>, vector<32x256xf32> -> vector<32x256xf32>
    %c0_16 = arith.constant 0 : index
    %c0_17 = arith.constant 0 : index
    %88 = vector.load %arg5[%c0_16, %c0_17] : memref<32x1xf32, #tpu.memory_space<vmem>>, vector<32x1xf32>
    %89 = vector.broadcast %88 : vector<32x1xf32> to vector<32x256xf32>
    %90 = arith.addf %87, %89 : vector<32x256xf32>
    %cst_18 = arith.constant 0.000000e+00 : f32
    %91 = vector.broadcast %cst_18 : f32 to vector<32x256xf32>
    %92 = arith.maximumf %90, %91 : vector<32x256xf32>
    %93 = arith.truncf %92 : vector<32x256xf32> to vector<32x256xbf16>
    %cst_19 = arith.constant 0.000000e+00 : bf16
    %94 = vector.broadcast %cst_19 : bf16 to vector<32x17xbf16>
    %95 = tpu.concatenate %94, %93, %94 in 1 : vector<32x17xbf16>, vector<32x256xbf16>, vector<32x17xbf16> -> vector<32x290xbf16>
    %96 = vector.extract_strided_slice %95 {offsets = [0, 0], sizes = [32, 256], strides = [1, 1]} : vector<32x290xbf16> to vector<32x256xbf16>
    %97 = vector.broadcast %21 : vector<1x256xbf16> to vector<32x256xbf16>
    %98 = arith.mulf %96, %97 : vector<32x256xbf16>
    %99 = vector.extract_strided_slice %95 {offsets = [0, 1], sizes = [32, 256], strides = [1, 1]} : vector<32x290xbf16> to vector<32x256xbf16>
    %100 = vector.extract_strided_slice %95 {offsets = [0, 2], sizes = [32, 256], strides = [1, 1]} : vector<32x290xbf16> to vector<32x256xbf16>
    %101 = vector.broadcast %26 : vector<1x256xbf16> to vector<32x256xbf16>
    %102 = arith.mulf %100, %101 : vector<32x256xbf16>
    %103 = vector.extract_strided_slice %95 {offsets = [0, 16], sizes = [32, 256], strides = [1, 1]} : vector<32x290xbf16> to vector<32x256xbf16>
    %104 = vector.broadcast %21 : vector<1x256xbf16> to vector<32x256xbf16>
    %105 = arith.mulf %103, %104 : vector<32x256xbf16>
    %106 = vector.extract_strided_slice %95 {offsets = [0, 17], sizes = [32, 256], strides = [1, 1]} : vector<32x290xbf16> to vector<32x256xbf16>
    %107 = vector.extract_strided_slice %95 {offsets = [0, 18], sizes = [32, 256], strides = [1, 1]} : vector<32x290xbf16> to vector<32x256xbf16>
    %108 = vector.broadcast %26 : vector<1x256xbf16> to vector<32x256xbf16>
    %109 = arith.mulf %107, %108 : vector<32x256xbf16>
    %110 = vector.extract_strided_slice %95 {offsets = [0, 32], sizes = [32, 256], strides = [1, 1]} : vector<32x290xbf16> to vector<32x256xbf16>
    %111 = vector.broadcast %21 : vector<1x256xbf16> to vector<32x256xbf16>
    %112 = arith.mulf %110, %111 : vector<32x256xbf16>
    %113 = vector.extract_strided_slice %95 {offsets = [0, 33], sizes = [32, 256], strides = [1, 1]} : vector<32x290xbf16> to vector<32x256xbf16>
    %114 = vector.extract_strided_slice %95 {offsets = [0, 34], sizes = [32, 256], strides = [1, 1]} : vector<32x290xbf16> to vector<32x256xbf16>
    %115 = vector.broadcast %26 : vector<1x256xbf16> to vector<32x256xbf16>
    %116 = arith.mulf %114, %115 : vector<32x256xbf16>
    %117 = tpu.concatenate %98, %99, %102, %105, %106, %109, %112, %113, %116 in 0 : vector<32x256xbf16>, vector<32x256xbf16>, vector<32x256xbf16>, vector<32x256xbf16>, vector<32x256xbf16>, vector<32x256xbf16>, vector<32x256xbf16>, vector<32x256xbf16>, vector<32x256xbf16> -> vector<288x256xbf16>
    %c0_20 = arith.constant 0 : index
    %c0_21 = arith.constant 0 : index
    %118 = vector.load %arg6[%c0_20, %c0_21] : memref<32x288xbf16, #tpu.memory_space<vmem>>, vector<32x288xbf16>
    %cst_22 = arith.constant dense<0.000000e+00> : vector<32x256xf32>
    %119 = tpu.matmul %118, %117, %cst_22 {dimension_numbers = #tpu.dot_dimension_numbers<[1], [0], [0], [1], [0, 0, 1, 1], [], []>} : vector<32x288xbf16>, vector<288x256xbf16>, vector<32x256xf32> -> vector<32x256xf32>
    %c0_23 = arith.constant 0 : index
    %c0_24 = arith.constant 0 : index
    %120 = vector.load %arg7[%c0_23, %c0_24] : memref<32x1xf32, #tpu.memory_space<vmem>>, vector<32x1xf32>
    %121 = vector.broadcast %120 : vector<32x1xf32> to vector<32x256xf32>
    %122 = arith.addf %119, %121 : vector<32x256xf32>
    %cst_25 = arith.constant 0.000000e+00 : f32
    %123 = vector.broadcast %cst_25 : f32 to vector<32x256xf32>
    %124 = arith.maximumf %122, %123 : vector<32x256xf32>
    %125 = arith.truncf %124 : vector<32x256xf32> to vector<32x256xbf16>
    %cst_26 = arith.constant 0.000000e+00 : bf16
    %126 = vector.broadcast %cst_26 : bf16 to vector<32x17xbf16>
    %127 = tpu.concatenate %126, %125, %126 in 1 : vector<32x17xbf16>, vector<32x256xbf16>, vector<32x17xbf16> -> vector<32x290xbf16>
    %128 = vector.extract_strided_slice %127 {offsets = [0, 0], sizes = [32, 256], strides = [1, 1]} : vector<32x290xbf16> to vector<32x256xbf16>
    %129 = vector.broadcast %21 : vector<1x256xbf16> to vector<32x256xbf16>
    %130 = arith.mulf %128, %129 : vector<32x256xbf16>
    %131 = vector.extract_strided_slice %127 {offsets = [0, 1], sizes = [32, 256], strides = [1, 1]} : vector<32x290xbf16> to vector<32x256xbf16>
    %132 = vector.extract_strided_slice %127 {offsets = [0, 2], sizes = [32, 256], strides = [1, 1]} : vector<32x290xbf16> to vector<32x256xbf16>
    %133 = vector.broadcast %26 : vector<1x256xbf16> to vector<32x256xbf16>
    %134 = arith.mulf %132, %133 : vector<32x256xbf16>
    %135 = vector.extract_strided_slice %127 {offsets = [0, 16], sizes = [32, 256], strides = [1, 1]} : vector<32x290xbf16> to vector<32x256xbf16>
    %136 = vector.broadcast %21 : vector<1x256xbf16> to vector<32x256xbf16>
    %137 = arith.mulf %135, %136 : vector<32x256xbf16>
    %138 = vector.extract_strided_slice %127 {offsets = [0, 17], sizes = [32, 256], strides = [1, 1]} : vector<32x290xbf16> to vector<32x256xbf16>
    %139 = vector.extract_strided_slice %127 {offsets = [0, 18], sizes = [32, 256], strides = [1, 1]} : vector<32x290xbf16> to vector<32x256xbf16>
    %140 = vector.broadcast %26 : vector<1x256xbf16> to vector<32x256xbf16>
    %141 = arith.mulf %139, %140 : vector<32x256xbf16>
    %142 = vector.extract_strided_slice %127 {offsets = [0, 32], sizes = [32, 256], strides = [1, 1]} : vector<32x290xbf16> to vector<32x256xbf16>
    %143 = vector.broadcast %21 : vector<1x256xbf16> to vector<32x256xbf16>
    %144 = arith.mulf %142, %143 : vector<32x256xbf16>
    %145 = vector.extract_strided_slice %127 {offsets = [0, 33], sizes = [32, 256], strides = [1, 1]} : vector<32x290xbf16> to vector<32x256xbf16>
    %146 = vector.extract_strided_slice %127 {offsets = [0, 34], sizes = [32, 256], strides = [1, 1]} : vector<32x290xbf16> to vector<32x256xbf16>
    %147 = vector.broadcast %26 : vector<1x256xbf16> to vector<32x256xbf16>
    %148 = arith.mulf %146, %147 : vector<32x256xbf16>
    %149 = tpu.concatenate %130, %131, %134, %137, %138, %141, %144, %145, %148 in 0 : vector<32x256xbf16>, vector<32x256xbf16>, vector<32x256xbf16>, vector<32x256xbf16>, vector<32x256xbf16>, vector<32x256xbf16>, vector<32x256xbf16>, vector<32x256xbf16>, vector<32x256xbf16> -> vector<288x256xbf16>
    %c0_27 = arith.constant 0 : index
    %c0_28 = arith.constant 0 : index
    %150 = vector.load %arg8[%c0_27, %c0_28] : memref<32x288xbf16, #tpu.memory_space<vmem>>, vector<32x288xbf16>
    %cst_29 = arith.constant dense<0.000000e+00> : vector<32x256xf32>
    %151 = tpu.matmul %150, %149, %cst_29 {dimension_numbers = #tpu.dot_dimension_numbers<[1], [0], [0], [1], [0, 0, 1, 1], [], []>} : vector<32x288xbf16>, vector<288x256xbf16>, vector<32x256xf32> -> vector<32x256xf32>
    %c0_30 = arith.constant 0 : index
    %c0_31 = arith.constant 0 : index
    %152 = vector.load %arg9[%c0_30, %c0_31] : memref<32x1xf32, #tpu.memory_space<vmem>>, vector<32x1xf32>
    %153 = vector.broadcast %152 : vector<32x1xf32> to vector<32x256xf32>
    %154 = arith.addf %151, %153 : vector<32x256xf32>
    %cst_32 = arith.constant 0.000000e+00 : f32
    %155 = vector.broadcast %cst_32 : f32 to vector<32x256xf32>
    %156 = arith.maximumf %154, %155 : vector<32x256xf32>
    %157 = arith.truncf %156 : vector<32x256xf32> to vector<32x256xbf16>
    %cst_33 = arith.constant 0.000000e+00 : bf16
    %158 = vector.broadcast %cst_33 : bf16 to vector<32x17xbf16>
    %159 = tpu.concatenate %158, %157, %158 in 1 : vector<32x17xbf16>, vector<32x256xbf16>, vector<32x17xbf16> -> vector<32x290xbf16>
    %160 = vector.extract_strided_slice %159 {offsets = [0, 0], sizes = [32, 256], strides = [1, 1]} : vector<32x290xbf16> to vector<32x256xbf16>
    %161 = vector.broadcast %21 : vector<1x256xbf16> to vector<32x256xbf16>
    %162 = arith.mulf %160, %161 : vector<32x256xbf16>
    %163 = vector.extract_strided_slice %159 {offsets = [0, 1], sizes = [32, 256], strides = [1, 1]} : vector<32x290xbf16> to vector<32x256xbf16>
    %164 = vector.extract_strided_slice %159 {offsets = [0, 2], sizes = [32, 256], strides = [1, 1]} : vector<32x290xbf16> to vector<32x256xbf16>
    %165 = vector.broadcast %26 : vector<1x256xbf16> to vector<32x256xbf16>
    %166 = arith.mulf %164, %165 : vector<32x256xbf16>
    %167 = vector.extract_strided_slice %159 {offsets = [0, 16], sizes = [32, 256], strides = [1, 1]} : vector<32x290xbf16> to vector<32x256xbf16>
    %168 = vector.broadcast %21 : vector<1x256xbf16> to vector<32x256xbf16>
    %169 = arith.mulf %167, %168 : vector<32x256xbf16>
    %170 = vector.extract_strided_slice %159 {offsets = [0, 17], sizes = [32, 256], strides = [1, 1]} : vector<32x290xbf16> to vector<32x256xbf16>
    %171 = vector.extract_strided_slice %159 {offsets = [0, 18], sizes = [32, 256], strides = [1, 1]} : vector<32x290xbf16> to vector<32x256xbf16>
    %172 = vector.broadcast %26 : vector<1x256xbf16> to vector<32x256xbf16>
    %173 = arith.mulf %171, %172 : vector<32x256xbf16>
    %174 = vector.extract_strided_slice %159 {offsets = [0, 32], sizes = [32, 256], strides = [1, 1]} : vector<32x290xbf16> to vector<32x256xbf16>
    %175 = vector.broadcast %21 : vector<1x256xbf16> to vector<32x256xbf16>
    %176 = arith.mulf %174, %175 : vector<32x256xbf16>
    %177 = vector.extract_strided_slice %159 {offsets = [0, 33], sizes = [32, 256], strides = [1, 1]} : vector<32x290xbf16> to vector<32x256xbf16>
    %178 = vector.extract_strided_slice %159 {offsets = [0, 34], sizes = [32, 256], strides = [1, 1]} : vector<32x290xbf16> to vector<32x256xbf16>
    %179 = vector.broadcast %26 : vector<1x256xbf16> to vector<32x256xbf16>
    %180 = arith.mulf %178, %179 : vector<32x256xbf16>
    %181 = tpu.concatenate %162, %163, %166, %169, %170, %173, %176, %177, %180 in 0 : vector<32x256xbf16>, vector<32x256xbf16>, vector<32x256xbf16>, vector<32x256xbf16>, vector<32x256xbf16>, vector<32x256xbf16>, vector<32x256xbf16>, vector<32x256xbf16>, vector<32x256xbf16> -> vector<288x256xbf16>
    %c0_34 = arith.constant 0 : index
    %c0_35 = arith.constant 0 : index
    %182 = vector.load %arg10[%c0_34, %c0_35] : memref<24x288xbf16, #tpu.memory_space<vmem>>, vector<24x288xbf16>
    %cst_36 = arith.constant dense<0.000000e+00> : vector<24x256xf32>
    %183 = tpu.matmul %182, %181, %cst_36 {dimension_numbers = #tpu.dot_dimension_numbers<[1], [0], [0], [1], [0, 0, 1, 1], [], []>} : vector<24x288xbf16>, vector<288x256xbf16>, vector<24x256xf32> -> vector<24x256xf32>
    %c0_37 = arith.constant 0 : index
    %c0_38 = arith.constant 0 : index
    %184 = vector.load %arg11[%c0_37, %c0_38] : memref<24x1xf32, #tpu.memory_space<vmem>>, vector<24x1xf32>
    %185 = vector.broadcast %184 : vector<24x1xf32> to vector<24x256xf32>
    %186 = arith.addf %183, %185 : vector<24x256xf32>
    %187 = math.tanh %186 : vector<24x256xf32>
    %188 = vector.extract_strided_slice %28 {offsets = [0, 0], sizes = [3, 256], strides = [1, 1]} : vector<8x256xf32> to vector<3x256xf32>
    %189 = vector.extract_strided_slice %187 {offsets = [0, 0], sizes = [3, 256], strides = [1, 1]} : vector<24x256xf32> to vector<3x256xf32>
    %190 = arith.mulf %188, %188 : vector<3x256xf32>
    %191 = arith.subf %190, %188 : vector<3x256xf32>
    %192 = arith.mulf %189, %191 : vector<3x256xf32>
    %193 = arith.addf %188, %192 : vector<3x256xf32>
    %194 = vector.extract_strided_slice %187 {offsets = [3, 0], sizes = [3, 256], strides = [1, 1]} : vector<24x256xf32> to vector<3x256xf32>
    %195 = arith.mulf %193, %193 : vector<3x256xf32>
    %196 = arith.subf %195, %193 : vector<3x256xf32>
    %197 = arith.mulf %194, %196 : vector<3x256xf32>
    %198 = arith.addf %193, %197 : vector<3x256xf32>
    %199 = vector.extract_strided_slice %187 {offsets = [6, 0], sizes = [3, 256], strides = [1, 1]} : vector<24x256xf32> to vector<3x256xf32>
    %200 = arith.mulf %198, %198 : vector<3x256xf32>
    %201 = arith.subf %200, %198 : vector<3x256xf32>
    %202 = arith.mulf %199, %201 : vector<3x256xf32>
    %203 = arith.addf %198, %202 : vector<3x256xf32>
    %204 = vector.extract_strided_slice %187 {offsets = [9, 0], sizes = [3, 256], strides = [1, 1]} : vector<24x256xf32> to vector<3x256xf32>
    %205 = arith.mulf %203, %203 : vector<3x256xf32>
    %206 = arith.subf %205, %203 : vector<3x256xf32>
    %207 = arith.mulf %204, %206 : vector<3x256xf32>
    %208 = arith.addf %203, %207 : vector<3x256xf32>
    %209 = vector.extract_strided_slice %187 {offsets = [12, 0], sizes = [3, 256], strides = [1, 1]} : vector<24x256xf32> to vector<3x256xf32>
    %210 = arith.mulf %208, %208 : vector<3x256xf32>
    %211 = arith.subf %210, %208 : vector<3x256xf32>
    %212 = arith.mulf %209, %211 : vector<3x256xf32>
    %213 = arith.addf %208, %212 : vector<3x256xf32>
    %214 = vector.extract_strided_slice %187 {offsets = [15, 0], sizes = [3, 256], strides = [1, 1]} : vector<24x256xf32> to vector<3x256xf32>
    %215 = arith.mulf %213, %213 : vector<3x256xf32>
    %216 = arith.subf %215, %213 : vector<3x256xf32>
    %217 = arith.mulf %214, %216 : vector<3x256xf32>
    %218 = arith.addf %213, %217 : vector<3x256xf32>
    %219 = vector.extract_strided_slice %187 {offsets = [18, 0], sizes = [3, 256], strides = [1, 1]} : vector<24x256xf32> to vector<3x256xf32>
    %220 = arith.mulf %218, %218 : vector<3x256xf32>
    %221 = arith.subf %220, %218 : vector<3x256xf32>
    %222 = arith.mulf %219, %221 : vector<3x256xf32>
    %223 = arith.addf %218, %222 : vector<3x256xf32>
    %224 = vector.extract_strided_slice %187 {offsets = [21, 0], sizes = [3, 256], strides = [1, 1]} : vector<24x256xf32> to vector<3x256xf32>
    %225 = arith.mulf %223, %223 : vector<3x256xf32>
    %226 = arith.subf %225, %223 : vector<3x256xf32>
    %227 = arith.mulf %224, %226 : vector<3x256xf32>
    %228 = arith.addf %223, %227 : vector<3x256xf32>
    %229 = vector.shape_cast %228 : vector<3x256xf32> to vector<1x3x256xf32>
    %c0_39 = arith.constant 0 : index
    %c0_40 = arith.constant 0 : index
    %c0_41 = arith.constant 0 : index
    %230 = vector.load %arg12[%c0_39, %c0_40, %c0_41] : memref<1x3x256xf32, #tpu.memory_space<vmem>>, vector<1x3x256xf32>
    tpu.vector_store %arg12[%c0_39, %c0_40, %c0_41], %229 {strides = array<i32>} : memref<1x3x256xf32, #tpu.memory_space<vmem>>, vector<1x3x256xf32>,
    %231 = vector.shape_cast %187 : vector<24x256xf32> to vector<1x24x256xf32>
    %c0_42 = arith.constant 0 : index
    %c0_43 = arith.constant 0 : index
    %c0_44 = arith.constant 0 : index
    %232 = vector.load %arg13[%c0_42, %c0_43, %c0_44] : memref<1x24x256xf32, #tpu.memory_space<vmem>>, vector<1x24x256xf32>
    tpu.vector_store %arg13[%c0_42, %c0_43, %c0_44], %231 {strides = array<i32>} : memref<1x24x256xf32, #tpu.memory_space<vmem>>, vector<1x24x256xf32>,
    return
  }
  func.func @transform_0(%arg0: i32) -> (i32, i32, i32) {
    %c0_i32 = arith.constant 0 : i32
    %c0_i32_0 = arith.constant 0 : i32
    %c0_i32_1 = arith.constant 0 : i32
    return %arg0, %c0_i32, %c0_i32_0 : i32, i32, i32
  }
  func.func @transform_1(%arg0: i32) -> (i32, i32) {
    %c0_i32 = arith.constant 0 : i32
    %c0_i32_0 = arith.constant 0 : i32
    %c0_i32_1 = arith.constant 0 : i32
    return %c0_i32, %c0_i32_0 : i32, i32
  }
  func.func @transform_2(%arg0: i32) -> (i32, i32) {
    %c0_i32 = arith.constant 0 : i32
    %c0_i32_0 = arith.constant 0 : i32
    %c0_i32_1 = arith.constant 0 : i32
    return %c0_i32, %c0_i32_0 : i32, i32
  }
  func.func @transform_3(%arg0: i32) -> (i32, i32) {
    %c0_i32 = arith.constant 0 : i32
    %c0_i32_0 = arith.constant 0 : i32
    %c0_i32_1 = arith.constant 0 : i32
    return %c0_i32, %c0_i32_0 : i32, i32
  }
  func.func @transform_4(%arg0: i32) -> (i32, i32) {
    %c0_i32 = arith.constant 0 : i32
    %c0_i32_0 = arith.constant 0 : i32
    %c0_i32_1 = arith.constant 0 : i32
    return %c0_i32, %c0_i32_0 : i32, i32
  }
  func.func @transform_5(%arg0: i32) -> (i32, i32) {
    %c0_i32 = arith.constant 0 : i32
    %c0_i32_0 = arith.constant 0 : i32
    %c0_i32_1 = arith.constant 0 : i32
    return %c0_i32, %c0_i32_0 : i32, i32
  }
  func.func @transform_6(%arg0: i32) -> (i32, i32) {
    %c0_i32 = arith.constant 0 : i32
    %c0_i32_0 = arith.constant 0 : i32
    %c0_i32_1 = arith.constant 0 : i32
    return %c0_i32, %c0_i32_0 : i32, i32
  }
  func.func @transform_7(%arg0: i32) -> (i32, i32) {
    %c0_i32 = arith.constant 0 : i32
    %c0_i32_0 = arith.constant 0 : i32
    %c0_i32_1 = arith.constant 0 : i32
    return %c0_i32, %c0_i32_0 : i32, i32
  }
  func.func @transform_8(%arg0: i32) -> (i32, i32) {
    %c0_i32 = arith.constant 0 : i32
    %c0_i32_0 = arith.constant 0 : i32
    %c0_i32_1 = arith.constant 0 : i32
    return %c0_i32, %c0_i32_0 : i32, i32
  }
  func.func @transform_9(%arg0: i32) -> (i32, i32) {
    %c0_i32 = arith.constant 0 : i32
    %c0_i32_0 = arith.constant 0 : i32
    %c0_i32_1 = arith.constant 0 : i32
    return %c0_i32, %c0_i32_0 : i32, i32
  }
  func.func @transform_10(%arg0: i32) -> (i32, i32) {
    %c0_i32 = arith.constant 0 : i32
    %c0_i32_0 = arith.constant 0 : i32
    %c0_i32_1 = arith.constant 0 : i32
    return %c0_i32, %c0_i32_0 : i32, i32
  }
  func.func @transform_11(%arg0: i32) -> (i32, i32, i32) {
    %c0_i32 = arith.constant 0 : i32
    %c0_i32_0 = arith.constant 0 : i32
    %c0_i32_1 = arith.constant 0 : i32
    return %arg0, %c0_i32, %c0_i32_0 : i32, i32, i32
  }
  func.func @transform_12(%arg0: i32) -> (i32, i32, i32) {
    %c0_i32 = arith.constant 0 : i32
    %c0_i32_0 = arith.constant 0 : i32
    %c0_i32_1 = arith.constant 0 : i32
    return %arg0, %c0_i32, %c0_i32_0 : i32, i32, i32
  }
}

</mosaic_0001>

<bundles_post_ra>
// kernel: tpu_custom_call.1
= control target key start
LH: loop header
LB: loop body
LE: loop exit
PB: predicated region body
PF: predicated region fallthrough
CT: control target
= control target key end

     0   :  { %s6485_s0 = inlined_call_operand.hbm [shape: f32[2,8,256], index: 0, kind: input, shape index: {}]   ;;  %s6486_s1 = inlined_call_operand.hbm [shape: bf16[32,72], index: 1, kind: input, shape index: {}]   ;;  %s6487_s2 = inlined_call_operand.vmem [shape: f32[32,1], index: 2, kind: input, shape index: {}]   ;;  %s6488_s3 = inlined_call_operand.vmem [shape: bf16[32,288], index: 3, kind: input, shape index: {}]   ;;  %s6489_s4 = inlined_call_operand.vmem [shape: f32[32,1], index: 4, kind: input, shape index: {}]   ;;  %s6490_s5 = inlined_call_operand.vmem [shape: bf16[32,288], index: 5, kind: input, shape index: {}]   ;;  %s6491_s6 = inlined_call_operand.vmem [shape: f32[32,1], index: 6, kind: input, shape index: {}]   ;;  %s6492_s7 = inlined_call_operand.vmem [shape: bf16[32,288], index: 7, kind: input, shape index: {}]   ;;  %s6493_s8 = inlined_call_operand.vmem [shape: f32[32,1], index: 8, kind: input, shape index: {}]   ;;  %s6494_s9 = inlined_call_operand.hbm [shape: bf16[24,288], index: 9, kind: input, shape index: {}]   ;;  %s6495_s10 = inlined_call_operand.vmem [shape: f32[24,1], index: 10, kind: input, shape index: {}]   ;;  %s6496_s11 = inlined_call_operand.vmem [shape: f32[2,3,256], index: 11, kind: output, shape index: {0}]   ;;  %s6497_s12 = inlined_call_operand.hbm [shape: f32[2,24,256], index: 12, kind: output, shape index: {1}]  }
   0x1   :  { %6520 = sst [smem:[#allocation17_spill]] %s6486_s1 }
   0x2   :  { %6521 = sst [smem:[#allocation18_spill]] %s6494_s9 }
   0x3   :  { %18 = vsyncpa [#allocation3], 0 }
   0x4   :  { %20 = vsyncpa [#allocation3 + $0x1], 0 }
   0x5   :  { %21 = vsyncpa [#allocation6], 0 }
   0x6   :  { %22 = vsyncpa [#allocation4], 0 }
   0x7   :  { %24 = vsyncpa [#allocation4 + $0x1], 0  ;;  %s4415_s21 = smov 0   ;;  %s4417_s22 = smov 0  }
   0x8   :  { %s4419_s23 = smov 0   ;;  %s4421_s24 = smov 0  }
   0x9 LB: > { %6522 = sst [smem:[#allocation12_spill]] %s4313_s21  ;;  %s4439_s28 = sadd.s32 4294967295, %s4325_s24   ;;  %s4325_s24 = sphi %s4421_s24, %s6550_s24   ;;  %s4321_s23 = sphi %s4419_s23, %s6552_s23   ;;  %s4317_s22 = sphi %s4417_s22, %s6554_s22   ;;  %s4313_s21 = sphi %s4415_s21, %s6553_s21  }
   0xa   : > { %6523 = sst [smem:[#allocation13_spill]] %s4321_s23  ;;  %p3866_p0 = scmp.ge.s32.totalorder %s4325_s24, 1 }
   0xb   : > { %s6524_s1 = sld [smem:[#allocation17_spill]]  ;;  %p51_p1 = scmp.eq.s32.totalorder %s4439_s28, 0 }
   0xc   : > { %p323_p2 = scmp.lt.s32.totalorder %s4325_s24, 3  ;;  %s4327_s30 = smov [#allocation5]  }
   0xd   : > { %s336_s13 = sshll.u32 %s4327_s30, 4  ;;  %s6526_s9 = sld [smem:[#allocation18_spill]]  ;;  %s337_s13 = int_to_ptr.vmem [resolvable:$true] %s336_s13 }
   0xe   : > { %p4444_p3 = pnand %p3866_p0, %p323_p2  ;;  %s4328_s17 = smov [#allocation7]  }
   0xf   : > { %s371_s18 = sshll.u32 %s4328_s17, 4  ;;  %s4329_s19 = smov 64   ;;  %s372_s18 = int_to_ptr.vmem [resolvable:$true] %s371_s18 }
  0x10   : > { %p4047_p4 = pneg %p4444_p3  ;;  %s4330_s20 = smov 4  }
  0x11   : > { %s334_s27 = sshll.u32 %s6524_s1, 4  ;;  %s4331_s25 = smov 192   ;;  %s335_s27 = int_to_ptr.hbm [resolvable:$true] %s334_s27 }
  0x12   : > { %p4048_p6 = pnand %p4047_p4, %p51_p1  ;;  %s4332_s26 = smov 12  }
  0x13   : > { %s369_s16 = sshll.u32 %s6526_s9, 4  ;;  %s3865_s30 = sadd.s32 4294967294, %s4325_s24   ;;  %s370_s16 = int_to_ptr.hbm [resolvable:$true] %s369_s16 }
  0x14   : > { %4050 = dma.hbm_to_vmem [thread:$0]  (!%p4048_p6), %s335_s27, 256, %s337_s13, [#allocation6], %s4329_s19, %s4329_s19, %s4330_s20  }
  0x15   : > { %4053 = dma.hbm_to_vmem [thread:$0]  (!%p4048_p6), %s370_s16, 576, %s372_s18, [#allocation6], %s4331_s25, %s4331_s25, %s4332_s26  }
  0x16   : > { %s4458_s14 = sadd.s32 1, %s4325_s24   ;;  %s37_s1 = sadd.s32 1, %s4321_s23 }
  0x17   : > { %6527 = sst [smem:[#allocation14_spill]] %s4458_s14  ;;  %s34_s15 = ssub.s32 %s4325_s24, %s4458_s14 }
  0x18   : > { %p35_p7 = scmp.eq.s32.totalorder %s34_s15, 0  ;;  %p44_p8 = scmp.ne.s32.totalorder %s4321_s23, %s4317_s22 }
  0x19   : > { %p45_p9 = scmp.eq.s32.totalorder %s4325_s24, 0  ;;  %p50_p10 = scmp.ne.s32.totalorder %s4317_s22, %s4313_s21 }
  0x1a   : > { %s4469_s17 = scalar_select %p35_p7, %s4321_s23, %s37_s1  }
  0x1b   : > { %p4471_p11 = por %p45_p9, %p44_p8  ;;  %p4477_p12 = por %p51_p1, %p50_p10 }
  0x1c   : > { %6528 = sst [smem:[#allocation15_spill]] %s4469_s17  ;;  %p310_p13 = scmp.eq.s32.totalorder %s4439_s28, 1 }
  0x1d   : > { %p316_p0 = scmp.eq.s32.totalorder %s3865_s30, 1  ;;  %p4064_p2 = scmp.lt.s32.totalorder %s4325_s24, 2 }
  0x1e   : > { %s388_s16 = sand.u32 1, %s4321_s23   ;;  %p4484_p4 = por %p310_p13, %p44_p8 }
  0x1f   : > { %p4488_p6 = por %p316_p0, %p50_p10  ;;  %s3870_s19 = sshll.u32 %s388_s16, 4 }
  0x20   : > { %s3998_s20 = sshll.u32 %s4325_s24, 4  ;;  %s392_s9 = scalar_lea.vmem [#allocation2], %s3870_s19 }
  0x21   : > { %s6532_s1 = scalar_select %p4488_p6, 1, 0 }
  0x22   : > { %s397_s15 = scalar_lea.hbm %s6485_s0, %s3998_s20  ;;  %s401_s17 = sshll.u32 %s392_s9, 4  ;;  %s402_s17 = int_to_ptr.vmem [resolvable:$true] %s401_s17 }
  0x23   : > { %6533 = sst [smem:[#allocation16_spill]] %s6532_s1  ;;  %s399_s14 = sshll.u32 %s397_s15, 4  ;;  %s400_s14 = int_to_ptr.hbm [resolvable:$true] %s399_s14 }
  0x24   : > { %p4498_p7 = pnand %p4064_p2, %p4471_p11  ;;  %s389_s23 = scalar_lea.sflag [#allocation3], %s388_s16 }
  0x25   : > { %s4225_s21 = sshra.s32 %s400_s14, 4  ;;  %s4232_s20 = scalar_lea.hbm %s6485_s0, 32  ;;  %s4226_s21 = int_to_ptr.hbm [resolvable:$true] %s4225_s21 }
  0x26   : > { %s4227_s1 = scalar_lea.hbm %s4226_s21, 16  ;;  %p4229_p9 = pneg %p4498_p7 }
  0x27   : > { %p4228_p8 = scmp.ne.s32.totalorder %s4226_s21, %s4227_s1  ;;  %p4233_p11 = scmp.lt.s32.totalorder %s4226_s21, %s6485_s0 }
  0x28   : > { %p4234_p0 = scmp.lt.s32.totalorder %s4232_s20, %s4227_s1 }
  0x29   : > { %p4230_p10 = pnand %p4229_p9, %p4228_p8 }
  0x2a   : > { %p4235_p2 = por %p4234_p0, %p4233_p11 }
  0x2b   : > { %p4231_p13 = pneg %p4230_p10 }
  0x2d   : > { %p4236_p5 = pnand %p4235_p2, %p4231_p13 }
  0x2f   : > { %4239 = shalt.err (!%p4236_p5)
}
  0x30   : > { %4057 = dma.hbm_to_vmem [thread:$0]  (!%p4498_p7), %s400_s14, 256, %s402_s17, %s389_s23  }
  0x31   : > { %410 = sbr.rel (%p4444_p3) target bundleno = 2622 (0xa3e), region = 64  ;;  %s4515_s16 = sand.u32 (!%p4444_p3), 1, %s4317_s22  }
  0x32   : > { %s3874_s26 = sshll.u32 (!%p4444_p3), %s4515_s16, 4  ;;  %s413_s15 = scalar_lea.sflag (!%p4444_p3), [#allocation3], %s4515_s16 }
  0x33   : > { %s4519_s19 = scalar_lea.vmem (!%p4444_p3), [#allocation2], %s3874_s26 }
  0x36   : > { %4300 = dma.done.wait (%p4477_p12), %s413_s15, 256  }
  0x37   : > { %4302 = vsyncadd (%p4477_p12), %s413_s15, 4294967040 }
  0x38   : > { %4304 = dma.done.wait (%p51_p1), [#allocation6], 832  }
  0x39   : > { %4306 = vsyncadd (%p51_p1), [#allocation6], 4294966464  ;;  %v479_v0 = vlaneseq  ;;  %v4333_v5 = vmov 0.0   ;;  %v520_v7 = vld [vmem:[%s4519_s19] sm:$0xff]  ;;  %v521_v8 = vld [vmem:[%s4519_s19 + $0x8] sm:$0xff]  ;;  %s4334_s21 = smov 34  }
  0x3a   : > { %v522_v9 = vpack.c.bf16 %v521_v8, %v520_v7  ;;  %s4335_s23 = smov 18   ;;  %s4336_s29 = smov 17   ;;  %vm532_vm4 = vcmask 138240   ;;  %vm617_vm5 = vcmask 277504   ;;  %vm603_vm6 = vcmask 261120  }
  0x3b   : > { %v480_v1 = vand.u32 127, %v479_v0  ;;  %s4337_s14 = smov 32   ;;  %s4338_s17 = smov 2   ;;  %vm589_vm7 = vcmask 146432   ;;  %vm559_vm8 = vcmask 15360   ;;  %vm575_vm9 = vcmask 130048  }
  0x3c   : > { %v524_v12 = vunpack.c.l.b16 %v522_v9  ;;  %v525_v16 = vunpack.c.h.b16 %v522_v9  ;;  %s6503_s13 = smov 16   ;;  %s6508_s1 = smov 111   ;;  %vm746_vm10 = vcmask 769024   ;;  %vm749_vm11 = vcmask 1043456  }
  0x3d   : > { %v481_v2 = vadd.s32 128, %v480_v1  ;;  %v486_v3 = vand.u32 15, %v480_v1  ;;  %s6516_s30 = smov 95   ;;  %s6504_s9 = smov 94   ;;  %vm729_vm12 = vcmask 777216   ;;  %vm720_vm13 = vcmask 785408  }
  0x3e   : > { %v526_v13 = vpack.c.b16 %v524_v12, %v524_v12  ;;  %v527_v18 = vpack.c.b16 %v525_v16, %v525_v16  ;;  %s6510_s20 = smov 96   ;;  %s6506_s25 = smov 110   ;;  %vm686_vm14 = vcmask 908288   ;;  %vm703_vm15 = vcmask 900096  }
  0x3f   : > { %v493_v4 = vand.u32 15, %v481_v2  ;;  %vm513_vm0 = vcmp.le.s32.totalorder %v486_v3, 14  ;;  %vm506_vm2 = vcmp.ge.s32.totalorder %v486_v3, 1  ;;  %s6512_s27 = smov 126   ;;  %s6514_s26 = smov 112  }
  0x40   : > { %v3881_v6 = vsel %vm513_vm0, 1.0, %v4333_v5  ;;  %v4531_v14 = vsel %vm506_vm2, 1.0, %v4333_v5  ;;  %528 = vrot.lane.b32.xlu0 %v526_v13, %s4336_s29  ;;  %s6518_s15 = smov 127   ;;  %vm660_vm0 = vcmask 1031168   ;;  %vm643_vm2 = vcmask 1039360  }
  0x41   : > { %vm514_vm1 = vcmp.le.s32.totalorder %v493_v4, 14  ;;  %vm507_vm3 = vcmp.ge.s32.totalorder %v493_v4, 1 }
  0x42   : > { %v3882_v10 = vsel %vm514_vm1, 1.0, %v4333_v5  ;;  %v4533_v15 = vsel %vm507_vm3, 1.0, %v4333_v5  ;;  %vm677_vm1 = vcmask 916480   ;;  %vm820_vm3 = vcmask 588800  }
  0x43   : > { %v4123_v11 = vpack.i.bf16 %v3882_v10, %v3881_v6  ;;  %v4128_v17 = vpack.i.bf16 %v4533_v15, %v4531_v14 }
  0x45   : > { %4124 = vrot.lane.b32.xlu1 %v4123_v11, %s4334_s21  ;;  %4134 = vrot.lane.b32.xlu2 %v4123_v11, %s4335_s23 }
  0x48   : > { %530 = vrot.lane.b32.xlu0 %v527_v18, %s4336_s29 }
  0x4d   : > { %4129 = vrot.lane.b32.xlu1 %v4128_v17, %s4337_s14  ;;  %4139 = vrot.lane.b32.xlu2 %v4123_v11, %s4338_s17  ;;  %s4275_s17 = scalar_lea.hbm %s6497_s12, 96 }
  0x50   : > { %4144 = vrot.lane.b32.xlu0 %v4128_v17, %s6503_s13  ;;  %s6535_s13 = smov 94  }
  0x9f   : > { %v4135_v36 = vpop.permute.xlu2 %4134 }
  0xa0   : > { %v4593_v42 = vunpack.i.h.bf16 %v4135_v36  ;;  %v4598_v47 = vunpack.i.l.bf16 %v4135_v36 }
  0xa2   : > { %v4609_v51 = vsel %vm589_vm7, %v4598_v47, %v4593_v42 }
  0xa7   : > { %v4140_v55 = vpop.permute.xlu2 %4139 }
  0xa8   : > { %v4616_v58 = vunpack.i.h.bf16 %v4140_v55  ;;  %v4624_v0 = vunpack.i.l.bf16 %v4140_v55 }
  0xaa   : > { %v4632_v5 = vsel %vm559_vm8, %v4624_v0, %v4616_v58 }
  0xb2   : > { %v529_v20 = vpop.permute.xlu0 %528 }
  0xb3   : > { %v4541_v21 = vsel %vm532_vm4, 0, %v529_v20 }
  0xb4   : > { %680 = vrot.lane.b32.xlu1 %v4541_v21, %s6508_s1  ;;  %v4552_v26 = vunpack.c.l.bf16 %v4541_v21  ;;  %v634_v28 = vrot.slane %v4541_v21, 4 }
  0xb6   : > { %v547_v59 = vmul.f32 %v4531_v14, %v4552_v26  ;;  %v594_v63 = vmul.f32 %v4598_v47, %v4552_v26  ;;  %v564_v18 = vmul.f32 %v4624_v0, %v4552_v26 }
  0xb7   : > { %v4125_v19 = vpop.permute.xlu1 %4124 }
  0xb8   : > { %v4545_v22 = vunpack.i.h.bf16 %v4125_v19  ;;  %v4547_v24 = vunpack.i.l.bf16 %v4125_v19 }
  0xba   : > { %v531_v27 = vpop.permute.xlu0 %530  ;;  %v4565_v32 = vsel %vm617_vm5, %v4547_v24, %v4545_v22  ;;  %v622_v37 = vmul.f32 %v4547_v24, %v4552_v26 }
  0xbb   : > { %v4558_v30 = vsel %vm532_vm4, %v531_v27, 0  ;;  %v4561_v31 = vsel %vm532_vm4, %v529_v20, %v531_v27 }
  0xbc   : > { %723 = vrot.lane.b32.xlu1 %v634_v28, %s6516_s30  ;;  %684 = vrot.lane.b32.xlu0 %v4558_v30, %s6508_s1  ;;  %v4573_v33 = vunpack.c.l.bf16 %v4558_v30  ;;  %v4576_v34 = vunpack.c.l.bf16 %v4561_v31  ;;  %v636_v43 = vrot.slane %v4558_v30, 4  ;;  %v635_v48 = vrot.slane %v4561_v31, 4 }
  0xbd   : > { %682 = vrot.lane.b32.xlu2 %v4561_v31, %s6508_s1 }
  0xbe   : > { %v623_v38 = vmul.f32 %v4565_v32, %v4576_v34  ;;  %v624_v39 = vmul.f32 %v4545_v22, %v4573_v33  ;;  %v595_v57 = vmul.f32 %v4609_v51, %v4576_v34  ;;  %v548_v60 = vmul.f32 %v4533_v15, %v4576_v34 }
  0xbf   : > { %v4130_v23 = vpop.permute.xlu1 %4129  ;;  %v596_v8 = vmul.f32 %v4593_v42, %v4573_v33  ;;  %v565_v11 = vmul.f32 %v4632_v5, %v4576_v34 }
  0xc0   : > { %v4549_v25 = vunpack.i.h.bf16 %v4130_v23  ;;  %v4555_v29 = vunpack.i.l.bf16 %v4130_v23  ;;  %v625_v40 = vpack.c.bf16 %v623_v38, %v622_v37  ;;  %v626_v45 = vpack.c.bf16 %v624_v39, %v624_v39 }
  0xc1   : > { %v4626_v2 = vpack.c.bf16 %v548_v60, %v547_v59  ;;  %v597_v4 = vpack.c.bf16 %v595_v57, %v594_v63  ;;  %v598_v17 = vpack.c.bf16 %v596_v8, %v596_v8  ;;  %v567_v23 = vpack.c.bf16 %v565_v11, %v564_v18 }
  0xc2   : > { %v4583_v35 = vsel %vm603_vm6, %v4555_v29, %v4549_v25  ;;  %v734_v44 = vunpack.c.l.b16 %v625_v40  ;;  %v608_v46 = vmul.f32 %v4555_v29, %v4552_v26  ;;  %v736_v52 = vunpack.c.l.b16 %v626_v45  ;;  %v4145_v6 = vpop.permute.xlu0 %4144 }
  0xc3   : > { %v609_v41 = vmul.f32 %v4583_v35, %v4576_v34  ;;  %v610_v53 = vmul.f32 %v4549_v25, %v4573_v33  ;;  %v735_v54 = vunpack.c.h.b16 %v625_v40  ;;  %v691_v10 = vunpack.c.l.b16 %v597_v4 }
  0xc4   : > { %727 = vrot.lane.b32.xlu0 %v636_v43, %s6516_s30  ;;  %v737_v49 = vpack.c.b16 %v734_v44, %v734_v44  ;;  %v739_v61 = vpack.c.b16 %v736_v52, %v736_v52  ;;  %v4639_v12 = vunpack.i.h.bf16 %v4145_v6  ;;  %v4641_v13 = vunpack.i.l.bf16 %v4145_v6 }
  0xc5   : > { %v611_v50 = vpack.c.bf16 %v609_v41, %v608_v46  ;;  %725 = vrot.lane.b32.xlu2 %v635_v48, %s6516_s30  ;;  %v612_v62 = vpack.c.bf16 %v610_v53, %v610_v53  ;;  %v738_v1 = vpack.c.b16 %v735_v54, %v735_v54  ;;  %v694_v20 = vpack.c.b16 %v691_v10, %v691_v10 }
  0xc6   : > { %740 = vrot.lane.b32.xlu1 %v737_v49, %s6504_s9  ;;  %v4649_v27 = vsel %vm575_vm9, %v4641_v13, %v4639_v12  ;;  %v693_v36 = vunpack.c.l.b16 %v598_v17  ;;  %v566_v37 = vmul.f32 %v4616_v58, %v4573_v33  ;;  %v692_v38 = vunpack.c.h.b16 %v597_v4 }
  0xc7   : > { %v708_v56 = vunpack.c.l.b16 %v611_v50  ;;  %v710_v7 = vunpack.c.l.b16 %v612_v62  ;;  %v709_v9 = vunpack.c.h.b16 %v611_v50  ;;  %v648_v39 = vunpack.c.l.b16 %v567_v23 }
  0xc8   : > { %v580_v40 = vmul.f32 %v4641_v13, %v4552_v26  ;;  %v581_v41 = vmul.f32 %v4649_v27, %v4576_v34  ;;  %v696_v44 = vpack.c.b16 %v693_v36, %v693_v36  ;;  %v568_v45 = vpack.c.bf16 %v566_v37, %v566_v37 }
  0xc9   : > { %v711_v3 = vpack.c.b16 %v708_v56, %v708_v56  ;;  %v713_v16 = vpack.c.b16 %v710_v7, %v710_v7  ;;  %v712_v19 = vpack.c.b16 %v709_v9, %v709_v9  ;;  %v695_v46 = vpack.c.b16 %v692_v38, %v692_v38 }
  0xca   : > { %v651_v49 = vpack.c.b16 %v648_v39, %v648_v39  ;;  %v583_v50 = vpack.c.bf16 %v581_v41, %v580_v40  ;;  %v650_v52 = vunpack.c.l.b16 %v568_v45  ;;  %v582_v53 = vmul.f32 %v4639_v12, %v4573_v33  ;;  %v788_v41 = vld [vmem:[%s6487_s2 + $0x10] sm:$0xff] }
  0xcb   : > { %v649_v26 = vunpack.c.h.b16 %v567_v23 }
  0xcc   : > { %744 = vrot.lane.b32.xlu0 %v739_v61, %s6504_s9  ;;  %v665_v54 = vunpack.c.l.b16 %v583_v50  ;;  %v653_v55 = vpack.c.b16 %v650_v52, %v650_v52  ;;  %v584_v34 = vpack.c.bf16 %v582_v53, %v582_v53  ;;  %v666_v60 = vunpack.c.h.b16 %v583_v50 }
  0xcd   : > { %742 = vrot.lane.b32.xlu2 %v738_v1, %s6504_s9  ;;  %v652_v56 = vpack.c.b16 %v649_v26, %v649_v26 }
  0xce   : > { %714 = vrot.lane.b32.xlu1 %v711_v3, %s6510_s20  ;;  %v668_v57 = vpack.c.b16 %v665_v54, %v665_v54  ;;  %v667_v59 = vunpack.c.l.b16 %v584_v34  ;;  %v669_v62 = vpack.c.b16 %v666_v60, %v666_v60  ;;  %v786_v54 = vld [vmem:[%s6487_s2] sm:$0xff]  ;;  %v628_v60 = vunpack.c.l.b16 %v4626_v2 }
  0xd0   : > { %v670_v61 = vpack.c.b16 %v667_v59, %v667_v59 }
  0xd4   : > { %718 = vrot.lane.b32.xlu0 %v713_v16, %s6510_s20 }
  0xd5   : > { %716 = vrot.lane.b32.xlu2 %v712_v19, %s6510_s20 }
  0xd6   : > { %697 = vrot.lane.b32.xlu1 %v694_v20, %s6506_s25 }
  0xdc   : > { %701 = vrot.lane.b32.xlu0 %v696_v44, %s6506_s25  ;;  %v4348_v44 = vmov 0  }
  0xdd   : > { %699 = vrot.lane.b32.xlu2 %v695_v46, %s6506_s25  ;;  %4148 = vset.pattern.permute.xlu1 %v4348_v44 }
  0xde   : > { %654 = vrot.lane.b32.xlu1 %v651_v49, %s6512_s27  ;;  %4150 = vset.pattern.permute.xlu0 %v4348_v44 }
  0xdf   : > { %4149 = vset.pattern.permute.xlu2 %v4348_v44 }
  0xe4   : > { %658 = vrot.lane.b32.xlu0 %v653_v55, %s6512_s27  ;;  %v787_v55 = vld [vmem:[%s6487_s2 + $0x8] sm:$0xff] }
  0xe5   : > { %656 = vrot.lane.b32.xlu2 %v652_v56, %s6512_s27 }
  0xe6   : > { %671 = vrot.lane.b32.xlu1 %v668_v57, %s6514_s26 }
  0xec   : > { %675 = vrot.lane.b32.xlu0 %v670_v61, %s6514_s26  ;;  %v789_v61 = vld [vmem:[%s6487_s2 + $0x18] sm:$0xff] }
  0xed   : > { %673 = vrot.lane.b32.xlu2 %v669_v62, %s6514_s26 }
  0xee   : > { %637 = vrot.lane.b32.xlu1 %v634_v28, %s6518_s15 }
  0xf4   : > { %641 = vrot.lane.b32.xlu0 %v636_v43, %s6518_s15 }
  0xf5   : > { %639 = vrot.lane.b32.xlu2 %v635_v48, %s6518_s15 }
  0xf6   : > { %802 = vperm.xlu1 %4148, %v788_v41  }
  0xfc   : > { %792 = vperm.xlu0 %4150, %v786_v54  }
  0xfd   : > { %807 = vperm.xlu2 %4149, %v789_v61  }
  0xfe   : > { %797 = vperm.xlu1 %4148, %v787_v55  }
 0x117   : > { %v683_v33 = vpop.permute.xlu2 %682 }
 0x11f   : > { %v726_v63 = vpop.permute.xlu2 %725 }
 0x126   : > { %v681_v1 = vpop.permute.xlu1 %680 }
 0x127   : > { %v743_v3 = vpop.permute.xlu2 %742  ;;  %v687_v37 = vsel %vm686_vm14, %v681_v1, %v683_v33 }
 0x12e   : > { %v685_v4 = vpop.permute.xlu0 %684  ;;  %v724_v6 = vpop.permute.xlu1 %723 }
 0x12f   : > { %v717_v8 = vpop.permute.xlu2 %716  ;;  %v730_v10 = vsel %vm729_vm12, %v724_v6, %v726_v63  ;;  %v688_v46 = vsel %vm686_vm14, %v683_v33, %v685_v4  ;;  %v630_v6 = vpack.c.b16 %v628_v60, %v628_v60 }
 0x136   : > { %v728_v7 = vpop.permute.xlu0 %727 }
 0x137   : > { %v700_v16 = vpop.permute.xlu2 %699  ;;  %v731_v19 = vsel %vm729_vm12, %v726_v63, %v728_v7 }
 0x138   : > { %v741_v21 = vpop.permute.xlu1 %740 }
 0x139   : > { %v747_v28 = vsel %vm746_vm10, %v741_v21, %v743_v3  ;;  %v4000_v21 = vld [vmem:[#allocation5] sm:$0xff] }
 0x13a   : > { %v828_v30 = vsel %vm749_vm11, %v747_v28, 0  ;;  %v629_v28 = vunpack.c.h.b16 %v4626_v2 }
 0x13b   : > { %836 = vmatpush.bf16.msra.mxu0 %v828_v30 }
 0x13e   : > { %v745_v43 = vpop.permute.xlu0 %744 }
 0x13f   : > { %v748_v31 = vsel %vm746_vm10, %v743_v3, %v745_v43  ;;  %v657_v40 = vpop.permute.xlu2 %656  ;;  %v631_v43 = vpack.c.b16 %v629_v28, %v629_v28 }
 0x140   : > { %v715_v48 = vpop.permute.xlu1 %714  ;;  %v831_v9 = vsel %vm749_vm11, %v748_v31, 0 }
 0x141   : > { %v721_v11 = vsel %vm720_vm13, %v715_v48, %v717_v8  ;;  %855 = vmatpush.bf16.msra.mxu1 %v831_v9  ;;  %v4001_v9 = vld [vmem:[#allocation5 + $0x8] sm:$0xff] }
 0x142   : > { %v776_v17 = vsel %vm749_vm11, %v721_v11, %v730_v10 }
 0x143   : > { %837 = vmatpush.bf16.msra.mxu0 %v776_v17 }
 0x146   : > { %v719_v18 = vpop.permute.xlu0 %718 }
 0x147   : > { %v722_v20 = vsel %vm720_vm13, %v717_v8, %v719_v18  ;;  %v674_v53 = vpop.permute.xlu2 %673 }
 0x148   : > { %v698_v23 = vpop.permute.xlu1 %697  ;;  %v780_v36 = vsel %vm749_vm11, %v722_v20, %v731_v19 }
 0x149   : > { %v704_v38 = vsel %vm703_vm15, %v698_v23, %v700_v16  ;;  %856 = vmatpush.bf16.msra.mxu1 %v780_v36 }
 0x14a   : > { %v768_v39 = vsel %vm749_vm11, %v687_v37, %v704_v38 }
 0x14b   : > { %838 = vmatpush.bf16.msra.mxu0 %v768_v39 }
 0x14e   : > { %v702_v45 = vpop.permute.xlu0 %701 }
 0x14f   : > { %v705_v49 = vsel %vm703_vm15, %v700_v16, %v702_v45  ;;  %v640_v1 = vpop.permute.xlu2 %639 }
 0x150   : > { %v655_v50 = vpop.permute.xlu1 %654  ;;  %v772_v52 = vsel %vm749_vm11, %v688_v46, %v705_v49 }
 0x151   : > { %857 = vmatpush.bf16.msra.mxu1 %v772_v52  ;;  %v661_v56 = vsel %vm660_vm0, %v655_v50, %v657_v40 }
 0x156   : > { %v659_v26 = vpop.permute.xlu0 %658 }
 0x157   : > { %v662_v33 = vsel %vm660_vm0, %v657_v40, %v659_v26 }
 0x158   : > { %v672_v34 = vpop.permute.xlu1 %671 }
 0x159   : > { %v678_v57 = vsel %vm677_vm1, %v672_v34, %v674_v53  ;;  %v808_v34 = vpop.permute.xlu2 %807 }
 0x15a   : > { %v760_v59 = vsel %vm749_vm11, %v661_v56, %v678_v57 }
 0x15b   : > { %839 = vmatpush.bf16.msra.mxu0 %v760_v59 }
 0x15e   : > { %v676_v62 = vpop.permute.xlu0 %675 }
 0x15f   : > { %v679_v63 = vsel %vm677_vm1, %v674_v53, %v676_v62 }
 0x160   : > { %v638_v3 = vpop.permute.xlu1 %637  ;;  %v764_v4 = vsel %vm749_vm11, %v662_v33, %v679_v63 }
 0x161   : > { %v644_v7 = vsel %vm643_vm2, %v638_v3, %v640_v1  ;;  %858 = vmatpush.bf16.msra.mxu1 %v764_v4 }
 0x162   : > { %v752_v8 = vsel %vm749_vm11, %v630_v6, %v644_v7 }
 0x163   : > { %840 = vmatpush.bf16.msra.mxu0 %v752_v8 }
 0x166   : > { %v642_v30 = vpop.permute.xlu0 %641  ;;  %3891 = vmatmul.msk.bf16.vlgmr.msra.gmra.mxu0 %vm820_vm3, %v4000_v21 }
 0x167   : > { %v645_v31 = vsel %vm643_vm2, %v640_v1, %v642_v30 }
 0x168   : > { %v756_v48 = vsel %vm749_vm11, %v631_v43, %v645_v31  ;;  %v803_v11 = vpop.permute.xlu1 %802 }
 0x169   : > { %859 = vmatpush.bf16.msra.mxu1 %v756_v48 }
 0x16c   : > { %3893 = vmatmul.msk.bf16.vlgmr.msra.gmra.mxu1 %vm820_vm3, %v4000_v21 }
 0x16e   : > { %v793_v16 = vpop.permute.xlu0 %792 }
 0x170   : > { %v798_v20 = vpop.permute.xlu1 %797 }
 0x176   : > { %3892 = vmatmul.msk.bf16.gmra.mxu0 %vm820_vm3, %v4001_v9 }
 0x17c   : > { %3894 = vmatmul.msk.bf16.gmra.mxu1 %vm820_vm3, %v4001_v9 }
 0x1e3   : > { %v842_v10 = vpop.f32.mrf.mxu0 }
 0x1e4   : > { %v843_v2 = vadd.f32 %v842_v10, %v793_v16 }
 0x1e6   : > { %v871_v23 = vmax.f32 %v843_v2, 0.0 }
 0x1e9   : > { %v861_v17 = vpop.f32.mrf.mxu1 }
 0x1ea   : > { %v862_v19 = vadd.f32 %v861_v17, %v793_v16 }
 0x1eb   : > { %v844_v18 = vpop.f32.mrf.mxu0 }
 0x1ec   : > { %v872_v36 = vmax.f32 %v862_v19, 0.0  ;;  %v845_v37 = vadd.f32 %v844_v18, %v798_v20 }
 0x1ee   : > { %v879_v41 = vpack.c.bf16 %v872_v36, %v871_v23  ;;  %v873_v44 = vmax.f32 %v845_v37, 0.0 }
 0x1f0   : > { %v887_v49 = vunpack.c.l.b16 %v879_v41  ;;  %v888_v50 = vunpack.c.h.b16 %v879_v41 }
 0x1f1   : > { %v863_v38 = vpop.f32.mrf.mxu1 }
 0x1f2   : > { %v864_v39 = vadd.f32 %v863_v38, %v798_v20 }
 0x1f3   : > { %v847_v40 = vpop.f32.mrf.mxu0 }
 0x1f4   : > { %v874_v45 = vmax.f32 %v864_v39, 0.0  ;;  %v848_v59 = vadd.f32 %v847_v40, %v803_v11 }
 0x1f6   : > { %v880_v46 = vpack.c.bf16 %v874_v45, %v873_v44  ;;  %v875_v33 = vmax.f32 %v848_v59, 0.0 }
 0x1f8   : > { %v890_v52 = vunpack.c.h.b16 %v880_v46  ;;  %v889_v53 = vunpack.c.l.b16 %v880_v46 }
 0x1f9   : > { %v866_v26 = vpop.f32.mrf.mxu1 }
 0x1fa   : > { %v896_v54 = vpack.c.b16 %v890_v52, %v888_v50  ;;  %v895_v55 = vpack.c.b16 %v889_v53, %v887_v49  ;;  %v867_v57 = vadd.f32 %v866_v26, %v803_v11 }
 0x1fb   : > { %v849_v56 = vpop.f32.mrf.mxu0 }
 0x1fc   : > { %901 = vrot.lane.b32.xlu0 %v896_v54, %s4336_s29  ;;  %899 = vrot.lane.b32.xlu2 %v895_v55, %s4336_s29  ;;  %v850_v60 = vadd.f32 %v849_v56, %v808_v34  ;;  %v876_v61 = vmax.f32 %v867_v57, 0.0 }
 0x1fe   : > { %v877_v1 = vmax.f32 %v850_v60, 0.0  ;;  %v881_v3 = vpack.c.bf16 %v876_v61, %v875_v33 }
 0x200   : > { %v891_v7 = vunpack.c.l.b16 %v881_v3  ;;  %v892_v8 = vunpack.c.h.b16 %v881_v3 }
 0x201   : > { %v868_v62 = vpop.f32.mrf.mxu1 }
 0x202   : > { %v869_v63 = vadd.f32 %v868_v62, %v808_v34 }
 0x204   : > { %v878_v4 = vmax.f32 %v869_v63, 0.0 }
 0x206   : > { %v882_v6 = vpack.c.bf16 %v878_v4, %v877_v1 }
 0x208   : > { %v893_v21 = vunpack.c.l.b16 %v882_v6  ;;  %v894_v28 = vunpack.c.h.b16 %v882_v6 }
 0x20a   : > { %v898_v30 = vpack.c.b16 %v894_v28, %v892_v8  ;;  %v897_v43 = vpack.c.b16 %v893_v21, %v891_v7 }
 0x20c   : > { %905 = vrot.lane.b32.xlu1 %v898_v30, %s4336_s29  ;;  %903 = vrot.lane.b32.xlu2 %v897_v43, %s4336_s29 }
 0x256   : > { %v900_v31 = vpop.permute.xlu2 %899 }
 0x257   : > { %v4722_v48 = vsel %vm532_vm4, 0, %v900_v31 }
 0x258   : > { %1071 = vrot.lane.b32.xlu0 %v4722_v48, %s6518_s15  ;;  %1295 = vrot.lane.b32.xlu1 %v4722_v48, %s6516_s30  ;;  %v4729_v9 = vunpack.c.l.bf16 %v4722_v48  ;;  %v4732_v10 = vunpack.c.h.bf16 %v4722_v48 }
 0x25a   : > { %v967_v2 = vmul.f32 %v4641_v13, %v4729_v9  ;;  %v970_v19 = vmul.f32 %v4641_v13, %v4732_v10  ;;  %v947_v20 = vmul.f32 %v4624_v0, %v4729_v9  ;;  %v950_v23 = vmul.f32 %v4624_v0, %v4732_v10 }
 0x25b   : > { %v1007_v50 = vmul.f32 %v4555_v29, %v4729_v9  ;;  %v1010_v52 = vmul.f32 %v4555_v29, %v4732_v10  ;;  %v987_v21 = vmul.f32 %v4598_v47, %v4729_v9  ;;  %v990_v28 = vmul.f32 %v4598_v47, %v4732_v10 }
 0x26e   : > { %v4734_v11 = vpop.permute.xlu0 %901 }
 0x26f   : > { %v4738_v16 = vsel %vm532_vm4, %v900_v31, %v4734_v11 }
 0x270   : > { %v4741_v17 = vunpack.c.l.bf16 %v4738_v16  ;;  %v4744_v18 = vunpack.c.h.bf16 %v4738_v16  ;;  %1073 = vrot.lane.b32.xlu1 %v4738_v16, %s6518_s15  ;;  %1297 = vrot.lane.b32.xlu2 %v4738_v16, %s6516_s30 }
 0x272   : > { %v968_v36 = vmul.f32 %v4741_v17, %v4649_v27  ;;  %v971_v37 = vmul.f32 %v4744_v18, %v4649_v27  ;;  %v948_v38 = vmul.f32 %v4741_v17, %v4632_v5  ;;  %v951_v39 = vmul.f32 %v4744_v18, %v4632_v5 }
 0x273   : > { %v1008_v40 = vmul.f32 %v4741_v17, %v4583_v35  ;;  %v1011_v41 = vmul.f32 %v4744_v18, %v4583_v35  ;;  %v988_v33 = vmul.f32 %v4741_v17, %v4609_v51  ;;  %v991_v63 = vmul.f32 %v4744_v18, %v4609_v51 }
 0x274   : > { %v979_v44 = vpack.c.bf16 %v968_v36, %v967_v2  ;;  %v981_v45 = vpack.c.bf16 %v971_v37, %v970_v19  ;;  %v959_v46 = vpack.c.bf16 %v948_v38, %v947_v20  ;;  %v961_v49 = vpack.c.bf16 %v951_v39, %v950_v23  ;;  %v904_v39 = vpop.permute.xlu2 %903 }
 0x275   : > { %v1019_v60 = vpack.c.bf16 %v1008_v40, %v1007_v50  ;;  %v1021_v61 = vpack.c.bf16 %v1011_v41, %v1010_v52  ;;  %v999_v31 = vpack.c.bf16 %v988_v33, %v987_v21  ;;  %v1001_v2 = vpack.c.bf16 %v991_v63, %v990_v28 }
 0x276   : > { %v1146_v53 = vunpack.c.h.b16 %v979_v44  ;;  %v1149_v26 = vunpack.c.h.b16 %v981_v45  ;;  %v1145_v54 = vunpack.c.l.b16 %v979_v44  ;;  %v1148_v55 = vunpack.c.l.b16 %v981_v45 }
 0x277   : > { %v1099_v34 = vunpack.c.l.b16 %v959_v46  ;;  %v1102_v56 = vunpack.c.l.b16 %v961_v49  ;;  %v1257_v1 = vunpack.c.l.b16 %v1019_v60  ;;  %v1260_v3 = vunpack.c.l.b16 %v1021_v61 }
 0x278   : > { %v1158_v57 = vpack.c.b16 %v1149_v26, %v1146_v53  ;;  %v1157_v59 = vpack.c.b16 %v1148_v55, %v1145_v54  ;;  %v1100_v4 = vunpack.c.h.b16 %v959_v46  ;;  %v1103_v6 = vunpack.c.h.b16 %v961_v49 }
 0x279   : > { %v1111_v62 = vpack.c.b16 %v1102_v56, %v1099_v34  ;;  %v1258_v7 = vunpack.c.h.b16 %v1019_v60  ;;  %v1261_v8 = vunpack.c.h.b16 %v1021_v61  ;;  %v1269_v30 = vpack.c.b16 %v1260_v3, %v1257_v1 }
 0x27a   : > { %1165 = vrot.lane.b32.xlu0 %v1158_v57, %s6514_s26  ;;  %1163 = vrot.lane.b32.xlu2 %v1157_v59, %s6514_s26  ;;  %v1112_v43 = vpack.c.b16 %v1103_v6, %v1100_v4  ;;  %v1212_v23 = vunpack.c.h.b16 %v999_v31  ;;  %v1215_v36 = vunpack.c.h.b16 %v1001_v2  ;;  %v1211_v37 = vunpack.c.l.b16 %v999_v31 }
 0x27b   : > { %1117 = vrot.lane.b32.xlu1 %v1111_v62, %s6512_s27  ;;  %v1270_v19 = vpack.c.b16 %v1261_v8, %v1258_v7  ;;  %v1214_v38 = vunpack.c.l.b16 %v1001_v2  ;;  %v915_v41 = vsel %vm532_vm4, 0, %v904_v39  ;;  %v1027_v57 = vmul.f32 %v4547_v24, %v4729_v9 }
 0x27c   : > { %v1224_v44 = vpack.c.b16 %v1215_v36, %v1212_v23  ;;  %v4799_v50 = vunpack.c.l.bf16 %v915_v41  ;;  %v4801_v52 = vunpack.c.h.bf16 %v915_v41  ;;  %v1030_v59 = vmul.f32 %v4547_v24, %v4732_v10 }
 0x27d   : > { %v1223_v45 = vpack.c.b16 %v1214_v38, %v1211_v37  ;;  %v931_v61 = vmul.f32 %v4531_v14, %v4729_v9  ;;  %v933_v62 = vmul.f32 %v4531_v14, %v4732_v10 }
 0x27e   : > { %v4787_v20 = vpop.permute.xlu1 %905  ;;  %v973_v54 = vmul.f32 %v4641_v13, %v4799_v50  ;;  %v976_v55 = vmul.f32 %v4641_v13, %v4801_v52  ;;  %v953_v33 = vmul.f32 %v4624_v0, %v4799_v50  ;;  %v956_v9 = vmul.f32 %v4624_v0, %v4801_v52 }
 0x27f   : > { %v908_v40 = vsel %vm532_vm4, %v904_v39, %v4787_v20  ;;  %v1013_v10 = vmul.f32 %v4555_v29, %v4799_v50  ;;  %v1016_v4 = vmul.f32 %v4555_v29, %v4801_v52  ;;  %v1033_v6 = vmul.f32 %v4547_v24, %v4799_v50 }
 0x280   : > { %v4793_v46 = vunpack.c.l.bf16 %v908_v40  ;;  %v4795_v49 = vunpack.c.h.bf16 %v908_v40  ;;  %v1036_v28 = vmul.f32 %v4547_v24, %v4801_v52  ;;  %v935_v31 = vmul.f32 %v4531_v14, %v4799_v50 }
 0x281   : > { %v937_v2 = vmul.f32 %v4531_v14, %v4801_v52 }
 0x282   : > { %1275 = vrot.lane.b32.xlu0 %v1269_v30, %s6510_s20  ;;  %1119 = vrot.lane.b32.xlu2 %v1112_v43, %s6512_s27  ;;  %v974_v53 = vmul.f32 %v4793_v46, %v4649_v27  ;;  %v977_v26 = vmul.f32 %v4795_v49, %v4649_v27  ;;  %v954_v60 = vmul.f32 %v4793_v46, %v4632_v5 }
 0x283   : > { %1277 = vrot.lane.b32.xlu1 %v1270_v19, %s6510_s20  ;;  %v957_v63 = vmul.f32 %v4795_v49, %v4632_v5  ;;  %v1014_v1 = vmul.f32 %v4793_v46, %v4583_v35  ;;  %v1017_v3 = vmul.f32 %v4795_v49, %v4583_v35  ;;  %v1034_v21 = vmul.f32 %v4793_v46, %v4565_v32 }
 0x284   : > { %v983_v34 = vpack.c.bf16 %v974_v53, %v973_v54  ;;  %v985_v56 = vpack.c.bf16 %v977_v26, %v976_v55  ;;  %v963_v30 = vpack.c.bf16 %v954_v60, %v953_v33  ;;  %v1037_v43 = vmul.f32 %v4795_v49, %v4565_v32 }
 0x285   : > { %v965_v19 = vpack.c.bf16 %v957_v63, %v956_v9  ;;  %v4851_v23 = vpack.c.bf16 %v1014_v1, %v1013_v10  ;;  %v4853_v36 = vpack.c.bf16 %v1017_v3, %v1016_v4  ;;  %v1043_v37 = vpack.c.bf16 %v1034_v21, %v1033_v6 }
 0x286   : > { %v1151_v7 = vunpack.c.l.b16 %v983_v34  ;;  %v1154_v8 = vunpack.c.l.b16 %v985_v56  ;;  %v1152_v38 = vunpack.c.h.b16 %v983_v34  ;;  %v1155_v39 = vunpack.c.h.b16 %v985_v56 }
 0x287   : > { %v1330_v53 = vunpack.c.h.b16 %v1043_v37  ;;  %v1031_v26 = vmul.f32 %v4744_v18, %v4565_v32  ;;  %v1329_v54 = vunpack.c.l.b16 %v1043_v37  ;;  %v1106_v55 = vunpack.c.h.b16 %v963_v30 }
 0x288   : > { %v1105_v60 = vunpack.c.l.b16 %v963_v30  ;;  %v1108_v34 = vunpack.c.l.b16 %v965_v19  ;;  %v936_v3 = vmul.f32 %v4533_v15, %v4793_v46  ;;  %v938_v6 = vmul.f32 %v4533_v15, %v4795_v49 }
 0x289   : > { %v1041_v56 = vpack.c.bf16 %v1031_v26, %v1030_v59  ;;  %v932_v59 = vmul.f32 %v4533_v15, %v4741_v17  ;;  %v934_v30 = vmul.f32 %v4533_v15, %v4744_v18 }
 0x28a   : > { %1231 = vrot.lane.b32.xlu0 %v1224_v44, %s6506_s25  ;;  %1229 = vrot.lane.b32.xlu2 %v1223_v45, %s6506_s25  ;;  %v1028_v44 = vmul.f32 %v4741_v17, %v4565_v32  ;;  %v1160_v45 = vpack.c.b16 %v1154_v8, %v1151_v7  ;;  %v941_v21 = vpack.c.bf16 %v936_v3, %v935_v31 }
 0x28b   : > { %1303 = vrot.lane.b32.xlu1 %v908_v40, %s6516_s30  ;;  %v1327_v7 = vunpack.c.h.b16 %v1041_v56  ;;  %v1114_v37 = vpack.c.b16 %v1108_v34, %v1105_v60  ;;  %v940_v26 = vpack.c.bf16 %v934_v30, %v933_v62  ;;  %v1266_v60 = vunpack.c.l.b16 %v4853_v36 }
 0x28c   : > { %v1039_v63 = vpack.c.bf16 %v1028_v44, %v1027_v57  ;;  %v1326_v57 = vunpack.c.l.b16 %v1041_v56  ;;  %v1267_v34 = vunpack.c.h.b16 %v4853_v36  ;;  %v996_v36 = vmul.f32 %v4598_v47, %v4801_v52 }
 0x28d   : > { %v4921_v52 = vsel %vm532_vm4, %v4787_v20, 0 }
 0x28e   : > { %v1324_v10 = vunpack.c.h.b16 %v1039_v63  ;;  %v1323_v4 = vunpack.c.l.b16 %v1039_v63  ;;  %v1264_v63 = vunpack.c.h.b16 %v4851_v23  ;;  %v4924_v30 = vunpack.c.l.bf16 %v4921_v52 }
 0x290   : > { %v4876_v44 = vpack.c.b16 %v1326_v57, %v1323_v4 }
 0x292   : > { %1077 = vrot.lane.b32.xlu2 %v915_v41, %s6518_s15  ;;  %1301 = vrot.lane.b32.xlu0 %v915_v41, %s6516_s30 }
 0x293   : > { %1189 = vrot.lane.b32.xlu1 %v915_v41, %s6508_s1  ;;  %v1045_v41 = vpack.c.bf16 %v1037_v43, %v1036_v28  ;;  %v942_v28 = vpack.c.bf16 %v938_v6, %v937_v2  ;;  %v1161_v43 = vpack.c.b16 %v1155_v39, %v1152_v38  ;;  %v1053_v2 = vunpack.c.l.b16 %v940_v26 }
 0x294   : > { %v4884_v39 = vsel %vm532_vm4, %v4734_v11, 0  ;;  %v997_v11 = vmul.f32 %v4795_v49, %v4609_v51 }
 0x295   : > { %v1333_v33 = vunpack.c.h.b16 %v1045_v41  ;;  %v1332_v1 = vunpack.c.l.b16 %v1045_v41  ;;  %v4874_v41 = vpack.c.b16 %v1327_v7, %v1324_v10  ;;  %v1058_v31 = vunpack.c.h.b16 %v942_v28 }
 0x296   : > { %v4902_v10 = vunpack.c.l.bf16 %v4884_v39  ;;  %v4905_v4 = vunpack.c.h.bf16 %v4884_v39  ;;  %v1005_v7 = vpack.c.bf16 %v997_v11, %v996_v36 }
 0x297   : > { %v4864_v9 = vpack.c.b16 %v1333_v33, %v1330_v53  ;;  %v4868_v8 = vpack.c.b16 %v1332_v1, %v1329_v54  ;;  %v939_v53 = vpack.c.bf16 %v932_v59, %v931_v61  ;;  %v1056_v33 = vunpack.c.h.b16 %v941_v21 }
 0x298   : > { %v1263_v61 = vunpack.c.l.b16 %v4851_v23  ;;  %v994_v1 = vmul.f32 %v4793_v46, %v4609_v51  ;;  %v993_v23 = vmul.f32 %v4598_v47, %v4799_v50  ;;  %v949_v49 = vmul.f32 %v4616_v58, %v4902_v10 }
 0x299   : > { %v1051_v18 = vunpack.c.l.b16 %v939_v53  ;;  %v1052_v38 = vunpack.c.h.b16 %v939_v53  ;;  %v4888_v62 = vpack.c.b16 %v1058_v31, %v1056_v33  ;;  %v952_v50 = vmul.f32 %v4616_v58, %v4905_v4 }
 0x29a   : > { %1191 = vrot.lane.b32.xlu2 %v908_v40, %s6508_s1  ;;  %1079 = vrot.lane.b32.xlu0 %v908_v40, %s6518_s15  ;;  %v1109_v40 = vunpack.c.h.b16 %v965_v19  ;;  %v1057_v19 = vunpack.c.l.b16 %v942_v28  ;;  %v1272_v6 = vpack.c.b16 %v1266_v60, %v1263_v61  ;;  %v1003_v46 = vpack.c.bf16 %v994_v1, %v993_v23 }
 0x29b   : > { %1169 = vrot.lane.b32.xlu1 %v1160_v45, %s6514_s26  ;;  %v1055_v45 = vunpack.c.l.b16 %v941_v21  ;;  %v4893_v56 = vpack.c.b16 %v1053_v2, %v1051_v18  ;;  %v1220_v21 = vunpack.c.l.b16 %v1005_v7  ;;  %v960_v28 = vpack.c.bf16 %v949_v49, %v949_v49 }
 0x29c   : > { %v1115_v54 = vpack.c.b16 %v1109_v40, %v1106_v55  ;;  %v1054_v55 = vunpack.c.h.b16 %v940_v26  ;;  %v1273_v40 = vpack.c.b16 %v1267_v34, %v1264_v63  ;;  %v1217_v57 = vunpack.c.l.b16 %v1003_v46 }
 0x29d   : > { %v4880_v17 = vpack.c.b16 %v1057_v19, %v1055_v45  ;;  %v962_v59 = vpack.c.bf16 %v952_v50, %v952_v50  ;;  %v1101_v20 = vunpack.c.l.b16 %v960_v28  ;;  %v969_v45 = vmul.f32 %v4639_v12, %v4902_v10 }
 0x29e   : > { %v4899_v3 = vpack.c.b16 %v1054_v55, %v1052_v38  ;;  %v972_v19 = vmul.f32 %v4639_v12, %v4905_v4  ;;  %v1218_v53 = vunpack.c.h.b16 %v1003_v46  ;;  %v1221_v26 = vunpack.c.h.b16 %v1005_v7 }
 0x29f   : > { %v980_v31 = vpack.c.bf16 %v969_v45, %v969_v45  ;;  %v1009_v63 = vmul.f32 %v4549_v25, %v4902_v10  ;;  %v1012_v34 = vmul.f32 %v4549_v25, %v4905_v4  ;;  %v1015_v23 = vmul.f32 %v4549_v25, %v4924_v30 }
 0x2a0   : > { %v1227_v18 = vpack.c.b16 %v1221_v26, %v1218_v53  ;;  %v992_v53 = vmul.f32 %v4593_v42, %v4905_v4 }
 0x2a1   : > { %v1147_v55 = vunpack.c.l.b16 %v980_v31  ;;  %v1020_v46 = vpack.c.bf16 %v1009_v63, %v1009_v63  ;;  %v1022_v7 = vpack.c.bf16 %v1012_v34, %v1012_v34 }
 0x2a2   : > { %1171 = vrot.lane.b32.xlu2 %v1161_v43, %s6514_s26  ;;  %1123 = vrot.lane.b32.xlu0 %v1114_v37, %s6512_s27  ;;  %v4927_v43 = vunpack.c.h.bf16 %v4921_v52  ;;  %v1104_v37 = vunpack.c.l.b16 %v962_v59 }
 0x2a3   : > { %1125 = vrot.lane.b32.xlu1 %v1115_v54, %s6512_s27  ;;  %v975_v54 = vmul.f32 %v4639_v12, %v4924_v30 }
 0x2a4   : > { %v978_v33 = vmul.f32 %v4639_v12, %v4927_v43  ;;  %v1113_v2 = vpack.c.b16 %v1104_v37, %v1101_v20  ;;  %v1018_v36 = vmul.f32 %v4549_v25, %v4927_v43  ;;  %v989_v20 = vmul.f32 %v4593_v42, %v4902_v10 }
 0x2a5   : > { %v984_v38 = vpack.c.bf16 %v975_v54, %v975_v54  ;;  %v1262_v37 = vunpack.c.l.b16 %v1022_v7  ;;  %v998_v31 = vmul.f32 %v4593_v42, %v4927_v43 }
 0x2a6   : > { %v986_v61 = vpack.c.bf16 %v978_v33, %v978_v33  ;;  %v995_v33 = vmul.f32 %v4593_v42, %v4924_v30 }
 0x2a7   : > { %v1153_v1 = vunpack.c.l.b16 %v984_v38  ;;  %v1002_v38 = vpack.c.bf16 %v992_v53, %v992_v53 }
 0x2a8   : > { %v1156_v11 = vunpack.c.l.b16 %v986_v61 }
 0x2aa   : > { %1281 = vrot.lane.b32.xlu2 %v1272_v6, %s6510_s20  ;;  %1283 = vrot.lane.b32.xlu0 %v1273_v40, %s6510_s20  ;;  %v955_v6 = vmul.f32 %v4616_v58, %v4924_v30  ;;  %v958_v40 = vmul.f32 %v4616_v58, %v4927_v43  ;;  %v1162_v50 = vpack.c.b16 %v1156_v11, %v1153_v1  ;;  %v1216_v1 = vunpack.c.l.b16 %v1002_v38 }
 0x2ab   : > { %1185 = vrot.lane.b32.xlu1 %v4738_v16, %s6508_s1  ;;  %v1226_v16 = vpack.c.b16 %v1220_v21, %v1217_v57  ;;  %v1024_v57 = vpack.c.bf16 %v1015_v23, %v1015_v23  ;;  %v1026_v21 = vpack.c.bf16 %v1018_v36, %v1018_v36  ;;  %v1035_v36 = vmul.f32 %v4545_v22, %v4924_v30 }
 0x2ac   : > { %v964_v28 = vpack.c.bf16 %v955_v6, %v955_v6  ;;  %v966_v59 = vpack.c.bf16 %v958_v40, %v958_v40  ;;  %v1038_v6 = vmul.f32 %v4545_v22, %v4927_v43  ;;  %v1029_v30 = vmul.f32 %v4545_v22, %v4902_v10 }
 0x2ad   : > { %v1265_v45 = vunpack.c.l.b16 %v1024_v57  ;;  %v1044_v7 = vpack.c.bf16 %v1035_v36, %v1035_v36  ;;  %v1032_v43 = vmul.f32 %v4545_v22, %v4905_v4 }
 0x2ae   : > { %v1107_v26 = vunpack.c.l.b16 %v964_v28  ;;  %v1110_v54 = vunpack.c.l.b16 %v966_v59  ;;  %v1040_v59 = vpack.c.bf16 %v1029_v30, %v1029_v30 }
 0x2af   : > { %v1331_v57 = vunpack.c.l.b16 %v1044_v7 }
 0x2b0   : > { %v1116_v61 = vpack.c.b16 %v1110_v54, %v1107_v26  ;;  %v1372_v54 = vld [vmem:[%s6489_s4 + $0x18] sm:$0xff] }
 0x2b2   : > { %1305 = vrot.lane.b32.xlu2 %v4921_v52, %s6516_s30  ;;  %1183 = vrot.lane.b32.xlu0 %v4722_v48, %s6508_s1  ;;  %v982_v48 = vpack.c.bf16 %v972_v19, %v972_v19  ;;  %v1268_v19 = vunpack.c.l.b16 %v1026_v21 }
 0x2b3   : > { %1235 = vrot.lane.b32.xlu1 %v1226_v16, %s6506_s25  ;;  %v1259_v16 = vunpack.c.l.b16 %v1020_v46 }
 0x2b4   : > { %v1150_v60 = vunpack.c.l.b16 %v982_v48 }
 0x2b5   : > { %v1271_v48 = vpack.c.b16 %v1262_v37, %v1259_v16  ;;  %v1042_v16 = vpack.c.bf16 %v1032_v43, %v1032_v43 }
 0x2b6   : > { %v1159_v49 = vpack.c.b16 %v1150_v60, %v1147_v55  ;;  %v1004_v55 = vpack.c.bf16 %v995_v33, %v995_v33  ;;  %v1006_v60 = vpack.c.bf16 %v998_v31, %v998_v31  ;;  %v1369_v33 = vld [vmem:[%s6489_s4] sm:$0xff] }
 0x2b8   : > { %v1219_v11 = vunpack.c.l.b16 %v1004_v55  ;;  %v1222_v23 = vunpack.c.l.b16 %v1006_v60 }
 0x2ba   : > { %1237 = vrot.lane.b32.xlu2 %v1227_v18, %s6506_s25  ;;  %1121 = vrot.lane.b32.xlu0 %v1113_v2, %s6512_s27  ;;  %v1274_v18 = vpack.c.b16 %v1268_v19, %v1265_v45  ;;  %v1000_v2 = vpack.c.bf16 %v989_v20, %v989_v20  ;;  %v1228_v46 = vpack.c.b16 %v1222_v23, %v1219_v11  ;;  %v1325_v45 = vunpack.c.l.b16 %v1040_v59 }
 0x2bb   : > { %1299 = vrot.lane.b32.xlu1 %v4884_v39, %s6516_s30  ;;  %v1328_v19 = vunpack.c.l.b16 %v1042_v16 }
 0x2bc   : > { %v1213_v34 = vunpack.c.l.b16 %v1000_v2 }
 0x2bd   : > { %v1337_v10 = vpack.c.b16 %v1328_v19, %v1325_v45 }
 0x2be   : > { %v1225_v40 = vpack.c.b16 %v1216_v1, %v1213_v34 }
 0x2c2   : > { %1167 = vrot.lane.b32.xlu2 %v1159_v49, %s6514_s26  ;;  %1173 = vrot.lane.b32.xlu0 %v1162_v50, %s6514_s26  ;;  %v1046_v49 = vpack.c.bf16 %v1038_v6, %v1038_v6 }
 0x2c3   : > { %1075 = vrot.lane.b32.xlu1 %v4884_v39, %s6518_s15 }
 0x2c4   : > { %v1334_v21 = vunpack.c.l.b16 %v1046_v49 }
 0x2c6   : > { %v1340_v28 = vpack.c.b16 %v1334_v21, %v1331_v57 }
 0x2ca   : > { %1279 = vrot.lane.b32.xlu2 %v1271_v48, %s6510_s20  ;;  %1285 = vrot.lane.b32.xlu0 %v1274_v18, %s6510_s20  ;;  %v4973_v63 = vpop.permute.xlu2 %1297  ;;  %v1296_v37 = vpop.permute.xlu1 %1295 }
 0x2cb   : > { %1127 = vrot.lane.b32.xlu1 %v1116_v61, %s6512_s27  ;;  %v1072_v4 = vpop.permute.xlu0 %1071  ;;  %v1307_v1 = vsel %vm729_vm12, %v1296_v37, %v4973_v63 }
 0x2d2   : > { %1081 = vrot.lane.b32.xlu2 %v4921_v52, %s6518_s15  ;;  %1233 = vrot.lane.b32.xlu0 %v1225_v40, %s6506_s25 }
 0x2d3   : > { %1239 = vrot.lane.b32.xlu1 %v1228_v46, %s6506_s25  ;;  %s6536_s25 = smov 110  }
 0x2d4   : > { %v1164_v50 = vpop.permute.xlu2 %1163 }
 0x2da   : > { %1193 = vrot.lane.b32.xlu2 %v4921_v52, %s6508_s1  ;;  %1349 = vrot.lane.b32.xlu0 %v4864_v9, %s6535_s13  ;;  %v1371_v9 = vld [vmem:[%s6489_s4 + $0x10] sm:$0xff] }
 0x2db   : > { %1351 = vrot.lane.b32.xlu1 %v1340_v28, %s6535_s13 }
 0x2dc   : > { %v4992_v20 = vpop.permute.xlu2 %1119 }
 0x2e2   : > { %1187 = vrot.lane.b32.xlu2 %v4884_v39, %s6508_s1  ;;  %1343 = vrot.lane.b32.xlu0 %v4874_v41, %s6535_s13  ;;  %v4999_v53 = vpop.permute.xlu1 %1073 }
 0x2e3   : > { %1345 = vrot.lane.b32.xlu1 %v1337_v10, %s6535_s13  ;;  %v1083_v37 = vsel %vm643_vm2, %v1072_v4, %v4999_v53 }
 0x2e4   : > { %v1230_v52 = vpop.permute.xlu2 %1229 }
 0x2ea   : > { %1347 = vrot.lane.b32.xlu2 %v4868_v8, %s6535_s13  ;;  %1341 = vrot.lane.b32.xlu0 %v4876_v44, %s6535_s13  ;;  %v1370_v8 = vld [vmem:[%s6489_s4 + $0x8] sm:$0xff] }
 0x2eb   : > { %1385 = vperm.xlu1 %4148, %v1371_v9  }
 0x2ec   : > { %v5008_v39 = vpop.permute.xlu0 %1165  ;;  %v1078_v41 = vpop.permute.xlu2 %1077 }
 0x2ed   : > { %v1118_v26 = vpop.permute.xlu1 %1117  ;;  %v1175_v40 = vsel %vm677_vm1, %v1164_v50, %v5008_v39 }
 0x2ee   : > { %v1129_v21 = vsel %vm660_vm0, %v1118_v26, %v4992_v20  ;;  %v4003_v26 = vld [vmem:[%s6488_s3 + $0x8] sm:$0xf0] }
 0x2f2   : > { %1390 = vperm.xlu2 %4149, %v1372_v54   ;;  %1375 = vperm.xlu0 %4150, %v1369_v33  }
 0x2f3   : > { %1380 = vperm.xlu1 %4148, %v1370_v8  }
 0x2f4   : > { %v1276_v44 = vpop.permute.xlu0 %1275  ;;  %v5019_v31 = vpop.permute.xlu2 %1191 }
 0x2f5   : > { %v5021_v48 = vpop.permute.xlu1 %1277 }
 0x2f6   : > { %v1287_v16 = vsel %vm720_vm13, %v1276_v44, %v5021_v48 }
 0x2fc   : > { %v5023_v18 = vpop.permute.xlu0 %1231  ;;  %v5025_v2 = vpop.permute.xlu2 %1171 }
 0x2fd   : > { %v1304_v38 = vpop.permute.xlu1 %1303  ;;  %v1241_v4 = vsel %vm703_vm15, %v1230_v52, %v5023_v18  ;;  %v3899_v52 = vld [vmem:[%s6488_s3 + $0xc] sm:$0xf0] }
 0x304   : > { %v1302_v61 = vpop.permute.xlu0 %1301  ;;  %v1282_v55 = vpop.permute.xlu2 %1281 }
 0x305   : > { %v1190_v60 = vpop.permute.xlu1 %1189  ;;  %v1309_v34 = vsel %vm729_vm12, %v1302_v61, %v1304_v38 }
 0x306   : > { %1448 = vmatpush.bf16.msra.mxu3 %v1309_v34  ;;  %v1197_v61 = vsel %vm686_vm14, %v1190_v60, %v5019_v31 }
 0x30a   : > { %1449 = vmatpush.bf16.msra.mxu3 %v1307_v1 }
 0x30c   : > { %v5030_v11 = vpop.permute.xlu0 %1079  ;;  %v1306_v23 = vpop.permute.xlu2 %1305 }
 0x30d   : > { %v1170_v36 = vpop.permute.xlu1 %1169  ;;  %v1085_v50 = vsel %vm643_vm2, %v1078_v41, %v5030_v11  ;;  %v3897_v41 = vld [vmem:[%s6488_s3] sm:$0xf]  ;;  %v1310_v33 = vsel %vm729_vm12, %v1304_v38, %v1306_v23  ;;  %v3909_v23 = vld [vmem:[%s6488_s3 + $0x18] sm:$0xf] }
 0x30e   : > { %v1177_v6 = vsel %vm677_vm1, %v1170_v36, %v5025_v2  ;;  %v5061_v54 = vor.u32 %v4003_v26, %v3897_v41  ;;  %v4006_v36 = vld [vmem:[%s6488_s3 + $0x20] sm:$0xf0] }
 0x30f   : > { %1429 = vmatpush.bf16.msra.mxu2 %v1177_v6 }
 0x313   : > { %1430 = vmatpush.bf16.msra.mxu2 %v1175_v40 }
 0x314   : > { %v5036_v46 = vpop.permute.xlu2 %1237  ;;  %v1124_v7 = vpop.permute.xlu0 %1123 }
 0x315   : > { %v1126_v49 = vpop.permute.xlu1 %1125 }
 0x316   : > { %v1131_v57 = vsel %vm660_vm0, %v1124_v7, %v1126_v49  ;;  %v3910_v7 = vor.u32 %v4006_v36, %v3909_v23 }
 0x317   : > { %1431 = vmatpush.bf16.msra.mxu2 %v1131_v57 }
 0x31b   : > { %1432 = vmatpush.bf16.msra.mxu2 %v1129_v21 }
 0x31c   : > { %v1168_v30 = vpop.permute.xlu2 %1167  ;;  %v1284_v43 = vpop.permute.xlu0 %1283 }
 0x31d   : > { %v5041_v28 = vpop.permute.xlu1 %1185  ;;  %v1289_v59 = vsel %vm720_vm13, %v1282_v55, %v1284_v43  ;;  %v1176_v40 = vsel %vm677_vm1, %v5008_v39, %v1168_v30 }
 0x31e   : > { %1450 = vmatpush.bf16.msra.mxu3 %v1289_v59 }
 0x31f   : > { %1433 = vmatpush.bf16.msra.mxu2 %v1085_v50  ;;  %v4005_v50 = vld [vmem:[%s6488_s3 + $0x1c] sm:$0xf] }
 0x322   : > { %1451 = vmatpush.bf16.msra.mxu3 %v1287_v16  ;;  %v3911_v16 = vld [vmem:[%s6488_s3 + $0x24] sm:$0xf0] }
 0x323   : > { %1434 = vmatpush.bf16.msra.mxu2 %v1083_v37  ;;  %v3914_v37 = vor.u32 %v4005_v50, %v3911_v16 }
 0x324   : > { %v1280_v45 = vpop.permute.xlu2 %1279  ;;  %v1184_v19 = vpop.permute.xlu0 %1183 }
 0x325   : > { %v1236_v10 = vpop.permute.xlu1 %1235  ;;  %v1195_v38 = vsel %vm686_vm14, %v1184_v19, %v5041_v28 }
 0x326   : > { %v1243_v9 = vsel %vm703_vm15, %v1236_v10, %v5036_v46 }
 0x327   : > { %1435 = vmatpush.bf16.msra.mxu2 %v4880_v17  ;;  %1452 = vmatpush.bf16.msra.mxu3 %v1243_v9 }
 0x32b   : > { %1436 = vmatpush.bf16.msra.mxu2 %v4893_v56  ;;  %1453 = vmatpush.bf16.msra.mxu3 %v1241_v4  ;;  %v4002_v56 = vld [vmem:[%s6488_s3 + $0x4] sm:$0xf] }
 0x32c   : > { %v1122_v17 = vpop.permute.xlu0 %1121  ;;  %v1082_v44 = vpop.permute.xlu2 %1081  ;;  %v3902_v34 = vor.u32 %v4002_v56, %v3899_v52 }
 0x32d   : > { %v1300_v8 = vpop.permute.xlu1 %1299  ;;  %v1130_v30 = vsel %vm660_vm0, %v4992_v20, %v1122_v17  ;;  %v1086_v10 = vsel %vm643_vm2, %v5030_v11, %v1082_v44  ;;  %v3917_v44 = vld [vmem:[%s6488_s3 + $0x20] sm:$0xf] }
 0x32e   : > { %1437 = vmatmul.bf16.vlgmr.msra.gmra.mxu2 %v5061_v54  ;;  %v1308_v55 = vsel %vm729_vm12, %v4973_v63, %v1300_v8 }
 0x32f   : > { %1505 = vmatpush.bf16.msrb.mxu2 %v1310_v33  ;;  %1454 = vmatpush.bf16.msra.mxu3 %v1197_v61 }
 0x333   : > { %1506 = vmatpush.bf16.msrb.mxu2 %v1308_v55  ;;  %1455 = vmatpush.bf16.msra.mxu3 %v1195_v38 }
 0x334   : > { %v1174_v1 = vpop.permute.xlu0 %1173  ;;  %v1194_v6 = vpop.permute.xlu2 %1193 }
 0x335   : > { %v1076_v60 = vpop.permute.xlu1 %1075  ;;  %v1178_v63 = vsel %vm677_vm1, %v5025_v2, %v1174_v1  ;;  %v1198_v11 = vsel %vm686_vm14, %v5019_v31, %v1194_v6  ;;  %v4004_v31 = vld [vmem:[%s6488_s3 + $0x10] sm:$0xf0] }
 0x336   : > { %1456 = vmatmul.bf16.vlgmr.msra.gmra.mxu3 %v3902_v34  ;;  %1486 = vmatpush.bf16.msrb.mxu1 %v1178_v63  ;;  %v1084_v20 = vsel %vm643_vm2, %v4999_v53, %v1076_v60 }
 0x33a   : > { %1487 = vmatpush.bf16.msrb.mxu1 %v1176_v40 }
 0x33c   : > { %v1286_v57 = vpop.permute.xlu0 %1285  ;;  %v1188_v39 = vpop.permute.xlu2 %1187 }
 0x33d   : > { %v1128_v21 = vpop.permute.xlu1 %1127  ;;  %v1290_v2 = vsel %vm720_vm13, %v1284_v43, %v1286_v57  ;;  %v1288_v43 = vsel %vm720_vm13, %v5021_v48, %v1280_v45  ;;  %v1196_v53 = vsel %vm686_vm14, %v5041_v28, %v1188_v39 }
 0x33e   : > { %1442 = vmatmul.bf16.gmra.mxu2 %v3910_v7  ;;  %v1132_v59 = vsel %vm660_vm0, %v1126_v49, %v1128_v21 }
 0x33f   : > { %1488 = vmatpush.bf16.msrb.mxu1 %v1132_v59  ;;  %1507 = vmatpush.bf16.msrb.mxu2 %v1290_v2 }
 0x343   : > { %1489 = vmatpush.bf16.msrb.mxu1 %v1130_v30  ;;  %1508 = vmatpush.bf16.msrb.mxu2 %v1288_v43 }
 0x344   : > { %v1234_v49 = vpop.permute.xlu0 %1233  ;;  %v1348_v45 = vpop.permute.xlu2 %1347 }
 0x345   : > { %v1240_v19 = vpop.permute.xlu1 %1239  ;;  %v1242_v48 = vsel %vm703_vm15, %v5023_v18, %v1234_v49  ;;  %v3905_v18 = vld [vmem:[%s6488_s3 + $0x8] sm:$0xf] }
 0x346   : > { %1461 = vmatmul.bf16.gmra.mxu3 %v3914_v37  ;;  %v1244_v9 = vsel %vm703_vm15, %v5036_v46, %v1240_v19  ;;  %v3906_v8 = vor.u32 %v4004_v31, %v3905_v18 }
 0x347   : > { %1490 = vmatpush.bf16.msrb.mxu1 %v1086_v10  ;;  %1509 = vmatpush.bf16.msrb.mxu2 %v1244_v9 }
 0x34b   : > { %1491 = vmatpush.bf16.msrb.mxu1 %v1084_v20  ;;  %1510 = vmatpush.bf16.msrb.mxu2 %v1242_v48 }
 0x34c   : > { %v1350_v41 = vpop.permute.xlu0 %1349 }
 0x34d   : > { %v1352_v26 = vpop.permute.xlu1 %1351  ;;  %v1355_v4 = vsel %vm746_vm10, %v1348_v45, %v1350_v41 }
 0x34e   : > { %1473 = vmatpush.bf16.msrb.mxu0 %v1355_v4  ;;  %v1356_v46 = vsel %vm746_vm10, %v1350_v41, %v1352_v26 }
 0x34f   : > { %1492 = vmatpush.bf16.msrb.mxu1 %v4888_v62  ;;  %1511 = vmatpush.bf16.msrb.mxu2 %v1198_v11 }
 0x350   : > { %1530 = vmatpush.bf16.msrb.mxu3 %v1356_v46 }
 0x353   : > { %1493 = vmatpush.bf16.msrb.mxu1 %v4899_v3  ;;  %1512 = vmatpush.bf16.msrb.mxu2 %v1196_v53 }
 0x354   : > { %v1344_v33 = vpop.permute.xlu0 %1343 }
 0x355   : > { %v1346_v17 = vpop.permute.xlu1 %1345 }
 0x356   : > { %1494 = vmatmul.bf16.vlgmr.msrb.gmra.mxu1 %v5061_v54  ;;  %1513 = vmatmul.bf16.vlgmr.msrb.gmra.mxu2 %v3902_v34  ;;  %v1354_v62 = vsel %vm746_vm10, %v1344_v33, %v1346_v17  ;;  %v4007_v54 = vld [vmem:[%s6488_s3 + $0x28] sm:$0xf0] }
 0x357   : > { %1531 = vmatpush.bf16.msrb.mxu3 %v1354_v62  ;;  %v3918_v61 = vor.u32 %v4007_v54, %v3917_v44 }
 0x35a   : > { %3921 = vmatmul.msk.bf16.vlgmr.msrb.gmra.mxu3 %vm603_vm6, %v3906_v8 }
 0x35c   : > { %v1342_v3 = vpop.permute.xlu0 %1341 }
 0x35d   : > { %v1353_v28 = vsel %vm746_vm10, %v1342_v3, %v1344_v33  ;;  %v1386_v36 = vpop.permute.xlu1 %1385 }
 0x35e   : > { %1474 = vmatpush.bf16.msrb.mxu0 %v1353_v28 }
 0x361   : > { %3919 = vmatmul.msk.bf16.vlgmr.msrb.gmra.mxu0 %vm603_vm6, %v3906_v8 }
 0x364   : > { %v1376_v57 = vpop.permute.xlu0 %1375 }
 0x365   : > { %v1381_v16 = vpop.permute.xlu1 %1380 }
 0x366   : > { %1499 = vmatmul.bf16.gmra.mxu1 %v3910_v7  ;;  %1518 = vmatmul.bf16.gmra.mxu2 %v3914_v37 }
 0x36a   : > { %3922 = vmatmul.msk.bf16.gmra.mxu3 %vm603_vm6, %v3918_v61 }
 0x371   : > { %3920 = vmatmul.msk.bf16.gmra.mxu0 %vm603_vm6, %v3918_v61 }
 0x3b1   : > { %v1438_v55 = vpop.f32.mrf.mxu2 }
 0x3b2   : > { %v1439_v7 = vadd.f32 %v1438_v55, %v1376_v57 }
 0x3b9   : > { %v1457_v56 = vpop.f32.mrf.mxu3  ;;  %v1440_v52 = vpop.f32.mrf.mxu2 }
 0x3ba   : > { %v1458_v59 = vadd.f32 %v1457_v56, %v1439_v7  ;;  %v1441_v49 = vadd.f32 %v1440_v52, %v1381_v16 }
 0x3c1   : > { %v1459_v38 = vpop.f32.mrf.mxu3  ;;  %v1443_v34 = vpop.f32.mrf.mxu2 }
 0x3c2   : > { %v1460_v9 = vadd.f32 %v1459_v38, %v1441_v49  ;;  %v1444_v17 = vadd.f32 %v1443_v34, %v1386_v36 }
 0x3c9   : > { %v1462_v1 = vpop.f32.mrf.mxu3  ;;  %v1445_v60 = vpop.f32.mrf.mxu2 }
 0x3ca   : > { %v1463_v61 = vadd.f32 %v1462_v1, %v1444_v17 }
 0x3d1   : > { %v1464_v23 = vpop.f32.mrf.mxu3 }
 0x3d3   : > { %v1495_v63 = vpop.f32.mrf.mxu1 }
 0x3d4   : > { %v1496_v50 = vadd.f32 %v1495_v63, %v1376_v57  ;;  %v1391_v63 = vpop.permute.xlu2 %1390 }
 0x3d5   : > { %v1446_v7 = vadd.f32 %v1445_v60, %v1391_v63 }
 0x3d9   : > { %v1514_v6 = vpop.f32.mrf.mxu2 }
 0x3da   : > { %v1515_v39 = vadd.f32 %v1514_v6, %v1496_v50 }
 0x3db   : > { %v1497_v40 = vpop.f32.mrf.mxu1 }
 0x3dc   : > { %v1498_v37 = vadd.f32 %v1497_v40, %v1381_v16 }
 0x3dd   : > { %v1533_v21 = vpop.f32.mrf.mxu3 }
 0x3de   : > { %v1476_v2 = vpop.f32.mrf.mxu0  ;;  %v1534_v19 = vadd.f32 %v1533_v21, %v1515_v39 }
 0x3df   : > { %v1477_v30 = vadd.f32 %v1476_v2, %v1458_v59  ;;  %v1465_v59 = vadd.f32 %v1464_v23, %v1446_v7 }
 0x3e0   : > { %v1544_v4 = vmax.f32 %v1534_v19, 0.0 }
 0x3e1   : > { %v1516_v43 = vpop.f32.mrf.mxu2  ;;  %v1543_v20 = vmax.f32 %v1477_v30, 0.0 }
 0x3e2   : > { %v1517_v10 = vadd.f32 %v1516_v43, %v1498_v37 }
 0x3e3   : > { %v1500_v48 = vpop.f32.mrf.mxu1  ;;  %v1551_v46 = vpack.c.bf16 %v1544_v4, %v1543_v20 }
 0x3e4   : > { %v1501_v55 = vadd.f32 %v1500_v48, %v1386_v36 }
 0x3e5   : > { %v1535_v45 = vpop.f32.mrf.mxu3  ;;  %v1559_v62 = vunpack.c.l.b16 %v1551_v46  ;;  %v1560_v8 = vunpack.c.h.b16 %v1551_v46 }
 0x3e6   : > { %v1536_v41 = vadd.f32 %v1535_v45, %v1517_v10  ;;  %v1478_v26 = vpop.f32.mrf.mxu0 }
 0x3e7   : > { %v1479_v11 = vadd.f32 %v1478_v26, %v1460_v9 }
 0x3e8   : > { %v1546_v53 = vmax.f32 %v1536_v41, 0.0 }
 0x3e9   : > { %v1545_v18 = vmax.f32 %v1479_v11, 0.0  ;;  %v1519_v31 = vpop.f32.mrf.mxu2 }
 0x3ea   : > { %v1520_v6 = vadd.f32 %v1519_v31, %v1501_v55 }
 0x3eb   : > { %v1552_v33 = vpack.c.bf16 %v1546_v53, %v1545_v18  ;;  %v1502_v56 = vpop.f32.mrf.mxu1 }
 0x3ec   : > { %v1503_v34 = vadd.f32 %v1502_v56, %v1391_v63 }
 0x3ed   : > { %v1561_v3 = vunpack.c.l.b16 %v1552_v33  ;;  %v1562_v28 = vunpack.c.h.b16 %v1552_v33  ;;  %v1538_v44 = vpop.f32.mrf.mxu3 }
 0x3ee   : > { %v1481_v54 = vpop.f32.mrf.mxu0  ;;  %v1539_v21 = vadd.f32 %v1538_v44, %v1520_v6 }
 0x3ef   : > { %v1568_v52 = vpack.c.b16 %v1562_v28, %v1560_v8  ;;  %v1567_v38 = vpack.c.b16 %v1561_v3, %v1559_v62  ;;  %v1482_v40 = vadd.f32 %v1481_v54, %v1463_v61 }
 0x3f0   : > { %v1548_v39 = vmax.f32 %v1539_v21, 0.0 }
 0x3f1   : > { %v1521_v57 = vpop.f32.mrf.mxu2  ;;  %1573 = vrot.lane.b32.xlu2 %v1568_v52, %s4336_s29  ;;  %1571 = vrot.lane.b32.xlu1 %v1567_v38, %s4336_s29  ;;  %v1547_v50 = vmax.f32 %v1482_v40, 0.0 }
 0x3f2   : > { %v1522_v2 = vadd.f32 %v1521_v57, %v1503_v34 }
 0x3f3   : > { %v1553_v43 = vpack.c.bf16 %v1548_v39, %v1547_v50 }
 0x3f5   : > { %v1540_v16 = vpop.f32.mrf.mxu3  ;;  %v1563_v10 = vunpack.c.l.b16 %v1553_v43  ;;  %v1564_v9 = vunpack.c.h.b16 %v1553_v43 }
 0x3f6   : > { %v1541_v1 = vadd.f32 %v1540_v16, %v1522_v2  ;;  %v1483_v36 = vpop.f32.mrf.mxu0 }
 0x3f7   : > { %v1484_v30 = vadd.f32 %v1483_v36, %v1465_v59 }
 0x3f8   : > { %v1550_v37 = vmax.f32 %v1541_v1, 0.0 }
 0x3f9   : > { %v1549_v49 = vmax.f32 %v1484_v30, 0.0 }
 0x3fb   : > { %v1554_v19 = vpack.c.bf16 %v1550_v37, %v1549_v49 }
 0x3fd   : > { %v1565_v20 = vunpack.c.l.b16 %v1554_v19  ;;  %v1566_v48 = vunpack.c.h.b16 %v1554_v19 }
 0x3ff   : > { %v1570_v45 = vpack.c.b16 %v1566_v48, %v1564_v9  ;;  %v1569_v41 = vpack.c.b16 %v1565_v20, %v1563_v10 }
 0x401   : > { %1577 = vrot.lane.b32.xlu0 %v1570_v45, %s4336_s29  ;;  %1575 = vrot.lane.b32.xlu2 %v1569_v41, %s4336_s29 }
 0x44b   : > { %v1574_v60 = vpop.permute.xlu2 %1573 }
 0x44c   : > { %v5140_v23 = vsel %vm532_vm4, %v1574_v60, 0 }
 0x44d   : > { %v5143_v26 = vunpack.c.l.bf16 %v5140_v23  ;;  %v5146_v4 = vunpack.c.h.bf16 %v5140_v23 }
 0x44f   : > { %v1681_v11 = vmul.f32 %v4549_v25, %v5143_v26  ;;  %v1684_v46 = vmul.f32 %v4549_v25, %v5146_v4  ;;  %v1661_v18 = vmul.f32 %v4593_v42, %v5143_v26  ;;  %v1664_v31 = vmul.f32 %v4593_v42, %v5146_v4 }
 0x450   : > { %v1701_v49 = vmul.f32 %v4545_v22, %v5143_v26 }
 0x451   : > { %v1692_v53 = vpack.c.bf16 %v1681_v11, %v1681_v11  ;;  %v1694_v33 = vpack.c.bf16 %v1684_v46, %v1684_v46  ;;  %v1672_v62 = vpack.c.bf16 %v1661_v18, %v1661_v18  ;;  %v1674_v8 = vpack.c.bf16 %v1664_v31, %v1664_v31 }
 0x452   : > { %v1704_v46 = vmul.f32 %v4545_v22, %v5146_v4 }
 0x453   : > { %v5156_v17 = vunpack.c.l.b16 %v1692_v53  ;;  %v5158_v3 = vunpack.c.l.b16 %v1694_v33  ;;  %v5160_v44 = vunpack.c.l.b16 %v1672_v62  ;;  %v5162_v54 = vunpack.c.l.b16 %v1674_v8 }
 0x454   : > { %v1712_v53 = vpack.c.bf16 %v1701_v49, %v1701_v49 }
 0x463   : > { %v1572_v28 = vpop.permute.xlu1 %1571 }
 0x464   : > { %v5165_v61 = vsel %vm532_vm4, %v1572_v28, %v1574_v60  ;;  %v1584_v55 = vsel %vm532_vm4, 0, %v1572_v28 }
 0x465   : > { %v5170_v52 = vunpack.c.l.bf16 %v1584_v55  ;;  %v5173_v38 = vunpack.c.l.bf16 %v5165_v61  ;;  %v5175_v63 = vunpack.c.h.bf16 %v1584_v55  ;;  %v5178_v6 = vunpack.c.h.bf16 %v5165_v61  ;;  %1743 = vrot.lane.b32.xlu2 %v1584_v55, %s6518_s15  ;;  %1967 = vrot.lane.b32.xlu0 %v1584_v55, %s6516_s30 }
 0x466   : > { %1969 = vrot.lane.b32.xlu1 %v5165_v61, %s6516_s30 }
 0x467   : > { %v1639_v57 = vmul.f32 %v4641_v13, %v5170_v52  ;;  %v1640_v34 = vmul.f32 %v5173_v38, %v4649_v27  ;;  %v1642_v7 = vmul.f32 %v4641_v13, %v5175_v63  ;;  %v1643_v21 = vmul.f32 %v5178_v6, %v4649_v27 }
 0x468   : > { %v1619_v2 = vmul.f32 %v4624_v0, %v5170_v52  ;;  %v1620_v59 = vmul.f32 %v5173_v38, %v4632_v5  ;;  %v1622_v50 = vmul.f32 %v4624_v0, %v5175_v63  ;;  %v1623_v16 = vmul.f32 %v5178_v6, %v4632_v5 }
 0x469   : > { %v1651_v1 = vpack.c.bf16 %v1640_v34, %v1639_v57  ;;  %v1653_v36 = vpack.c.bf16 %v1643_v21, %v1642_v7  ;;  %v1679_v39 = vmul.f32 %v4555_v29, %v5170_v52  ;;  %v1680_v30 = vmul.f32 %v5173_v38, %v4583_v35 }
 0x46a   : > { %v1682_v43 = vmul.f32 %v4555_v29, %v5175_v63  ;;  %v1683_v37 = vmul.f32 %v5178_v6, %v4583_v35  ;;  %v1631_v9 = vpack.c.bf16 %v1620_v59, %v1619_v2  ;;  %v1633_v20 = vpack.c.bf16 %v1623_v16, %v1622_v50 }
 0x46b   : > { %v1818_v19 = vunpack.c.h.b16 %v1651_v1  ;;  %v1821_v10 = vunpack.c.h.b16 %v1653_v36  ;;  %v1691_v48 = vpack.c.bf16 %v1680_v30, %v1679_v39  ;;  %v1817_v18 = vunpack.c.l.b16 %v1651_v1 }
 0x46c   : > { %v1693_v45 = vpack.c.bf16 %v1683_v37, %v1682_v43  ;;  %v1771_v60 = vunpack.c.l.b16 %v1631_v9  ;;  %v1774_v11 = vunpack.c.l.b16 %v1633_v20  ;;  %v1820_v31 = vunpack.c.l.b16 %v1653_v36 }
 0x46d   : > { %1745 = vrot.lane.b32.xlu0 %v5165_v61, %s6518_s15  ;;  %v1830_v41 = vpack.c.b16 %v1821_v10, %v1818_v19  ;;  %v1929_v33 = vunpack.c.l.b16 %v1691_v48  ;;  %v1659_v8 = vmul.f32 %v4598_v47, %v5170_v52  ;;  %v1660_v28 = vmul.f32 %v5173_v38, %v4609_v51 }
 0x46e   : > { %1855 = vrot.lane.b32.xlu1 %v1584_v55, %s6508_s1  ;;  %v1932_v62 = vunpack.c.l.b16 %v1693_v45  ;;  %v1662_v55 = vmul.f32 %v4598_v47, %v5175_v63  ;;  %v1663_v57 = vmul.f32 %v5178_v6, %v4609_v51  ;;  %v1783_v34 = vpack.c.b16 %v1774_v11, %v1771_v60 }
 0x46f   : > { %1837 = vrot.lane.b32.xlu2 %v1830_v41, %s6514_s26  ;;  %v1829_v7 = vpack.c.b16 %v1820_v31, %v1817_v18  ;;  %v1641_v21 = vmul.f32 %v4639_v12, %v5143_v26  ;;  %v1644_v2 = vmul.f32 %v4639_v12, %v5146_v4  ;;  %v1714_v59 = vpack.c.bf16 %v1704_v46, %v1704_v46 }
 0x470   : > { %v1941_v50 = vpack.c.b16 %v1932_v62, %v1929_v33  ;;  %v1671_v16 = vpack.c.bf16 %v1660_v28, %v1659_v8  ;;  %v1673_v1 = vpack.c.bf16 %v1663_v57, %v1662_v55  ;;  %v5231_v36 = vunpack.c.l.b16 %v1712_v53 }
 0x471   : > { %v1772_v39 = vunpack.c.h.b16 %v1631_v9  ;;  %v1775_v30 = vunpack.c.h.b16 %v1633_v20  ;;  %v1699_v43 = vmul.f32 %v4547_v24, %v5170_v52  ;;  %v1700_v37 = vmul.f32 %v5173_v38, %v4565_v32 }
 0x472   : > { %v1930_v49 = vunpack.c.h.b16 %v1691_v48  ;;  %v1933_v19 = vunpack.c.h.b16 %v1693_v45  ;;  %v1702_v10 = vmul.f32 %v4547_v24, %v5175_v63  ;;  %v1703_v41 = vmul.f32 %v5178_v6, %v4565_v32 }
 0x473   : > { %v1711_v60 = vpack.c.bf16 %v1700_v37, %v1699_v43  ;;  %v5243_v11 = vunpack.c.l.b16 %v1714_v59  ;;  %v1884_v9 = vunpack.c.h.b16 %v1671_v16  ;;  %v1887_v20 = vunpack.c.h.b16 %v1673_v1 }
 0x474   : > { %v1713_v46 = vpack.c.bf16 %v1703_v41, %v1702_v10  ;;  %v1784_v33 = vpack.c.b16 %v1775_v30, %v1772_v39  ;;  %v1942_v48 = vpack.c.b16 %v1933_v19, %v1930_v49  ;;  %v1652_v45 = vpack.c.bf16 %v1641_v21, %v1641_v21 }
 0x475   : > { %1789 = vrot.lane.b32.xlu0 %v1783_v34, %s6512_s27  ;;  %v1995_v53 = vunpack.c.l.b16 %v1711_v60  ;;  %v1996_v18 = vunpack.c.h.b16 %v1711_v60  ;;  %v1654_v62 = vpack.c.bf16 %v1644_v2, %v1644_v2  ;;  %v1603_v55 = vmul.f32 %v4531_v14, %v5170_v52  ;;  %v5251_v34 = vpop.permute.xlu0 %1577  ;;  %v1576_v52 = vpop.permute.xlu2 %1575 }
 0x476   : > { %1835 = vrot.lane.b32.xlu1 %v1829_v7, %s6514_s26  ;;  %v1998_v8 = vunpack.c.l.b16 %v1713_v46  ;;  %v1999_v28 = vunpack.c.h.b16 %v1713_v46  ;;  %v1604_v57 = vmul.f32 %v4533_v15, %v5173_v38  ;;  %v1896_v7 = vpack.c.b16 %v1887_v20, %v1884_v9 }
 0x477   : > { %1947 = vrot.lane.b32.xlu2 %v1941_v50, %s6510_s20  ;;  %v1605_v59 = vmul.f32 %v4531_v14, %v5175_v63  ;;  %v1606_v21 = vmul.f32 %v4533_v15, %v5178_v6  ;;  %v1819_v38 = vunpack.c.l.b16 %v1652_v45  ;;  %v1822_v39 = vunpack.c.l.b16 %v1654_v62 }
 0x478   : > { %v5259_v2 = vpack.c.b16 %v1998_v8, %v1995_v53  ;;  %v5261_v50 = vpack.c.b16 %v1999_v28, %v1996_v18  ;;  %v1611_v30 = vpack.c.bf16 %v1604_v57, %v1603_v55  ;;  %v1580_v37 = vsel %vm532_vm4, %v1576_v52, %v5251_v34 }
 0x479   : > { %v1612_v43 = vpack.c.bf16 %v1606_v21, %v1605_v59  ;;  %v1883_v63 = vunpack.c.l.b16 %v1671_v16  ;;  %v1886_v49 = vunpack.c.l.b16 %v1673_v1  ;;  %v1587_v10 = vsel %vm532_vm4, 0, %v1576_v52 }
 0x47a   : > { %v1723_v19 = vunpack.c.l.b16 %v1611_v30  ;;  %v5267_v41 = vunpack.c.l.bf16 %v1580_v37  ;;  %v5269_v60 = vunpack.c.h.bf16 %v1580_v37  ;;  %v1831_v9 = vpack.c.b16 %v1822_v39, %v1819_v38 }
 0x47b   : > { %v1725_v6 = vunpack.c.l.b16 %v1612_v43  ;;  %v1895_v46 = vpack.c.b16 %v1886_v49, %v1883_v63  ;;  %v5273_v53 = vunpack.c.l.bf16 %v1587_v10  ;;  %v5275_v18 = vunpack.c.h.bf16 %v1587_v10 }
 0x47c   : > { %v1646_v16 = vmul.f32 %v5267_v41, %v4649_v27  ;;  %v1649_v1 = vmul.f32 %v5269_v60, %v4649_v27  ;;  %v1626_v55 = vmul.f32 %v5267_v41, %v4632_v5  ;;  %v1629_v57 = vmul.f32 %v5269_v60, %v4632_v5 }
 0x47d   : > { %1949 = vrot.lane.b32.xlu0 %v1942_v48, %s6510_s20  ;;  %v5271_v20 = vpack.c.b16 %v1725_v6, %v1723_v19  ;;  %v1648_v48 = vmul.f32 %v4641_v13, %v5275_v18  ;;  %v1625_v59 = vmul.f32 %v4624_v0, %v5273_v53  ;;  %v1628_v21 = vmul.f32 %v4624_v0, %v5275_v18 }
 0x47e   : > { %1791 = vrot.lane.b32.xlu1 %v1784_v33, %s6512_s27  ;;  %v1645_v33 = vmul.f32 %v4641_v13, %v5273_v53  ;;  %v1607_v52 = vmul.f32 %v4531_v14, %v5273_v53  ;;  %v1608_v38 = vmul.f32 %v4533_v15, %v5267_v41  ;;  %v1609_v39 = vmul.f32 %v4531_v14, %v5275_v18 }
 0x47f   : > { %1903 = vrot.lane.b32.xlu2 %v1896_v7, %s6536_s25  ;;  %v1657_v62 = vpack.c.bf16 %v1649_v1, %v1648_v48  ;;  %v1724_v7 = vunpack.c.h.b16 %v1611_v30  ;;  %v1610_v63 = vmul.f32 %v4533_v15, %v5269_v60  ;;  %v1726_v49 = vunpack.c.h.b16 %v1612_v43 }
 0x480   : > { %v1655_v45 = vpack.c.bf16 %v1646_v16, %v1645_v33  ;;  %v1635_v19 = vpack.c.bf16 %v1626_v55, %v1625_v59  ;;  %v1637_v6 = vpack.c.bf16 %v1629_v57, %v1628_v21  ;;  %v1669_v55 = vmul.f32 %v5269_v60, %v4609_v51 }
 0x481   : > { %v1826_v28 = vunpack.c.l.b16 %v1657_v62  ;;  %v5307_v16 = vpack.c.b16 %v1726_v49, %v1724_v7  ;;  %v1827_v33 = vunpack.c.h.b16 %v1657_v62  ;;  %v1665_v59 = vmul.f32 %v4598_v47, %v5273_v53 }
 0x482   : > { %v1823_v8 = vunpack.c.l.b16 %v1655_v45  ;;  %v1824_v1 = vunpack.c.h.b16 %v1655_v45  ;;  %v1778_v43 = vunpack.c.h.b16 %v1635_v19  ;;  %v1686_v45 = vmul.f32 %v5267_v41, %v4583_v35 }
 0x483   : > { %v1777_v7 = vunpack.c.l.b16 %v1635_v19  ;;  %v1668_v21 = vmul.f32 %v4598_v47, %v5275_v18 }
 0x484   : > { %v1832_v30 = vpack.c.b16 %v1826_v28, %v1823_v8  ;;  %v1781_v8 = vunpack.c.h.b16 %v1637_v6  ;;  %v1666_v28 = vmul.f32 %v5267_v41, %v4609_v51  ;;  %v1833_v49 = vpack.c.b16 %v1827_v33, %v1824_v1 }
 0x485   : > { %1839 = vrot.lane.b32.xlu0 %v1831_v9, %s6514_s26  ;;  %v1613_v9 = vpack.c.bf16 %v1608_v38, %v1607_v52  ;;  %v1685_v52 = vmul.f32 %v4555_v29, %v5273_v53  ;;  %v1688_v38 = vmul.f32 %v4555_v29, %v5275_v18 }
 0x486   : > { %1901 = vrot.lane.b32.xlu1 %v1895_v46, %s6536_s25  ;;  %v1614_v46 = vpack.c.bf16 %v1610_v63, %v1609_v39  ;;  %v1787_v39 = vpack.c.b16 %v1781_v8, %v1778_v43  ;;  %v1675_v63 = vpack.c.bf16 %v1666_v28, %v1665_v59  ;;  %v1621_v59 = vmul.f32 %v4616_v58, %v5143_v26 }
 0x487   : > { %1973 = vrot.lane.b32.xlu2 %v1587_v10, %s6516_s30  ;;  %v1727_v48 = vunpack.c.l.b16 %v1613_v9  ;;  %v1728_v40 = vunpack.c.h.b16 %v1613_v9  ;;  %v5337_v9 = vsel %vm532_vm4, %v5251_v34, 0 }
 0x488   : > { %v1729_v31 = vunpack.c.l.b16 %v1614_v46  ;;  %v1730_v56 = vunpack.c.h.b16 %v1614_v46  ;;  %v1889_v19 = vunpack.c.l.b16 %v1675_v63  ;;  %v5340_v1 = vunpack.c.l.bf16 %v5337_v9 }
 0x489   : > { %v5343_v33 = vunpack.c.h.bf16 %v5337_v9 }
 0x48a   : > { %v5320_v62 = vpack.c.b16 %v1729_v31, %v1727_v48  ;;  %v5322_v57 = vpack.c.b16 %v1730_v56, %v1728_v40  ;;  %v1677_v31 = vpack.c.bf16 %v1669_v55, %v1668_v21  ;;  %v1695_v56 = vpack.c.bf16 %v1686_v45, %v1685_v52 }
 0x48b   : > { %v1647_v34 = vmul.f32 %v4639_v12, %v5340_v1  ;;  %v1624_v21 = vmul.f32 %v4616_v58, %v5146_v4  ;;  %v1627_v26 = vmul.f32 %v4616_v58, %v5340_v1  ;;  %v1630_v4 = vmul.f32 %v4616_v58, %v5343_v33 }
 0x48c   : > { %v1935_v46 = vunpack.c.l.b16 %v1695_v56  ;;  %v1936_v43 = vunpack.c.h.b16 %v1695_v56 }
 0x48d   : > { %1975 = vrot.lane.b32.xlu0 %v1580_v37, %s6516_s30  ;;  %v1656_v52 = vpack.c.bf16 %v1647_v34, %v1647_v34  ;;  %v1634_v56 = vpack.c.bf16 %v1624_v21, %v1624_v21 }
 0x48e   : > { %1749 = vrot.lane.b32.xlu1 %v1587_v10, %s6518_s15 }
 0x48f   : > { %1751 = vrot.lane.b32.xlu2 %v1580_v37, %s6518_s15 }
 0x495   : > { %1841 = vrot.lane.b32.xlu0 %v1832_v30, %s6514_s26 }
 0x496   : > { %1861 = vrot.lane.b32.xlu1 %v1587_v10, %s6508_s1  ;;  %v1689_v10 = vmul.f32 %v5269_v60, %v4583_v35 }
 0x497   : > { %1863 = vrot.lane.b32.xlu2 %v1580_v37, %s6508_s1  ;;  %v1780_v37 = vunpack.c.l.b16 %v1637_v6  ;;  %v1892_v6 = vunpack.c.l.b16 %v1677_v31 }
 0x498   : > { %v1697_v40 = vpack.c.bf16 %v1689_v10, %v1688_v38  ;;  %v1650_v10 = vmul.f32 %v4639_v12, %v5343_v33 }
 0x499   : > { %v1786_v30 = vpack.c.b16 %v1780_v37, %v1777_v7  ;;  %v1898_v28 = vpack.c.b16 %v1892_v6, %v1889_v19  ;;  %v1890_v7 = vunpack.c.h.b16 %v1675_v63  ;;  %v1893_v37 = vunpack.c.h.b16 %v1677_v31 }
 0x49a   : > { %v1938_v48 = vunpack.c.l.b16 %v1697_v40  ;;  %v1939_v8 = vunpack.c.h.b16 %v1697_v40  ;;  %v1658_v38 = vpack.c.bf16 %v1650_v10, %v1650_v10  ;;  %v1825_v63 = vunpack.c.l.b16 %v1656_v52 }
 0x49b   : > { %v1687_v19 = vmul.f32 %v4549_v25, %v5340_v1  ;;  %v1690_v6 = vmul.f32 %v4549_v25, %v5343_v33 }
 0x49c   : > { %v1944_v55 = vpack.c.b16 %v1938_v48, %v1935_v46  ;;  %v1945_v45 = vpack.c.b16 %v1939_v8, %v1936_v43  ;;  %v1828_v31 = vunpack.c.l.b16 %v1658_v38  ;;  %v1636_v48 = vpack.c.bf16 %v1627_v26, %v1627_v26 }
 0x49d   : > { %1797 = vrot.lane.b32.xlu0 %v1787_v39, %s6512_s27  ;;  %v1899_v39 = vpack.c.b16 %v1893_v37, %v1890_v7  ;;  %v1638_v43 = vpack.c.bf16 %v1630_v4, %v1630_v4  ;;  %v1696_v8 = vpack.c.bf16 %v1687_v19, %v1687_v19  ;;  %v1667_v7 = vmul.f32 %v4593_v42, %v5340_v1 }
 0x49e   : > { %1843 = vrot.lane.b32.xlu1 %v1833_v49, %s6514_s26  ;;  %v1632_v49 = vpack.c.bf16 %v1621_v59, %v1621_v59  ;;  %v1834_v46 = vpack.c.b16 %v1828_v31, %v1825_v63  ;;  %v1670_v37 = vmul.f32 %v4593_v42, %v5343_v33  ;;  %v1706_v63 = vmul.f32 %v5267_v41, %v4565_v32 }
 0x49f   : > { %1795 = vrot.lane.b32.xlu2 %v1786_v30, %s6512_s27  ;;  %v1776_v30 = vunpack.c.l.b16 %v1634_v56  ;;  %v1937_v34 = vunpack.c.l.b16 %v1696_v8  ;;  %v1676_v52 = vpack.c.bf16 %v1667_v7, %v1667_v7  ;;  %v1709_v31 = vmul.f32 %v5269_v60, %v4565_v32 }
 0x4a0   : > { %v1773_v40 = vunpack.c.l.b16 %v1632_v49  ;;  %v1678_v38 = vpack.c.bf16 %v1670_v37, %v1670_v37  ;;  %v1705_v26 = vmul.f32 %v4547_v24, %v5273_v53  ;;  %v1708_v4 = vmul.f32 %v4547_v24, %v5275_v18  ;;  %v2044_v37 = vld [vmem:[%s6491_s6 + $0x18] sm:$0xff] }
 0x4a1   : > { %v1891_v49 = vunpack.c.l.b16 %v1676_v52  ;;  %v6538_v18 = vpack.c.b16 %v5162_v54, %v5160_v44 }
 0x4a2   : > { %v1894_v56 = vunpack.c.l.b16 %v1678_v38  ;;  %v1717_v19 = vpack.c.bf16 %v1709_v31, %v1708_v4 }
 0x4a4   : > { %v2005_v53 = vunpack.c.h.b16 %v1717_v19 }
 0x4a5   : > { %1907 = vrot.lane.b32.xlu0 %v1898_v28, %s6536_s25  ;;  %v1698_v28 = vpack.c.bf16 %v1690_v6, %v1690_v6  ;;  %v6537_v6 = vpack.c.b16 %v5158_v3, %v5156_v17  ;;  %v1707_v17 = vmul.f32 %v4545_v22, %v5340_v1  ;;  %v1710_v3 = vmul.f32 %v4545_v22, %v5343_v33 }
 0x4a6   : > { %1953 = vrot.lane.b32.xlu1 %v1944_v55, %s6510_s20  ;;  %v1779_v55 = vunpack.c.l.b16 %v1636_v48 }
 0x4a7   : > { %1955 = vrot.lane.b32.xlu2 %v1945_v45, %s6510_s20  ;;  %v1782_v45 = vunpack.c.l.b16 %v1638_v43  ;;  %v1940_v10 = vunpack.c.l.b16 %v1698_v28  ;;  %v2004_v43 = vunpack.c.l.b16 %v1717_v19  ;;  %v1716_v8 = vpack.c.bf16 %v1707_v17, %v1707_v17 }
 0x4a8   : > { %v1718_v28 = vpack.c.bf16 %v1710_v3, %v1710_v3 }
 0x4a9   : > { %v1788_v59 = vpack.c.b16 %v1782_v45, %v1779_v55  ;;  %v1946_v21 = vpack.c.b16 %v1940_v10, %v1937_v34  ;;  %v2003_v54 = vunpack.c.l.b16 %v1716_v8  ;;  %v2043_v10 = vld [vmem:[%s6491_s6 + $0x10] sm:$0xff] }
 0x4ad   : > { %1971 = vrot.lane.b32.xlu0 %v5140_v23, %s6516_s30 }
 0x4ae   : > { %1909 = vrot.lane.b32.xlu1 %v1899_v39, %s6536_s25 }
 0x4af   : > { %1857 = vrot.lane.b32.xlu2 %v5165_v61, %s6508_s1  ;;  %v1785_v61 = vpack.c.b16 %v1776_v30, %v1773_v40  ;;  %v1900_v40 = vpack.c.b16 %v1894_v56, %v1891_v49  ;;  %v1715_v30 = vpack.c.bf16 %v1706_v63, %v1705_v26 }
 0x4b1   : > { %v2002_v60 = vunpack.c.h.b16 %v1715_v30  ;;  %v2001_v48 = vunpack.c.l.b16 %v1715_v30 }
 0x4b3   : > { %v2010_v55 = vpack.c.b16 %v2004_v43, %v2001_v48 }
 0x4b5   : > { %1845 = vrot.lane.b32.xlu0 %v1834_v46, %s6514_s26  ;;  %v2011_v46 = vpack.c.b16 %v2005_v53, %v2002_v60 }
 0x4b6   : > { %1977 = vrot.lane.b32.xlu1 %v5337_v9, %s6516_s30 }
 0x4b7   : > { %1793 = vrot.lane.b32.xlu2 %v1785_v61, %s6512_s27 }
 0x4bd   : > { %1799 = vrot.lane.b32.xlu0 %v1788_v59, %s6512_s27  ;;  %v2042_v59 = vld [vmem:[%s6491_s6 + $0x8] sm:$0xff]  ;;  %s6542_s27 = smov 111  }
 0x4be   : > { %1753 = vrot.lane.b32.xlu1 %v5337_v9, %s6518_s15 }
 0x4bf   : > { %1957 = vrot.lane.b32.xlu2 %v1946_v21, %s6510_s20  ;;  %v5381_v39 = vpop.permute.xlu2 %1743 }
 0x4c5   : > { %1747 = vrot.lane.b32.xlu0 %v5140_v23, %s6518_s15 }
 0x4c6   : > { %1951 = vrot.lane.b32.xlu1 %v6537_v6, %s6510_s20  ;;  %s6541_s20 = smov 96  }
 0x4c7   : > { %1911 = vrot.lane.b32.xlu2 %v1900_v40, %s6536_s25 }
 0x4c9   : > { %v5398_v41 = vpop.permute.xlu2 %1837 }
 0x4cd   : > { %1905 = vrot.lane.b32.xlu0 %v6538_v18, %s6536_s25 }
 0x4ce   : > { %2013 = vrot.lane.b32.xlu1 %v5259_v2, %s6535_s13  ;;  %v2006_v2 = vunpack.c.l.b16 %v1718_v28 }
 0x4cf   : > { %2021 = vrot.lane.b32.xlu2 %v2011_v46, %s6535_s13 }
 0x4d0   : > { %v2012_v45 = vpack.c.b16 %v2006_v2, %v2003_v54 }
 0x4d1   : > { %v1948_v61 = vpop.permute.xlu2 %1947 }
 0x4d5   : > { %1865 = vrot.lane.b32.xlu0 %v5337_v9, %s6508_s1  ;;  %v6539_v9 = vpack.c.b16 %v5243_v11, %v5231_v36 }
 0x4d6   : > { %2019 = vrot.lane.b32.xlu1 %v2010_v55, %s6535_s13 }
 0x4d7   : > { %v1968_v44 = vpop.permute.xlu0 %1967  ;;  %2015 = vrot.lane.b32.xlu2 %v5261_v50, %s6535_s13 }
 0x4d8   : > { %v5416_v1 = vpop.permute.xlu1 %1969 }
 0x4d9   : > { %v5418_v33 = vpop.permute.xlu2 %1903  ;;  %v1979_v30 = vsel %vm729_vm12, %v1968_v44, %v5416_v1 }
 0x4dd   : > { %2023 = vrot.lane.b32.xlu0 %v2012_v45, %s6535_s13 }
 0x4de   : > { %1859 = vrot.lane.b32.xlu1 %v5140_v23, %s6508_s1  ;;  %v2041_v23 = vld [vmem:[%s6491_s6] sm:$0xff]  ;;  %s6540_s1 = smov 126  }
 0x4df   : > { %v5423_v34 = vpop.permute.xlu0 %1745  ;;  %2017 = vrot.lane.b32.xlu2 %v6539_v9, %s6535_s13 }
 0x4e0   : > { %v5429_v50 = vpop.permute.xlu1 %1855 }
 0x4e1   : > { %v1974_v7 = vpop.permute.xlu2 %1973 }
 0x4e5   : > { %2057 = vperm.xlu0 %4150, %v2043_v10  }
 0x4e6   : > { %2062 = vperm.xlu1 %4148, %v2044_v37  }
 0x4e7   : > { %2047 = vperm.xlu2 %4149, %v2041_v23   ;;  %v1790_v36 = vpop.permute.xlu0 %1789 }
 0x4e8   : > { %v1836_v11 = vpop.permute.xlu1 %1835 }
 0x4e9   : > { %v5443_v21 = vpop.permute.xlu2 %1751  ;;  %v1847_v3 = vsel %vm677_vm1, %v1836_v11, %v5398_v41 }
 0x4ed   : > { %2052 = vperm.xlu0 %4150, %v2042_v59  }
 0x4ef   : > { %v5445_v52 = vpop.permute.xlu0 %1949 }
 0x4f0   : > { %v5447_v38 = vpop.permute.xlu1 %1791  ;;  %v1959_v44 = vsel %vm720_vm13, %v1948_v61, %v5445_v52 }
 0x4f1   : > { %v5449_v49 = vpop.permute.xlu2 %1863  ;;  %v1801_v55 = vsel %vm660_vm0, %v1790_v36, %v5447_v38 }
 0x4f7   : > { %v1840_v56 = vpop.permute.xlu0 %1839 }
 0x4f8   : > { %v1902_v63 = vpop.permute.xlu1 %1901 }
 0x4f9   : > { %v1796_v40 = vpop.permute.xlu2 %1795  ;;  %v1913_v37 = vsel %vm703_vm15, %v1902_v63, %v5418_v33  ;;  %v4008_v63 = vld [vmem:[%s6490_s5 + $0x4] sm:$0xf] }
 0x4ff   : > { %v1976_v31 = vpop.permute.xlu0 %1975 }
 0x500   : > { %v1750_v26 = vpop.permute.xlu1 %1749  ;;  %v1981_v4 = vsel %vm729_vm12, %v1974_v7, %v1976_v31  ;;  %v1755_v7 = vsel %vm643_vm2, %v5381_v39, %v5423_v34  ;;  %v4009_v39 = vld [vmem:[%s6490_s5 + $0x8] sm:$0xf0] }
 0x501   : > { %2120 = vmatpush.bf16.msra.mxu1 %v1981_v4  ;;  %v1956_v60 = vpop.permute.xlu2 %1955  ;;  %v1757_v9 = vsel %vm643_vm2, %v1750_v26, %v5443_v21  ;;  %v3925_v26 = vld [vmem:[%s6490_s5] sm:$0xf]  ;;  %v3927_v4 = vld [vmem:[%s6490_s5 + $0xc] sm:$0xf0] }
 0x505   : > { %2121 = vmatpush.bf16.msra.mxu1 %v1979_v30  ;;  %v3926_v30 = vor.u32 %v4009_v39, %v3925_v26  ;;  %v3945_v39 = vld [vmem:[%s6490_s5 + $0x20] sm:$0xf] }
 0x507   : > { %v1842_v19 = vpop.permute.xlu0 %1841 }
 0x508   : > { %v1862_v6 = vpop.permute.xlu1 %1861 }
 0x509   : > { %v5455_v17 = vpop.permute.xlu2 %1857  ;;  %v1869_v59 = vsel %vm686_vm14, %v1862_v6, %v5449_v49 }
 0x50f   : > { %v1798_v53 = vpop.permute.xlu0 %1797 }
 0x510   : > { %v1844_v18 = vpop.permute.xlu1 %1843  ;;  %v1803_v8 = vsel %vm660_vm0, %v1796_v40, %v1798_v53  ;;  %v1848_v40 = vsel %vm677_vm1, %v5398_v41, %v1840_v56 }
 0x511   : > { %v1849_v46 = vsel %vm677_vm1, %v1842_v19, %v1844_v18  ;;  %v1794_v54 = vpop.permute.xlu2 %1793  ;;  %v5494_v19 = vor.u32 %v4008_v63, %v3927_v4  ;;  %v4013_v63 = vld [vmem:[%s6490_s5 + $0x28] sm:$0xf0] }
 0x512   : > { %2101 = vmatpush.bf16.msra.mxu0 %v1849_v46  ;;  %v1802_v56 = vsel %vm660_vm0, %v5447_v38, %v1794_v54  ;;  %v4012_v38 = vld [vmem:[%s6490_s5 + $0x20] sm:$0xf0]  ;;  %v3946_v4 = vor.u32 %v4013_v63, %v3945_v39 }
 0x516   : > { %2102 = vmatpush.bf16.msra.mxu0 %v1847_v3 }
 0x517   : > { %v1908_v48 = vpop.permute.xlu0 %1907 }
 0x518   : > { %v1954_v43 = vpop.permute.xlu1 %1953 }
 0x519   : > { %v1961_v28 = vsel %vm720_vm13, %v1954_v43, %v1956_v60  ;;  %v1958_v11 = vpop.permute.xlu2 %1957 }
 0x51a   : > { %2103 = vmatpush.bf16.msra.mxu0 %v1803_v8  ;;  %2122 = vmatpush.bf16.msra.mxu1 %v1961_v28 }
 0x51e   : > { %2104 = vmatpush.bf16.msra.mxu0 %v1801_v55  ;;  %2123 = vmatpush.bf16.msra.mxu1 %v1959_v44 }
 0x51f   : > { %v1972_v2 = vpop.permute.xlu0 %1971 }
 0x520   : > { %v1910_v45 = vpop.permute.xlu1 %1909  ;;  %v1980_v41 = vsel %vm729_vm12, %v5416_v1, %v1972_v2  ;;  %v3937_v1 = vld [vmem:[%s6490_s5 + $0x18] sm:$0xf] }
 0x521   : > { %v1915_v10 = vsel %vm703_vm15, %v1908_v48, %v1910_v45  ;;  %v3938_v28 = vor.u32 %v4012_v38, %v3937_v1 }
 0x522   : > { %2105 = vmatpush.bf16.msra.mxu0 %v1757_v9  ;;  %2124 = vmatpush.bf16.msra.mxu1 %v1915_v10 }
 0x526   : > { %2106 = vmatpush.bf16.msra.mxu0 %v1755_v7  ;;  %2125 = vmatpush.bf16.msra.mxu1 %v1913_v37 }
 0x527   : > { %v1846_v61 = vpop.permute.xlu0 %1845 }
 0x528   : > { %v1978_v23 = vpop.permute.xlu1 %1977  ;;  %v1850_v36 = vsel %vm677_vm1, %v1844_v18, %v1846_v61 }
 0x529   : > { %2158 = vmatpush.bf16.msra.mxu3 %v1850_v36  ;;  %v1982_v6 = vsel %vm729_vm12, %v1976_v31, %v1978_v23 }
 0x52a   : > { %2107 = vmatpush.bf16.msra.mxu0 %v5320_v62  ;;  %2126 = vmatpush.bf16.msra.mxu1 %v1869_v59  ;;  %v1867_v62 = vsel %vm686_vm14, %v5429_v50, %v5455_v17  ;;  %v1912_v50 = vpop.permute.xlu2 %1911 }
 0x52b   : > { %v1916_v44 = vsel %vm703_vm15, %v1910_v45, %v1912_v50 }
 0x52d   : > { %2159 = vmatpush.bf16.msra.mxu3 %v1848_v40 }
 0x52e   : > { %2108 = vmatpush.bf16.msra.mxu0 %v5271_v20  ;;  %2127 = vmatpush.bf16.msra.mxu1 %v1867_v62  ;;  %v1962_v20 = vsel %vm720_vm13, %v1956_v60, %v1958_v11  ;;  %v4011_v60 = vld [vmem:[%s6490_s5 + $0x1c] sm:$0xf] }
 0x52f   : > { %v1800_v18 = vpop.permute.xlu0 %1799 }
 0x530   : > { %v1754_v46 = vpop.permute.xlu1 %1753  ;;  %v1804_v3 = vsel %vm660_vm0, %v1798_v53, %v1800_v18 }
 0x531   : > { %2109 = vmatmul.bf16.vlgmr.msra.gmra.mxu0 %v3926_v30  ;;  %2128 = vmatmul.bf16.vlgmr.msra.gmra.mxu1 %v5494_v19  ;;  %v1758_v53 = vsel %vm643_vm2, %v5443_v21, %v1754_v46  ;;  %v3939_v21 = vld [vmem:[%s6490_s5 + $0x24] sm:$0xf0] }
 0x532   : > { %2177 = vmatpush.bf16.msrb.mxu0 %v1982_v6  ;;  %2160 = vmatpush.bf16.msra.mxu3 %v1804_v3  ;;  %v2022_v8 = vpop.permute.xlu2 %2021  ;;  %v3942_v55 = vor.u32 %v4011_v60, %v3939_v21 }
 0x536   : > { %2178 = vmatpush.bf16.msrb.mxu0 %v1980_v41  ;;  %2161 = vmatpush.bf16.msra.mxu3 %v1802_v56 }
 0x537   : > { %v1748_v31 = vpop.permute.xlu0 %1747 }
 0x538   : > { %v1952_v48 = vpop.permute.xlu1 %1951 }
 0x539   : > { %v1960_v43 = vsel %vm720_vm13, %v5445_v52, %v1952_v48  ;;  %v1756_v52 = vsel %vm643_vm2, %v5423_v34, %v1748_v31 }
 0x53a   : > { %2179 = vmatpush.bf16.msrb.mxu0 %v1962_v20  ;;  %2162 = vmatpush.bf16.msra.mxu3 %v1758_v53  ;;  %v2016_v10 = vpop.permute.xlu2 %2015 }
 0x53e   : > { %2180 = vmatpush.bf16.msrb.mxu0 %v1960_v43  ;;  %2163 = vmatpush.bf16.msra.mxu3 %v1756_v52 }
 0x53f   : > { %v1906_v54 = vpop.permute.xlu0 %1905 }
 0x540   : > { %v2014_v2 = vpop.permute.xlu1 %2013  ;;  %v1914_v9 = vsel %vm703_vm15, %v5418_v33, %v1906_v54  ;;  %v3933_v33 = vld [vmem:[%s6490_s5 + $0x8] sm:$0xf] }
 0x541   : > { %2114 = vmatmul.bf16.gmra.mxu0 %v3938_v28  ;;  %2133 = vmatmul.bf16.gmra.mxu1 %v3942_v55 }
 0x542   : > { %2181 = vmatpush.bf16.msrb.mxu0 %v1916_v44  ;;  %2164 = vmatpush.bf16.msra.mxu3 %v5322_v57  ;;  %v4010_v57 = vld [vmem:[%s6490_s5 + $0x10] sm:$0xf0]  ;;  %v2018_v11 = vpop.permute.xlu2 %2017 }
 0x543   : > { %v3934_v61 = vor.u32 %v4010_v57, %v3933_v33  ;;  %v2026_v26 = vsel %vm746_vm10, %v2016_v10, %v2018_v11 }
 0x546   : > { %2182 = vmatpush.bf16.msrb.mxu0 %v1914_v9  ;;  %2165 = vmatpush.bf16.msra.mxu3 %v5307_v16  ;;  %v2025_v16 = vsel %vm746_vm10, %v2014_v2, %v2016_v10 }
 0x547   : > { %v1866_v34 = vpop.permute.xlu0 %1865 }
 0x548   : > { %v2020_v7 = vpop.permute.xlu1 %2019  ;;  %v1870_v37 = vsel %vm686_vm14, %v5449_v49, %v1866_v34 }
 0x549   : > { %v2027_v45 = vsel %vm746_vm10, %v2020_v7, %v2022_v8  ;;  %2166 = vmatmul.bf16.vlgmr.msra.gmra.mxu3 %v3926_v30 }
 0x54a   : > { %2183 = vmatpush.bf16.msrb.mxu0 %v1870_v37  ;;  %2145 = vmatpush.bf16.msra.mxu2 %v2027_v45  ;;  %v2048_v50 = vpop.permute.xlu2 %2047 }
 0x54e   : > { %2146 = vmatpush.bf16.msra.mxu2 %v2025_v16 }
 0x54f   : > { %v2024_v23 = vpop.permute.xlu0 %2023 }
 0x550   : > { %v1860_v36 = vpop.permute.xlu1 %1859  ;;  %v2028_v49 = vsel %vm746_vm10, %v2022_v8, %v2024_v23 }
 0x551   : > { %3947 = vmatmul.msk.bf16.vlgmr.msra.gmra.mxu2 %vm603_vm6, %v3934_v61  ;;  %v1868_v59 = vsel %vm686_vm14, %v5455_v17, %v1860_v36  ;;  %2202 = vmatpush.bf16.msrb.mxu1 %v2028_v49 }
 0x552   : > { %2184 = vmatpush.bf16.msrb.mxu0 %v1868_v59 }
 0x555   : > { %2185 = vmatmul.bf16.vlgmr.msrb.gmra.mxu0 %v5494_v19  ;;  %2203 = vmatpush.bf16.msrb.mxu1 %v2026_v26 }
 0x557   : > { %v2058_v46 = vpop.permute.xlu0 %2057 }
 0x558   : > { %3949 = vmatmul.msk.bf16.vlgmr.msrb.gmra.mxu1 %vm603_vm6, %v3934_v61 }
 0x559   : > { %2171 = vmatmul.bf16.gmra.mxu3 %v3938_v28 }
 0x55f   : > { %v2053_v38 = vpop.permute.xlu0 %2052 }
 0x561   : > { %3948 = vmatmul.msk.bf16.gmra.mxu2 %vm603_vm6, %v3946_v4 }
 0x565   : > { %2190 = vmatmul.bf16.gmra.mxu0 %v3942_v55 }
 0x568   : > { %3950 = vmatmul.msk.bf16.gmra.mxu1 %vm603_vm6, %v3946_v4 }
 0x5ae   : > { %v2110_v17 = vpop.f32.mrf.mxu0  ;;  %v2129_v40 = vpop.f32.mrf.mxu1 }
 0x5af   : > { %v2111_v20 = vadd.f32 %v2110_v17, %v2048_v50  ;;  %v2063_v17 = vpop.permute.xlu1 %2062 }
 0x5b1   : > { %v2130_v60 = vadd.f32 %v2129_v40, %v2111_v20 }
 0x5b6   : > { %v2112_v62 = vpop.f32.mrf.mxu0  ;;  %v2131_v30 = vpop.f32.mrf.mxu1 }
 0x5b7   : > { %v2113_v21 = vadd.f32 %v2112_v62, %v2053_v38 }
 0x5b9   : > { %v2132_v44 = vadd.f32 %v2131_v30, %v2113_v21 }
 0x5be   : > { %v2115_v19 = vpop.f32.mrf.mxu0  ;;  %v2134_v6 = vpop.f32.mrf.mxu1 }
 0x5bf   : > { %v2116_v36 = vadd.f32 %v2115_v19, %v2058_v46 }
 0x5c6   : > { %v2117_v18 = vpop.f32.mrf.mxu0  ;;  %v2136_v41 = vpop.f32.mrf.mxu1 }
 0x5cc   : > { %v2167_v3 = vpop.f32.mrf.mxu3 }
 0x5cd   : > { %v2168_v31 = vadd.f32 %v2167_v3, %v2048_v50  ;;  %v2118_v3 = vadd.f32 %v2117_v18, %v2063_v17 }
 0x5d2   : > { %v2186_v56 = vpop.f32.mrf.mxu0 }
 0x5d3   : > { %v2187_v43 = vadd.f32 %v2186_v56, %v2168_v31  ;;  %v2135_v56 = vadd.f32 %v2134_v6, %v2116_v36 }
 0x5d4   : > { %v2148_v48 = vpop.f32.mrf.mxu2  ;;  %v2169_v53 = vpop.f32.mrf.mxu3 }
 0x5d5   : > { %v2205_v1 = vpop.f32.mrf.mxu1  ;;  %v2149_v52 = vadd.f32 %v2148_v48, %v2130_v60  ;;  %v2170_v28 = vadd.f32 %v2169_v53, %v2053_v38 }
 0x5d6   : > { %v2206_v8 = vadd.f32 %v2205_v1, %v2187_v43 }
 0x5d7   : > { %v2215_v10 = vmax.f32 %v2149_v52, 0.0 }
 0x5d8   : > { %v2216_v54 = vmax.f32 %v2206_v8, 0.0 }
 0x5da   : > { %v2188_v55 = vpop.f32.mrf.mxu0  ;;  %v2223_v33 = vpack.c.bf16 %v2216_v54, %v2215_v10 }
 0x5db   : > { %v2189_v2 = vadd.f32 %v2188_v55, %v2170_v28 }
 0x5dc   : > { %v2150_v9 = vpop.f32.mrf.mxu2  ;;  %v2172_v7 = vpop.f32.mrf.mxu3  ;;  %v2231_v49 = vunpack.c.l.b16 %v2223_v33  ;;  %v2232_v11 = vunpack.c.h.b16 %v2223_v33 }
 0x5dd   : > { %v2151_v34 = vadd.f32 %v2150_v9, %v2132_v44  ;;  %v2207_v37 = vpop.f32.mrf.mxu1  ;;  %v2173_v59 = vadd.f32 %v2172_v7, %v2058_v46  ;;  %v2137_v46 = vadd.f32 %v2136_v41, %v2118_v3 }
 0x5de   : > { %v2208_v45 = vadd.f32 %v2207_v37, %v2189_v2 }
 0x5df   : > { %v2217_v57 = vmax.f32 %v2151_v34, 0.0 }
 0x5e0   : > { %v2218_v16 = vmax.f32 %v2208_v45, 0.0 }
 0x5e2   : > { %v2224_v61 = vpack.c.bf16 %v2218_v16, %v2217_v57  ;;  %v2191_v23 = vpop.f32.mrf.mxu0 }
 0x5e3   : > { %v2192_v30 = vadd.f32 %v2191_v23, %v2173_v59 }
 0x5e4   : > { %v2233_v26 = vunpack.c.l.b16 %v2224_v61  ;;  %v2234_v39 = vunpack.c.h.b16 %v2224_v61  ;;  %v2153_v63 = vpop.f32.mrf.mxu2  ;;  %v2174_v50 = vpop.f32.mrf.mxu3 }
 0x5e5   : > { %v2210_v4 = vpop.f32.mrf.mxu1  ;;  %v2154_v19 = vadd.f32 %v2153_v63, %v2135_v56  ;;  %v2175_v31 = vadd.f32 %v2174_v50, %v2063_v17 }
 0x5e6   : > { %v2239_v40 = vpack.c.b16 %v2233_v26, %v2231_v49  ;;  %v2240_v62 = vpack.c.b16 %v2234_v39, %v2232_v11  ;;  %v2211_v20 = vadd.f32 %v2210_v4, %v2192_v30 }
 0x5e7   : > { %v2219_v21 = vmax.f32 %v2154_v19, 0.0 }
 0x5e8   : > { %2245 = vrot.lane.b32.xlu1 %v2240_v62, %s4336_s29  ;;  %2243 = vrot.lane.b32.xlu0 %v2239_v40, %s4336_s29  ;;  %v2220_v53 = vmax.f32 %v2211_v20, 0.0 }
 0x5ea   : > { %v2193_v48 = vpop.f32.mrf.mxu0  ;;  %v2225_v52 = vpack.c.bf16 %v2220_v53, %v2219_v21 }
 0x5eb   : > { %v2194_v43 = vadd.f32 %v2193_v48, %v2175_v31 }
 0x5ec   : > { %v2155_v1 = vpop.f32.mrf.mxu2  ;;  %v2235_v55 = vunpack.c.l.b16 %v2225_v52  ;;  %v2236_v44 = vunpack.c.h.b16 %v2225_v52 }
 0x5ed   : > { %v2156_v38 = vadd.f32 %v2155_v1, %v2137_v46  ;;  %v2212_v60 = vpop.f32.mrf.mxu1 }
 0x5ee   : > { %v2213_v8 = vadd.f32 %v2212_v60, %v2194_v43 }
 0x5ef   : > { %v2221_v18 = vmax.f32 %v2156_v38, 0.0 }
 0x5f0   : > { %v2222_v28 = vmax.f32 %v2213_v8, 0.0 }
 0x5f2   : > { %v2226_v6 = vpack.c.bf16 %v2222_v28, %v2221_v18 }
 0x5f4   : > { %v2237_v54 = vunpack.c.l.b16 %v2226_v6  ;;  %v2238_v2 = vunpack.c.h.b16 %v2226_v6 }
 0x5f6   : > { %v2241_v9 = vpack.c.b16 %v2237_v54, %v2235_v55  ;;  %v2242_v10 = vpack.c.b16 %v2238_v2, %v2236_v44 }
 0x5f8   : > { %2249 = vrot.lane.b32.xlu2 %v2242_v10, %s4336_s29  ;;  %2247 = vrot.lane.b32.xlu1 %v2241_v9, %s4336_s29 }
 0x65a   : > { %v5557_v41 = vpop.permute.xlu1 %2245  ;;  %v2244_v34 = vpop.permute.xlu0 %2243 }
 0x65b   : > { %v5561_v7 = vsel %vm532_vm4, %v2244_v34, %v5557_v41  ;;  %v5564_v37 = vsel %vm532_vm4, 0, %v2244_v34 }
 0x65c   : > { %v5567_v45 = vunpack.c.l.bf16 %v5564_v37  ;;  %v5570_v33 = vunpack.c.l.bf16 %v5561_v7  ;;  %2415 = vrot.lane.b32.xlu1 %v5564_v37, %s6518_s15  ;;  %2639 = vrot.lane.b32.xlu2 %v5564_v37, %s6516_s30  ;;  %v5577_v57 = vunpack.c.h.bf16 %v5564_v37  ;;  %v5580_v16 = vunpack.c.h.bf16 %v5561_v7 }
 0x65d   : > { %2641 = vrot.lane.b32.xlu0 %v5561_v7, %s6516_s30 }
 0x65e   : > { %v2311_v61 = vmul.f32 %v4641_v13, %v5567_v45  ;;  %v2312_v23 = vmul.f32 %v5570_v33, %v4649_v27  ;;  %v2291_v36 = vmul.f32 %v4624_v0, %v5567_v45  ;;  %v2292_v49 = vmul.f32 %v5570_v33, %v4632_v5 }
 0x65f   : > { %v2314_v11 = vmul.f32 %v4641_v13, %v5577_v57  ;;  %v2315_v59 = vmul.f32 %v5580_v16, %v4649_v27  ;;  %v2294_v26 = vmul.f32 %v4624_v0, %v5577_v57  ;;  %v2295_v39 = vmul.f32 %v5580_v16, %v4632_v5 }
 0x660   : > { %v2323_v63 = vpack.c.bf16 %v2312_v23, %v2311_v61  ;;  %v2351_v4 = vmul.f32 %v4555_v29, %v5567_v45  ;;  %v2352_v17 = vmul.f32 %v5570_v33, %v4583_v35  ;;  %v2354_v62 = vmul.f32 %v4555_v29, %v5577_v57 }
 0x661   : > { %v2325_v40 = vpack.c.bf16 %v2315_v59, %v2314_v11  ;;  %v2355_v30 = vmul.f32 %v5580_v16, %v4583_v35  ;;  %v2303_v56 = vpack.c.bf16 %v2292_v49, %v2291_v36  ;;  %v2305_v20 = vpack.c.bf16 %v2295_v39, %v2294_v26 }
 0x662   : > { %v2490_v3 = vunpack.c.h.b16 %v2323_v63  ;;  %v2489_v50 = vunpack.c.l.b16 %v2323_v63  ;;  %v2363_v48 = vpack.c.bf16 %v2352_v17, %v2351_v4  ;;  %v2331_v18 = vmul.f32 %v4598_v47, %v5567_v45  ;;  %v5624_v4 = vpop.permute.xlu2 %2249 }
 0x663   : > { %v2493_v19 = vunpack.c.h.b16 %v2325_v40  ;;  %v2492_v31 = vunpack.c.l.b16 %v2325_v40  ;;  %v2365_v46 = vpack.c.bf16 %v2355_v30, %v2354_v62  ;;  %v2443_v1 = vunpack.c.l.b16 %v2303_v56 }
 0x664   : > { %2417 = vrot.lane.b32.xlu2 %v5561_v7, %s6518_s15  ;;  %v2446_v38 = vunpack.c.l.b16 %v2305_v20  ;;  %v2601_v60 = vunpack.c.l.b16 %v2363_v48  ;;  %v2444_v8 = vunpack.c.h.b16 %v2303_v56  ;;  %v2447_v52 = vunpack.c.h.b16 %v2305_v20 }
 0x665   : > { %v2502_v53 = vpack.c.b16 %v2493_v19, %v2490_v3  ;;  %v2501_v43 = vpack.c.b16 %v2492_v31, %v2489_v50  ;;  %v2604_v21 = vunpack.c.l.b16 %v2365_v46  ;;  %v2332_v28 = vmul.f32 %v5570_v33, %v4609_v51 }
 0x666   : > { %v2334_v6 = vmul.f32 %v4598_v47, %v5577_v57  ;;  %v2335_v55 = vmul.f32 %v5580_v16, %v4609_v51  ;;  %v2455_v44 = vpack.c.b16 %v2446_v38, %v2443_v1  ;;  %v2456_v2 = vpack.c.b16 %v2447_v52, %v2444_v8 }
 0x667   : > { %2509 = vrot.lane.b32.xlu1 %v2502_v53, %s6514_s26  ;;  %2507 = vrot.lane.b32.xlu0 %v2501_v43, %s6514_s26  ;;  %v2613_v54 = vpack.c.b16 %v2604_v21, %v2601_v60  ;;  %v2343_v9 = vpack.c.bf16 %v2332_v28, %v2331_v18  ;;  %v2602_v34 = vunpack.c.h.b16 %v2363_v48  ;;  %v2605_v61 = vunpack.c.h.b16 %v2365_v46 }
 0x668   : > { %v2345_v10 = vpack.c.bf16 %v2335_v55, %v2334_v6 }
 0x669   : > { %v2556_v23 = vunpack.c.h.b16 %v2343_v9  ;;  %v2555_v49 = vunpack.c.l.b16 %v2343_v9  ;;  %v2614_v59 = vpack.c.b16 %v2605_v61, %v2602_v34 }
 0x66a   : > { %v2559_v36 = vunpack.c.h.b16 %v2345_v10  ;;  %v2558_v11 = vunpack.c.l.b16 %v2345_v10  ;;  %v2248_v26 = vpop.permute.xlu1 %2247  ;;  %v2372_v10 = vmul.f32 %v5570_v33, %v4565_v32 }
 0x66b   : > { %v2252_v17 = vsel %vm532_vm4, %v2248_v26, %v5624_v4  ;;  %v2259_v40 = vsel %vm532_vm4, 0, %v2248_v26  ;;  %v5679_v26 = vsel %vm532_vm4, %v5557_v41, 0 }
 0x66c   : > { %2461 = vrot.lane.b32.xlu2 %v2455_v44, %s6540_s1  ;;  %v2568_v39 = vpack.c.b16 %v2559_v36, %v2556_v23  ;;  %v2567_v63 = vpack.c.b16 %v2558_v11, %v2555_v49  ;;  %v5631_v62 = vunpack.c.l.bf16 %v2259_v40  ;;  %v5633_v30 = vunpack.c.l.bf16 %v2252_v17 }
 0x66d   : > { %v5635_v3 = vunpack.c.h.bf16 %v2259_v40  ;;  %v5637_v50 = vunpack.c.h.bf16 %v2252_v17  ;;  %v2371_v44 = vmul.f32 %v4547_v24, %v5567_v45  ;;  %v2374_v23 = vmul.f32 %v4547_v24, %v5577_v57 }
 0x66e   : > { %v2317_v56 = vmul.f32 %v4641_v13, %v5631_v62  ;;  %v2318_v20 = vmul.f32 %v5633_v30, %v4649_v27  ;;  %v2297_v48 = vmul.f32 %v4624_v0, %v5631_v62  ;;  %v2298_v46 = vmul.f32 %v5633_v30, %v4632_v5 }
 0x66f   : > { %2619 = vrot.lane.b32.xlu1 %v2613_v54, %s6541_s20  ;;  %2463 = vrot.lane.b32.xlu0 %v2456_v2, %s6540_s1  ;;  %v2320_v19 = vmul.f32 %v4641_v13, %v5635_v3  ;;  %v2321_v31 = vmul.f32 %v5637_v50, %v4649_v27  ;;  %v2300_v53 = vmul.f32 %v4624_v0, %v5635_v3 }
 0x670   : > { %v2301_v43 = vmul.f32 %v5637_v50, %v4632_v5  ;;  %v2327_v1 = vpack.c.bf16 %v2318_v20, %v2317_v56  ;;  %v2307_v60 = vpack.c.bf16 %v2298_v46, %v2297_v48  ;;  %v2357_v8 = vmul.f32 %v4555_v29, %v5631_v62 }
 0x671   : > { %v2329_v38 = vpack.c.bf16 %v2321_v31, %v2320_v19  ;;  %v2358_v52 = vmul.f32 %v5633_v30, %v4583_v35  ;;  %v2360_v6 = vmul.f32 %v4555_v29, %v5635_v3  ;;  %v2361_v55 = vmul.f32 %v5637_v50, %v4583_v35 }
 0x672   : > { %v2309_v21 = vpack.c.bf16 %v2301_v43, %v2300_v53  ;;  %v2495_v18 = vunpack.c.l.b16 %v2327_v1  ;;  %v2449_v54 = vunpack.c.l.b16 %v2307_v60  ;;  %v2496_v2 = vunpack.c.h.b16 %v2327_v1 }
 0x673   : > { %v2498_v28 = vunpack.c.l.b16 %v2329_v38  ;;  %v2499_v9 = vunpack.c.h.b16 %v2329_v38  ;;  %v2367_v61 = vpack.c.bf16 %v2358_v52, %v2357_v8  ;;  %v2375_v36 = vmul.f32 %v5580_v16, %v4565_v32 }
 0x674   : > { %2621 = vrot.lane.b32.xlu2 %v2614_v59, %s6541_s20  ;;  %v2452_v34 = vunpack.c.l.b16 %v2309_v21  ;;  %v2369_v11 = vpack.c.bf16 %v2361_v55, %v2360_v6  ;;  %v2383_v59 = vpack.c.bf16 %v2372_v10, %v2371_v44  ;;  %v2279_v43 = vmul.f32 %v4531_v14, %v5631_v62 }
 0x675   : > { %v2504_v49 = vpack.c.b16 %v2498_v28, %v2495_v18  ;;  %v2608_v31 = vunpack.c.h.b16 %v2367_v61  ;;  %v2280_v41 = vmul.f32 %v4533_v15, %v5633_v30  ;;  %v2281_v1 = vmul.f32 %v4531_v14, %v5635_v3 }
 0x676   : > { %v2668_v56 = vunpack.c.h.b16 %v2383_v59  ;;  %v2667_v20 = vunpack.c.l.b16 %v2383_v59  ;;  %v2458_v19 = vpack.c.b16 %v2452_v34, %v2449_v54  ;;  %v2611_v53 = vunpack.c.h.b16 %v2369_v11 }
 0x677   : > { %2575 = vrot.lane.b32.xlu1 %v2568_v39, %s6536_s25  ;;  %2573 = vrot.lane.b32.xlu0 %v2567_v63, %s6536_s25  ;;  %v2450_v39 = vunpack.c.h.b16 %v2307_v60  ;;  %v2385_v63 = vpack.c.bf16 %v2375_v36, %v2374_v23  ;;  %v2607_v38 = vunpack.c.l.b16 %v2367_v61  ;;  %v2610_v60 = vunpack.c.l.b16 %v2369_v11 }
 0x678   : > { %v2282_v52 = vmul.f32 %v4533_v15, %v5637_v50  ;;  %v2285_v18 = vpack.c.bf16 %v2280_v41, %v2279_v43  ;;  %v2275_v28 = vmul.f32 %v4531_v14, %v5567_v45  ;;  %v2276_v6 = vmul.f32 %v4533_v15, %v5570_v33 }
 0x679   : > { %v2671_v48 = vunpack.c.h.b16 %v2385_v63  ;;  %v2670_v46 = vunpack.c.l.b16 %v2385_v63  ;;  %v5701_v55 = vunpack.c.l.bf16 %v5679_v26  ;;  %v2277_v54 = vmul.f32 %v4531_v14, %v5577_v57 }
 0x67a   : > { %v2399_v10 = vunpack.c.l.b16 %v2285_v18  ;;  %v2283_v34 = vpack.c.bf16 %v2276_v6, %v2275_v28  ;;  %v2400_v61 = vunpack.c.h.b16 %v2285_v18  ;;  %v5708_v23 = vunpack.c.h.bf16 %v5679_v26 }
 0x67b   : > { %v5692_v8 = vpack.c.b16 %v2670_v46, %v2667_v20  ;;  %v2617_v45 = vpack.c.b16 %v2611_v53, %v2608_v31  ;;  %v2616_v36 = vpack.c.b16 %v2610_v60, %v2607_v38  ;;  %v2337_v57 = vmul.f32 %v4598_v47, %v5631_v62 }
 0x67c   : > { %2647 = vrot.lane.b32.xlu2 %v2252_v17, %s6516_s30  ;;  %v2395_v11 = vunpack.c.l.b16 %v2283_v34  ;;  %v2293_v46 = vmul.f32 %v4616_v58, %v5701_v55  ;;  %v5733_v53 = vsel %vm532_vm4, %v5624_v4, 0  ;;  %v2296_v43 = vmul.f32 %v4616_v58, %v5708_v23 }
 0x67d   : > { %v5738_v38 = vunpack.c.l.bf16 %v5733_v53  ;;  %v5741_v60 = vunpack.c.h.bf16 %v5733_v53 }
 0x67e   : > { %v2306_v18 = vpack.c.bf16 %v2296_v43, %v2296_v43 }
 0x67f   : > { %2645 = vrot.lane.b32.xlu1 %v2259_v40, %s6516_s30  ;;  %2421 = vrot.lane.b32.xlu0 %v2259_v40, %s6518_s15 }
 0x684   : > { %2533 = vrot.lane.b32.xlu2 %v2259_v40, %s6542_s27  ;;  %v2453_v40 = vunpack.c.h.b16 %v2309_v21  ;;  %v5690_v21 = vpack.c.b16 %v2671_v48, %v2668_v56  ;;  %v2341_v56 = vmul.f32 %v5637_v50, %v4609_v51 }
 0x686   : > { %v2459_v44 = vpack.c.b16 %v2453_v40, %v2450_v39  ;;  %v2396_v39 = vunpack.c.h.b16 %v2283_v34  ;;  %v2340_v40 = vmul.f32 %v4598_v47, %v5635_v3  ;;  %v2316_v34 = vmul.f32 %v4639_v12, %v5708_v23 }
 0x687   : > { %2423 = vrot.lane.b32.xlu1 %v2252_v17, %s6518_s15  ;;  %2535 = vrot.lane.b32.xlu0 %v2252_v17, %s6542_s27  ;;  %v2505_v17 = vpack.c.b16 %v2499_v9, %v2496_v2  ;;  %v2278_v2 = vmul.f32 %v4533_v15, %v5580_v16  ;;  %v2286_v9 = vpack.c.bf16 %v2282_v52, %v2281_v1 }
 0x688   : > { %v2338_v16 = vmul.f32 %v5633_v30, %v4609_v51  ;;  %v2349_v1 = vpack.c.bf16 %v2341_v56, %v2340_v40  ;;  %v2304_v52 = vpack.c.bf16 %v2293_v46, %v2293_v46  ;;  %v2353_v40 = vmul.f32 %v4549_v25, %v5701_v55 }
 0x689   : > { %v2284_v33 = vpack.c.bf16 %v2278_v2, %v2277_v54  ;;  %v2402_v59 = vunpack.c.h.b16 %v2286_v9  ;;  %v2322_v54 = vmul.f32 %v4639_v12, %v5741_v60  ;;  %v2448_v2 = vunpack.c.l.b16 %v2306_v18 }
 0x68a   : > { %v2347_v41 = vpack.c.bf16 %v2338_v16, %v2337_v57  ;;  %v2564_v6 = vunpack.c.l.b16 %v2349_v1  ;;  %v2445_v4 = vunpack.c.l.b16 %v2304_v52  ;;  %v2359_v57 = vmul.f32 %v4549_v25, %v5738_v38 }
 0x68b   : > { %v2397_v63 = vunpack.c.l.b16 %v2284_v33  ;;  %v2362_v16 = vmul.f32 %v4549_v25, %v5741_v60  ;;  %v2356_v56 = vmul.f32 %v4549_v25, %v5708_v23  ;;  %v2364_v52 = vpack.c.bf16 %v2353_v40, %v2353_v40 }
 0x68c   : > { %2513 = vrot.lane.b32.xlu2 %v2504_v49, %s6514_s26  ;;  %v2401_v49 = vunpack.c.l.b16 %v2286_v9  ;;  %v2561_v28 = vunpack.c.l.b16 %v2347_v41  ;;  %v2562_v9 = vunpack.c.h.b16 %v2347_v41  ;;  %v2368_v43 = vpack.c.bf16 %v2359_v57, %v2359_v57 }
 0x68d   : > { %v5725_v31 = vpack.c.b16 %v2397_v63, %v2395_v11  ;;  %v2326_v11 = vpack.c.bf16 %v2316_v34, %v2316_v34  ;;  %v2366_v18 = vpack.c.bf16 %v2356_v56, %v2356_v56  ;;  %v2380_v40 = vmul.f32 %v4547_v24, %v5635_v3 }
 0x68e   : > { %v5719_v20 = vpack.c.b16 %v2401_v49, %v2399_v10  ;;  %v2565_v10 = vunpack.c.h.b16 %v2349_v1  ;;  %v2370_v1 = vpack.c.bf16 %v2362_v16, %v2362_v16  ;;  %v2377_v16 = vmul.f32 %v4547_v24, %v5631_v62 }
 0x68f   : > { %2467 = vrot.lane.b32.xlu1 %v2458_v19, %s6540_s1  ;;  %2515 = vrot.lane.b32.xlu0 %v2505_v17, %s6514_s26  ;;  %v2398_v17 = vunpack.c.h.b16 %v2284_v33  ;;  %v5721_v19 = vpack.c.b16 %v2402_v59, %v2400_v61  ;;  %v2381_v56 = vmul.f32 %v5637_v50, %v4565_v32  ;;  %v2382_v3 = vmul.f32 %v4545_v22, %v5741_v60 }
 0x690   : > { %v2571_v33 = vpack.c.b16 %v2565_v10, %v2562_v9  ;;  %v2336_v9 = vmul.f32 %v4593_v42, %v5708_v23 }
 0x691   : > { %v5727_v48 = vpack.c.b16 %v2398_v17, %v2396_v39  ;;  %v2494_v17 = vunpack.c.l.b16 %v2326_v11 }
 0x694   : > { %2469 = vrot.lane.b32.xlu2 %v2459_v44, %s6540_s1  ;;  %v2319_v44 = vmul.f32 %v4639_v12, %v5738_v38 }
 0x696   : > { %v2328_v61 = vpack.c.bf16 %v2319_v44, %v2319_v44  ;;  %v2333_v44 = vmul.f32 %v4593_v42, %v5701_v55 }
 0x697   : > { %2627 = vrot.lane.b32.xlu1 %v2617_v45, %s6541_s20  ;;  %2625 = vrot.lane.b32.xlu0 %v2616_v36, %s6541_s20  ;;  %v2330_v45 = vpack.c.bf16 %v2322_v54, %v2322_v54  ;;  %v2457_v36 = vpack.c.b16 %v2448_v2, %v2445_v4  ;;  %v2609_v4 = vunpack.c.l.b16 %v2368_v43  ;;  %v2612_v54 = vunpack.c.l.b16 %v2370_v1 }
 0x698   : > { %v2497_v59 = vunpack.c.l.b16 %v2328_v61  ;;  %v2606_v2 = vunpack.c.l.b16 %v2366_v18  ;;  %v2389_v18 = vpack.c.bf16 %v2381_v56, %v2380_v40  ;;  %v2716_v40 = vld [vmem:[%s6493_s8 + $0x18] sm:$0xff] }
 0x699   : > { %v2500_v39 = vunpack.c.l.b16 %v2330_v45  ;;  %v2618_v61 = vpack.c.b16 %v2612_v54, %v2609_v4 }
 0x69a   : > { %v2677_v4 = vunpack.c.h.b16 %v2389_v18 }
 0x69b   : > { %v2506_v46 = vpack.c.b16 %v2500_v39, %v2497_v59  ;;  %v2339_v59 = vmul.f32 %v4593_v42, %v5738_v38  ;;  %v2342_v39 = vmul.f32 %v4593_v42, %v5741_v60 }
 0x69c   : > { %2529 = vrot.lane.b32.xlu2 %v5561_v7, %s6542_s27  ;;  %v2313_v7 = vmul.f32 %v4639_v12, %v5701_v55 }
 0x69d   : > { %v2348_v43 = vpack.c.bf16 %v2339_v59, %v2339_v59 }
 0x69e   : > { %v2324_v49 = vpack.c.bf16 %v2313_v7, %v2313_v7  ;;  %v2603_v7 = vunpack.c.l.b16 %v2364_v52 }
 0x69f   : > { %2527 = vrot.lane.b32.xlu1 %v5564_v37, %s6542_s27  ;;  %2649 = vrot.lane.b32.xlu0 %v5733_v53, %s6516_s30  ;;  %v2570_v37 = vpack.c.b16 %v2564_v6, %v2561_v28  ;;  %v2299_v28 = vmul.f32 %v4616_v58, %v5738_v38  ;;  %v2302_v6 = vmul.f32 %v4616_v58, %v5741_v60  ;;  %v2563_v62 = vunpack.c.l.b16 %v2348_v43  ;;  %v2714_v43 = vld [vmem:[%s6493_s8 + $0x8] sm:$0xff] }
 0x6a0   : > { %v2491_v63 = vunpack.c.l.b16 %v2324_v49  ;;  %v2615_v45 = vpack.c.b16 %v2606_v2, %v2603_v7  ;;  %v2390_v7 = vpack.c.bf16 %v2382_v3, %v2382_v3  ;;  %v2373_v60 = vmul.f32 %v4545_v22, %v5701_v55 }
 0x6a1   : > { %v2308_v10 = vpack.c.bf16 %v2299_v28, %v2299_v28  ;;  %v2310_v34 = vpack.c.bf16 %v2302_v6, %v2302_v6 }
 0x6a2   : > { %v2503_v41 = vpack.c.b16 %v2494_v17, %v2491_v63  ;;  %v2378_v17 = vmul.f32 %v5633_v30, %v4565_v32  ;;  %v2379_v30 = vmul.f32 %v4545_v22, %v5738_v38  ;;  %v2678_v38 = vunpack.c.l.b16 %v2390_v7 }
 0x6a3   : > { %v2451_v49 = vunpack.c.l.b16 %v2308_v10  ;;  %v2454_v11 = vunpack.c.l.b16 %v2310_v34  ;;  %v2376_v34 = vmul.f32 %v4545_v22, %v5708_v23 }
 0x6a4   : > { %2579 = vrot.lane.b32.xlu2 %v2570_v37, %s6536_s25  ;;  %v2344_v37 = vpack.c.bf16 %v2333_v44, %v2333_v44  ;;  %v2387_v52 = vpack.c.bf16 %v2378_v17, %v2377_v16  ;;  %v2388_v54 = vpack.c.bf16 %v2379_v30, %v2379_v30  ;;  %v2713_v17 = vld [vmem:[%s6493_s8] sm:$0xff] }
 0x6a6   : > { %v2557_v57 = vunpack.c.l.b16 %v2344_v37  ;;  %v2674_v50 = vunpack.c.h.b16 %v2387_v52  ;;  %v2675_v10 = vunpack.c.l.b16 %v2388_v54  ;;  %v2673_v59 = vunpack.c.l.b16 %v2387_v52 }
 0x6a7   : > { %2465 = vrot.lane.b32.xlu1 %v2457_v36, %s6540_s1  ;;  %2581 = vrot.lane.b32.xlu0 %v2571_v33, %s6536_s25  ;;  %v2346_v36 = vpack.c.bf16 %v2336_v9, %v2336_v9 }
 0x6a8   : > { %v2683_v2 = vpack.c.b16 %v2677_v4, %v2674_v50  ;;  %v2684_v37 = vpack.c.b16 %v2678_v38, %v2675_v10 }
 0x6a9   : > { %v2560_v63 = vunpack.c.l.b16 %v2346_v36 }
 0x6ab   : > { %v2569_v1 = vpack.c.b16 %v2560_v63, %v2557_v57 }
 0x6ac   : > { %2643 = vrot.lane.b32.xlu2 %v5679_v26, %s6516_s30  ;;  %s6543_s30 = smov 127  }
 0x6af   : > { %2517 = vrot.lane.b32.xlu1 %v2506_v46, %s6514_s26  ;;  %2511 = vrot.lane.b32.xlu0 %v2503_v41, %s6514_s26  ;;  %v2460_v46 = vpack.c.b16 %v2454_v11, %v2451_v49  ;;  %v2350_v41 = vpack.c.bf16 %v2342_v39, %v2342_v39  ;;  %s6544_s26 = smov 95  }
 0x6b1   : > { %v2566_v6 = vunpack.c.l.b16 %v2350_v41 }
 0x6b3   : > { %v2572_v44 = vpack.c.b16 %v2566_v6, %v2563_v62 }
 0x6b4   : > { %2419 = vrot.lane.b32.xlu2 %v5679_v26, %s6518_s15 }
 0x6b6   : > { %v5782_v33 = vpop.permute.xlu2 %2639 }
 0x6b7   : > { %2629 = vrot.lane.b32.xlu1 %v2618_v61, %s6541_s20  ;;  %2623 = vrot.lane.b32.xlu0 %v2615_v45, %s6541_s20  ;;  %v2384_v61 = vpack.c.bf16 %v2373_v60, %v2373_v60  ;;  %v2386_v45 = vpack.c.bf16 %v2376_v34, %v2376_v34 }
 0x6b9   : > { %v2669_v49 = vunpack.c.l.b16 %v2384_v61  ;;  %v2672_v11 = vunpack.c.l.b16 %v2386_v45 }
 0x6bb   : > { %v2681_v39 = vpack.c.b16 %v2672_v11, %v2669_v49 }
 0x6bc   : > { %2471 = vrot.lane.b32.xlu2 %v2460_v46, %s6540_s1 }
 0x6be   : > { %v5799_v28 = vpop.permute.xlu2 %2417 }
 0x6bf   : > { %2577 = vrot.lane.b32.xlu1 %v2569_v1, %s6536_s25  ;;  %2425 = vrot.lane.b32.xlu0 %v5733_v53, %s6518_s15 }
 0x6c4   : > { %2583 = vrot.lane.b32.xlu2 %v2572_v44, %s6536_s25 }
 0x6c6   : > { %v5809_v9 = vpop.permute.xlu2 %2461 }
 0x6c7   : > { %2693 = vrot.lane.b32.xlu1 %v2683_v2, %s6535_s13  ;;  %2537 = vrot.lane.b32.xlu0 %v5733_v53, %s6542_s27  ;;  %v2676_v53 = vunpack.c.l.b16 %v2389_v18 }
 0x6c9   : > { %v2682_v57 = vpack.c.b16 %v2676_v53, %v2673_v59 }
 0x6cc   : > { %2695 = vrot.lane.b32.xlu2 %v2684_v37, %s6535_s13 }
 0x6ce   : > { %v5819_v36 = vpop.permute.xlu2 %2621  ;;  %v2416_v55 = vpop.permute.xlu1 %2415 }
 0x6cf   : > { %2687 = vrot.lane.b32.xlu1 %v5690_v21, %s6535_s13  ;;  %2531 = vrot.lane.b32.xlu0 %v5679_v26, %s6542_s27  ;;  %v5825_v23 = vpop.permute.xlu0 %2641  ;;  %v2715_v26 = vld [vmem:[%s6493_s8 + $0x10] sm:$0xff] }
 0x6d0   : > { %v2651_v3 = vsel %vm729_vm12, %v5782_v33, %v5825_v23 }
 0x6d4   : > { %2689 = vrot.lane.b32.xlu2 %v2681_v39, %s6535_s13  ;;  %v2427_v39 = vsel %vm643_vm2, %v2416_v55, %v5799_v28 }
 0x6d6   : > { %v5828_v16 = vpop.permute.xlu2 %2647 }
 0x6d7   : > { %2685 = vrot.lane.b32.xlu1 %v5692_v8, %s6535_s13  ;;  %2691 = vrot.lane.b32.xlu0 %v2682_v57, %s6535_s13 }
 0x6d9   : > { %v5833_v21 = vpop.permute.xlu1 %2509  ;;  %v2508_v63 = vpop.permute.xlu0 %2507 }
 0x6da   : > { %v2519_v38 = vsel %vm677_vm1, %v2508_v63, %v5833_v21 }
 0x6dc   : > { %2729 = vperm.xlu2 %4149, %v2715_v26  }
 0x6de   : > { %v5844_v56 = vpop.permute.xlu2 %2533 }
 0x6df   : > { %2719 = vperm.xlu1 %4148, %v2713_v17   ;;  %2734 = vperm.xlu0 %4150, %v2716_v40   ;;  %v3953_v17 = vld [vmem:[%s6492_s7] sm:$0xf]  ;;  %v4015_v40 = vld [vmem:[%s6492_s7 + $0x8] sm:$0xf0] }
 0x6e1   : > { %v2620_v8 = vpop.permute.xlu1 %2619  ;;  %v5846_v46 = vpop.permute.xlu0 %2463 }
 0x6e2   : > { %v2473_v45 = vsel %vm660_vm0, %v5809_v9, %v5846_v46  ;;  %v2631_v49 = vsel %vm720_vm13, %v2620_v8, %v5819_v36  ;;  %v5891_v8 = vor.u32 %v4015_v40, %v3953_v17 }
 0x6e4   : > { %2724 = vperm.xlu2 %4149, %v2714_v43  }
 0x6e6   : > { %v2514_v41 = vpop.permute.xlu2 %2513 }
 0x6e9   : > { %v5851_v1 = vpop.permute.xlu1 %2575  ;;  %v2574_v52 = vpop.permute.xlu0 %2573 }
 0x6ea   : > { %v2585_v55 = vsel %vm703_vm15, %v2574_v52, %v5851_v1 }
 0x6ee   : > { %v5853_v18 = vpop.permute.xlu2 %2469 }
 0x6f1   : > { %v2646_v62 = vpop.permute.xlu1 %2645  ;;  %v2422_v6 = vpop.permute.xlu0 %2421 }
 0x6f2   : > { %v2653_v30 = vsel %vm729_vm12, %v2646_v62, %v5828_v16 }
 0x6f3   : > { %2792 = vmatpush.bf16.msrb.mxu3 %v2653_v30  ;;  %v3955_v30 = vld [vmem:[%s6492_s7 + $0xc] sm:$0xf0] }
 0x6f6   : > { %v5864_v44 = vpop.permute.xlu2 %2529 }
 0x6f7   : > { %2793 = vmatpush.bf16.msrb.mxu3 %v2651_v3 }
 0x6f9   : > { %v5860_v50 = vpop.permute.xlu1 %2423  ;;  %v5862_v4 = vpop.permute.xlu0 %2535 }
 0x6fa   : > { %v2429_v53 = vsel %vm643_vm2, %v2422_v6, %v5860_v50  ;;  %v2541_v52 = vsel %vm686_vm14, %v5844_v56, %v5862_v4 }
 0x6fe   : > { %v2580_v10 = vpop.permute.xlu2 %2579 }
 0x701   : > { %v2468_v54 = vpop.permute.xlu1 %2467  ;;  %v2516_v7 = vpop.permute.xlu0 %2515 }
 0x702   : > { %v2521_v2 = vsel %vm677_vm1, %v2514_v41, %v2516_v7  ;;  %v2475_v33 = vsel %vm660_vm0, %v2468_v54, %v5853_v18 }
 0x703   : > { %2773 = vmatpush.bf16.msrb.mxu2 %v2521_v2 }
 0x706   : > { %v2644_v61 = vpop.permute.xlu2 %2643 }
 0x707   : > { %2774 = vmatpush.bf16.msrb.mxu2 %v2519_v38  ;;  %v3965_v38 = vld [vmem:[%s6492_s7 + $0x18] sm:$0xf] }
 0x709   : > { %v2628_v60 = vpop.permute.xlu1 %2627  ;;  %v2626_v34 = vpop.permute.xlu0 %2625 }
 0x70a   : > { %v2633_v37 = vsel %vm720_vm13, %v2626_v34, %v2628_v60 }
 0x70b   : > { %2775 = vmatpush.bf16.msrb.mxu2 %v2475_v33  ;;  %2794 = vmatpush.bf16.msrb.mxu3 %v2633_v37 }
 0x70e   : > { %v2420_v57 = vpop.permute.xlu2 %2419 }
 0x70f   : > { %2776 = vmatpush.bf16.msrb.mxu2 %v2473_v45  ;;  %2795 = vmatpush.bf16.msrb.mxu3 %v2631_v49 }
 0x711   : > { %v2528_v11 = vpop.permute.xlu1 %2527  ;;  %v2650_v59 = vpop.permute.xlu0 %2649 }
 0x712   : > { %v2654_v43 = vsel %vm729_vm12, %v5828_v16, %v2650_v59  ;;  %v2652_v16 = vsel %vm729_vm12, %v5825_v23, %v2644_v61  ;;  %v2539_v3 = vsel %vm686_vm14, %v2528_v11, %v5864_v44  ;;  %v2428_v59 = vsel %vm643_vm2, %v5799_v28, %v2420_v57 }
 0x713   : > { %2777 = vmatpush.bf16.msrb.mxu2 %v2429_v53 }
 0x716   : > { %v2472_v62 = vpop.permute.xlu2 %2471 }
 0x717   : > { %2778 = vmatpush.bf16.msrb.mxu2 %v2427_v39  ;;  %v2476_v2 = vsel %vm660_vm0, %v5853_v18, %v2472_v62 }
 0x719   : > { %v2466_v63 = vpop.permute.xlu1 %2465  ;;  %v2582_v26 = vpop.permute.xlu0 %2581 }
 0x71a   : > { %v2587_v9 = vsel %vm703_vm15, %v2580_v10, %v2582_v26  ;;  %v2474_v33 = vsel %vm660_vm0, %v5846_v46, %v2466_v63  ;;  %v4017_v46 = vld [vmem:[%s6492_s7 + $0x1c] sm:$0xf] }
 0x71b   : > { %2779 = vmatpush.bf16.msrb.mxu2 %v5719_v20  ;;  %2796 = vmatpush.bf16.msrb.mxu3 %v2587_v9 }
 0x71e   : > { %v2584_v34 = vpop.permute.xlu2 %2583 }
 0x71f   : > { %2797 = vmatpush.bf16.msrb.mxu3 %v2585_v55  ;;  %2780 = vmatpush.bf16.msrb.mxu2 %v5725_v31  ;;  %v4014_v31 = vld [vmem:[%s6492_s7 + $0x4] sm:$0xf]  ;;  %v2588_v49 = vsel %vm703_vm15, %v2582_v26, %v2584_v34 }
 0x720   : > { %v3958_v54 = vor.u32 %v4014_v31, %v3955_v30 }
 0x721   : > { %v2518_v20 = vpop.permute.xlu1 %2517  ;;  %v2512_v41 = vpop.permute.xlu0 %2511 }
 0x722   : > { %v2522_v6 = vsel %vm677_vm1, %v2516_v7, %v2518_v20  ;;  %2781 = vmatmul.bf16.vlgmr.msrb.gmra.mxu2 %v5891_v8  ;;  %v2520_v56 = vsel %vm677_vm1, %v5833_v21, %v2512_v41  ;;  %v4018_v21 = vld [vmem:[%s6492_s7 + $0x20] sm:$0xf0]  ;;  %v3973_v20 = vld [vmem:[%s6492_s7 + $0x20] sm:$0xf]  ;;  %v4019_v41 = vld [vmem:[%s6492_s7 + $0x28] sm:$0xf0] }
 0x723   : > { %2849 = vmatpush.bf16.msra.mxu2 %v2654_v43  ;;  %2798 = vmatpush.bf16.msrb.mxu3 %v2541_v52  ;;  %v3966_v18 = vor.u32 %v4018_v21, %v3965_v38  ;;  %v3974_v62 = vor.u32 %v4019_v41, %v3973_v20 }
 0x724   : > { %2830 = vmatpush.bf16.msra.mxu1 %v2522_v6 }
 0x726   : > { %v2696_v11 = vpop.permute.xlu2 %2695 }
 0x727   : > { %2850 = vmatpush.bf16.msra.mxu2 %v2652_v16  ;;  %2799 = vmatpush.bf16.msrb.mxu3 %v2539_v3 }
 0x728   : > { %2831 = vmatpush.bf16.msra.mxu1 %v2520_v56 }
 0x729   : > { %v2630_v7 = vpop.permute.xlu1 %2629  ;;  %v2624_v23 = vpop.permute.xlu0 %2623 }
 0x72a   : > { %2800 = vmatmul.bf16.vlgmr.msrb.gmra.mxu3 %v3958_v54  ;;  %v2634_v10 = vsel %vm720_vm13, %v2628_v60, %v2630_v7  ;;  %v2632_v37 = vsel %vm720_vm13, %v5819_v36, %v2624_v23  ;;  %v3967_v36 = vld [vmem:[%s6492_s7 + $0x24] sm:$0xf0] }
 0x72b   : > { %2851 = vmatpush.bf16.msra.mxu2 %v2634_v10 }
 0x72c   : > { %2832 = vmatpush.bf16.msra.mxu1 %v2476_v2 }
 0x72e   : > { %v2690_v28 = vpop.permute.xlu2 %2689 }
 0x72f   : > { %2852 = vmatpush.bf16.msra.mxu2 %v2632_v37 }
 0x730   : > { %2833 = vmatpush.bf16.msra.mxu1 %v2474_v33 }
 0x731   : > { %v2578_v60 = vpop.permute.xlu1 %2577  ;;  %v2426_v61 = vpop.permute.xlu0 %2425 }
 0x732   : > { %2786 = vmatmul.bf16.gmra.mxu2 %v3966_v18  ;;  %v2430_v45 = vsel %vm643_vm2, %v5860_v50, %v2426_v61  ;;  %v2586_v53 = vsel %vm703_vm15, %v5851_v1, %v2578_v60  ;;  %v3970_v50 = vor.u32 %v4017_v46, %v3967_v36 }
 0x733   : > { %2853 = vmatpush.bf16.msra.mxu2 %v2588_v49 }
 0x734   : > { %2834 = vmatpush.bf16.msra.mxu1 %v2430_v45 }
 0x736   : > { %v2730_v23 = vpop.permute.xlu2 %2729 }
 0x737   : > { %2854 = vmatpush.bf16.msra.mxu2 %v2586_v53 }
 0x738   : > { %2835 = vmatpush.bf16.msra.mxu1 %v2428_v59 }
 0x739   : > { %v2694_v39 = vpop.permute.xlu1 %2693  ;;  %v2538_v63 = vpop.permute.xlu0 %2537 }
 0x73a   : > { %v2700_v26 = vsel %vm746_vm10, %v2694_v39, %v2696_v11  ;;  %2805 = vmatmul.bf16.gmra.mxu3 %v3970_v50  ;;  %v2542_v9 = vsel %vm686_vm14, %v5862_v4, %v2538_v63 }
 0x73b   : > { %2855 = vmatpush.bf16.msra.mxu2 %v2542_v9  ;;  %2874 = vmatpush.bf16.msra.mxu3 %v2700_v26 }
 0x73c   : > { %2836 = vmatpush.bf16.msra.mxu1 %v5721_v19  ;;  %v3961_v19 = vld [vmem:[%s6492_s7 + $0x8] sm:$0xf] }
 0x73e   : > { %v2725_v60 = vpop.permute.xlu2 %2724 }
 0x740   : > { %2837 = vmatpush.bf16.msra.mxu1 %v5727_v48  ;;  %v4016_v48 = vld [vmem:[%s6492_s7 + $0x10] sm:$0xf0] }
 0x741   : > { %v2688_v57 = vpop.permute.xlu1 %2687  ;;  %v2532_v1 = vpop.permute.xlu0 %2531  ;;  %v3962_v4 = vor.u32 %v4016_v48, %v3961_v19 }
 0x742   : > { %v2540_v17 = vsel %vm686_vm14, %v5864_v44, %v2532_v1  ;;  %v2698_v40 = vsel %vm746_vm10, %v2688_v57, %v2690_v28 }
 0x743   : > { %2838 = vmatmul.bf16.vlgmr.msra.gmra.mxu1 %v5891_v8  ;;  %2856 = vmatpush.bf16.msra.mxu2 %v2540_v17 }
 0x744   : > { %2875 = vmatpush.bf16.msra.mxu3 %v2698_v40 }
 0x746   : > { %2857 = vmatmul.bf16.vlgmr.msra.gmra.mxu2 %v3958_v54 }
 0x749   : > { %v2692_v55 = vpop.permute.xlu0 %2691  ;;  %v2686_v44 = vpop.permute.xlu1 %2685 }
 0x74a   : > { %v2699_v8 = vsel %vm746_vm10, %v2692_v55, %v2694_v39  ;;  %3977 = vmatmul.msk.bf16.vlgmr.msra.gmra.mxu3 %vm603_vm6, %v3962_v4  ;;  %v2697_v43 = vsel %vm746_vm10, %v2686_v44, %v2688_v57 }
 0x74b   : > { %2817 = vmatpush.bf16.msra.mxu0 %v2699_v8 }
 0x74f   : > { %2818 = vmatpush.bf16.msra.mxu0 %v2697_v43 }
 0x751   : > { %v2720_v38 = vpop.permute.xlu1 %2719 }
 0x752   : > { %3975 = vmatmul.msk.bf16.vlgmr.msra.gmra.mxu0 %vm603_vm6, %v3962_v4 }
 0x753   : > { %2843 = vmatmul.bf16.gmra.mxu1 %v3966_v18 }
 0x756   : > { %2862 = vmatmul.bf16.gmra.mxu2 %v3970_v50 }
 0x75a   : > { %3978 = vmatmul.msk.bf16.gmra.mxu3 %vm603_vm6, %v3974_v62 }
 0x762   : > { %3976 = vmatmul.msk.bf16.gmra.mxu0 %vm603_vm6, %v3974_v62 }
 0x7a5   : > { %v2782_v6 = vpop.f32.mrf.mxu2 }
 0x7a6   : > { %v2783_v34 = vadd.f32 %v2782_v6, %v2720_v38 }
 0x7ad   : > { %v2784_v52 = vpop.f32.mrf.mxu2  ;;  %v2801_v16 = vpop.f32.mrf.mxu3 }
 0x7ae   : > { %v2802_v37 = vadd.f32 %v2801_v16, %v2783_v34  ;;  %v2785_v36 = vadd.f32 %v2784_v52, %v2725_v60 }
 0x7b5   : > { %v2803_v31 = vpop.f32.mrf.mxu3  ;;  %v2787_v30 = vpop.f32.mrf.mxu2 }
 0x7b6   : > { %v2804_v39 = vadd.f32 %v2803_v31, %v2785_v36  ;;  %v2788_v4 = vadd.f32 %v2787_v30, %v2730_v23 }
 0x7bd   : > { %v2806_v3 = vpop.f32.mrf.mxu3  ;;  %v2789_v56 = vpop.f32.mrf.mxu2 }
 0x7be   : > { %v2807_v6 = vadd.f32 %v2806_v3, %v2788_v4 }
 0x7c0   : > { %v2839_v54 = vpop.f32.mrf.mxu1 }
 0x7c1   : > { %v2840_v18 = vadd.f32 %v2839_v54, %v2720_v38  ;;  %v2735_v54 = vpop.permute.xlu0 %2734 }
 0x7c2   : > { %v2790_v30 = vadd.f32 %v2789_v56, %v2735_v54 }
 0x7c5   : > { %v2808_v7 = vpop.f32.mrf.mxu3 }
 0x7c8   : > { %v2841_v10 = vpop.f32.mrf.mxu1 }
 0x7c9   : > { %v2858_v2 = vpop.f32.mrf.mxu2  ;;  %v2842_v45 = vadd.f32 %v2841_v10, %v2725_v60 }
 0x7ca   : > { %v2859_v49 = vadd.f32 %v2858_v2, %v2840_v18  ;;  %v2809_v18 = vadd.f32 %v2808_v7, %v2790_v30 }
 0x7cd   : > { %v2877_v21 = vpop.f32.mrf.mxu3 }
 0x7ce   : > { %v2878_v11 = vadd.f32 %v2877_v21, %v2859_v49 }
 0x7cf   : > { %v2820_v33 = vpop.f32.mrf.mxu0 }
 0x7d0   : > { %v2821_v46 = vadd.f32 %v2820_v33, %v2802_v37  ;;  %v2844_v53 = vpop.f32.mrf.mxu1  ;;  %v2888_v28 = vmax.f32 %v2878_v11, 0.0 }
 0x7d1   : > { %v2860_v61 = vpop.f32.mrf.mxu2  ;;  %v2845_v52 = vadd.f32 %v2844_v53, %v2730_v23 }
 0x7d2   : > { %v2861_v59 = vadd.f32 %v2860_v61, %v2842_v45  ;;  %v2887_v63 = vmax.f32 %v2821_v46, 0.0 }
 0x7d4   : > { %v2895_v17 = vpack.c.bf16 %v2888_v28, %v2887_v63 }
 0x7d5   : > { %v2879_v50 = vpop.f32.mrf.mxu3 }
 0x7d6   : > { %v2880_v26 = vadd.f32 %v2879_v50, %v2861_v59  ;;  %v2903_v8 = vunpack.c.l.b16 %v2895_v17  ;;  %v2904_v44 = vunpack.c.h.b16 %v2895_v17 }
 0x7d7   : > { %v2822_v9 = vpop.f32.mrf.mxu0 }
 0x7d8   : > { %v2823_v57 = vadd.f32 %v2822_v9, %v2804_v39  ;;  %v2890_v40 = vmax.f32 %v2880_v26, 0.0  ;;  %v2846_v41 = vpop.f32.mrf.mxu1 }
 0x7d9   : > { %v2863_v1 = vpop.f32.mrf.mxu2  ;;  %v2847_v10 = vadd.f32 %v2846_v41, %v2735_v54 }
 0x7da   : > { %v2889_v19 = vmax.f32 %v2823_v57, 0.0  ;;  %v2864_v38 = vadd.f32 %v2863_v1, %v2845_v52 }
 0x7dc   : > { %v2896_v48 = vpack.c.bf16 %v2890_v40, %v2889_v19 }
 0x7dd   : > { %v2882_v55 = vpop.f32.mrf.mxu3 }
 0x7de   : > { %v2905_v43 = vunpack.c.l.b16 %v2896_v48  ;;  %v2906_v20 = vunpack.c.h.b16 %v2896_v48  ;;  %v2883_v34 = vadd.f32 %v2882_v55, %v2864_v38 }
 0x7df   : > { %v2825_v62 = vpop.f32.mrf.mxu0 }
 0x7e0   : > { %v2911_v16 = vpack.c.b16 %v2905_v43, %v2903_v8  ;;  %v2912_v31 = vpack.c.b16 %v2906_v20, %v2904_v44  ;;  %v2826_v21 = vadd.f32 %v2825_v62, %v2807_v6  ;;  %v2892_v23 = vmax.f32 %v2883_v34, 0.0 }
 0x7e1   : > { %v2865_v2 = vpop.f32.mrf.mxu2 }
 0x7e2   : > { %2917 = vrot.lane.b32.xlu0 %v2912_v31, %s4336_s29  ;;  %2915 = vrot.lane.b32.xlu2 %v2911_v16, %s4336_s29  ;;  %v2866_v33 = vadd.f32 %v2865_v2, %v2847_v10  ;;  %v2891_v60 = vmax.f32 %v2826_v21, 0.0 }
 0x7e4   : > { %v2897_v49 = vpack.c.bf16 %v2892_v23, %v2891_v60 }
 0x7e5   : > { %v2884_v37 = vpop.f32.mrf.mxu3 }
 0x7e6   : > { %v2885_v61 = vadd.f32 %v2884_v37, %v2866_v33  ;;  %v2907_v59 = vunpack.c.l.b16 %v2897_v49  ;;  %v2908_v53 = vunpack.c.h.b16 %v2897_v49 }
 0x7e7   : > { %v2827_v3 = vpop.f32.mrf.mxu0 }
 0x7e8   : > { %v2828_v45 = vadd.f32 %v2827_v3, %v2809_v18  ;;  %v2894_v46 = vmax.f32 %v2885_v61, 0.0 }
 0x7ea   : > { %v2893_v36 = vmax.f32 %v2828_v45, 0.0 }
 0x7ec   : > { %v2898_v11 = vpack.c.bf16 %v2894_v46, %v2893_v36 }
 0x7ee   : > { %v2909_v50 = vunpack.c.l.b16 %v2898_v11  ;;  %v2910_v39 = vunpack.c.h.b16 %v2898_v11 }
 0x7f0   : > { %v2913_v63 = vpack.c.b16 %v2909_v50, %v2907_v59  ;;  %v2914_v26 = vpack.c.b16 %v2910_v39, %v2908_v53 }
 0x7f2   : > { %2921 = vrot.lane.b32.xlu1 %v2914_v26, %s4336_s29  ;;  %2919 = vrot.lane.b32.xlu0 %v2913_v63, %s4336_s29  ;;  %s6545_s29 = smov 112  }
 0x83c   : > { %v2916_v56 = vpop.permute.xlu2 %2915 }
 0x83d   : > { %v2928_v7 = vsel %vm532_vm4, 0, %v2916_v56 }
 0x83e   : > { %3087 = vrot.lane.b32.xlu0 %v2928_v7, %s6543_s30  ;;  %3311 = vrot.lane.b32.xlu1 %v2928_v7, %s6544_s26  ;;  %v5973_v9 = vunpack.c.l.bf16 %v2928_v7  ;;  %v5975_v28 = vunpack.c.h.bf16 %v2928_v7 }
 0x840   : > { %v2983_v19 = vmul.f32 %v4641_v13, %v5973_v9  ;;  %v2986_v48 = vmul.f32 %v4641_v13, %v5975_v28  ;;  %v2963_v4 = vmul.f32 %v4624_v0, %v5973_v9  ;;  %v2966_v55 = vmul.f32 %v4624_v0, %v5975_v28 }
 0x841   : > { %v3023_v2 = vmul.f32 %v4555_v29, %v5973_v9  ;;  %v3026_v10 = vmul.f32 %v4555_v29, %v5975_v28  ;;  %v3003_v63 = vmul.f32 %v4598_v47, %v5973_v9  ;;  %v3006_v26 = vmul.f32 %v4598_v47, %v5975_v28 }
 0x854   : > { %v2918_v57 = vpop.permute.xlu0 %2917 }
 0x855   : > { %v5978_v1 = vsel %vm532_vm4, %v2916_v56, %v2918_v57  ;;  %v6011_v54 = vsel %vm532_vm4, %v2918_v57, 0 }
 0x856   : > { %v5981_v17 = vunpack.c.l.bf16 %v5978_v1  ;;  %v5984_v40 = vunpack.c.h.bf16 %v5978_v1  ;;  %3089 = vrot.lane.b32.xlu1 %v5978_v1, %s6543_s30  ;;  %3313 = vrot.lane.b32.xlu2 %v5978_v1, %s6544_s26  ;;  %v6018_v18 = vunpack.c.l.bf16 %v6011_v54  ;;  %v6021_v60 = vunpack.c.h.bf16 %v6011_v54 }
 0x858   : > { %v2984_v8 = vmul.f32 %v5981_v17, %v4649_v27  ;;  %v2987_v44 = vmul.f32 %v5984_v40, %v4649_v27  ;;  %v2964_v43 = vmul.f32 %v5981_v17, %v4632_v5  ;;  %v2967_v20 = vmul.f32 %v5984_v40, %v4632_v5 }
 0x859   : > { %v3024_v41 = vmul.f32 %v5981_v17, %v4583_v35  ;;  %v3027_v62 = vmul.f32 %v5984_v40, %v4583_v35  ;;  %v3004_v36 = vmul.f32 %v5981_v17, %v4609_v51  ;;  %v3007_v11 = vmul.f32 %v5984_v40, %v4609_v51 }
 0x85a   : > { %v2995_v6 = vpack.c.bf16 %v2984_v8, %v2983_v19  ;;  %v2997_v52 = vpack.c.bf16 %v2987_v44, %v2986_v48  ;;  %v2975_v16 = vpack.c.bf16 %v2964_v43, %v2963_v4  ;;  %v2977_v31 = vpack.c.bf16 %v2967_v20, %v2966_v55 }
 0x85b   : > { %v3035_v33 = vpack.c.bf16 %v3024_v41, %v3023_v2  ;;  %v3037_v37 = vpack.c.bf16 %v3027_v62, %v3026_v10  ;;  %v2985_v50 = vmul.f32 %v4639_v12, %v6018_v18  ;;  %v2988_v39 = vmul.f32 %v4639_v12, %v6021_v60 }
 0x85c   : > { %v3162_v38 = vunpack.c.h.b16 %v2995_v6  ;;  %v3165_v21 = vunpack.c.h.b16 %v2997_v52  ;;  %v3115_v30 = vunpack.c.l.b16 %v2975_v16  ;;  %v3118_v34 = vunpack.c.l.b16 %v2977_v31 }
 0x85d   : > { %v3161_v23 = vunpack.c.l.b16 %v2995_v6  ;;  %v3164_v45 = vunpack.c.l.b16 %v2997_v52  ;;  %v3273_v49 = vunpack.c.l.b16 %v3035_v33  ;;  %v3276_v46 = vunpack.c.l.b16 %v3037_v37 }
 0x85e   : > { %3199 = vrot.lane.b32.xlu2 %v2928_v7, %s6542_s27  ;;  %v3174_v61 = vpack.c.b16 %v3165_v21, %v3162_v38  ;;  %v3127_v3 = vpack.c.b16 %v3118_v34, %v3115_v30  ;;  %v3274_v59 = vunpack.c.h.b16 %v3035_v33  ;;  %v3277_v53 = vunpack.c.h.b16 %v3037_v37 }
 0x85f   : > { %v3173_v56 = vpack.c.b16 %v3164_v45, %v3161_v23  ;;  %v3015_v7 = vpack.c.bf16 %v3004_v36, %v3003_v63  ;;  %v3017_v57 = vpack.c.bf16 %v3007_v11, %v3006_v26  ;;  %v3285_v19 = vpack.c.b16 %v3276_v46, %v3273_v49 }
 0x860   : > { %3181 = vrot.lane.b32.xlu0 %v3174_v61, %s6545_s29  ;;  %3133 = vrot.lane.b32.xlu1 %v3127_v3, %s6540_s1  ;;  %v3286_v48 = vpack.c.b16 %v3277_v53, %v3274_v59  ;;  %v2996_v4 = vpack.c.bf16 %v2985_v50, %v2985_v50  ;;  %v2998_v55 = vpack.c.bf16 %v2988_v39, %v2988_v39  ;;  %v3116_v43 = vunpack.c.h.b16 %v2975_v16 }
 0x861   : > { %v3119_v20 = vunpack.c.h.b16 %v2977_v31  ;;  %v3228_v41 = vunpack.c.h.b16 %v3015_v7  ;;  %v3231_v62 = vunpack.c.h.b16 %v3017_v57  ;;  %v3044_v38 = vmul.f32 %v5981_v17, %v4565_v32 }
 0x862   : > { %v3163_v52 = vunpack.c.l.b16 %v2996_v4  ;;  %v3166_v2 = vunpack.c.l.b16 %v2998_v55  ;;  %v3043_v31 = vmul.f32 %v4547_v24, %v5973_v9  ;;  %v3047_v3 = vmul.f32 %v5984_v40, %v4565_v32 }
 0x863   : > { %v3128_v21 = vpack.c.b16 %v3119_v20, %v3116_v43  ;;  %v3240_v16 = vpack.c.b16 %v3231_v62, %v3228_v41  ;;  %v3227_v45 = vunpack.c.l.b16 %v3015_v7  ;;  %v3230_v49 = vunpack.c.l.b16 %v3017_v57 }
 0x864   : > { %v2920_v8 = vpop.permute.xlu0 %2919  ;;  %v6039_v44 = vpop.permute.xlu1 %2921  ;;  %v3175_v61 = vpack.c.b16 %v3166_v2, %v3163_v52  ;;  %v6069_v23 = vpack.c.bf16 %v3044_v38, %v3043_v31  ;;  %v3046_v46 = vmul.f32 %v4547_v24, %v5975_v28  ;;  %v3025_v26 = vmul.f32 %v4549_v25, %v6018_v18 }
 0x865   : > { %v6044_v6 = vsel %vm532_vm4, 0, %v2920_v8  ;;  %v6048_v10 = vsel %vm532_vm4, %v2920_v8, %v6039_v44  ;;  %v3239_v63 = vpack.c.b16 %v3230_v49, %v3227_v45  ;;  %v6131_v45 = vmul.f32 %v4531_v14, %v5975_v28 }
 0x866   : > { %3179 = vrot.lane.b32.xlu2 %v3173_v56, %s6545_s29  ;;  %v6053_v30 = vunpack.c.l.bf16 %v6044_v6  ;;  %v6058_v34 = vunpack.c.l.bf16 %v6048_v10  ;;  %v6061_v33 = vunpack.c.h.bf16 %v6044_v6  ;;  %v6064_v37 = vunpack.c.h.bf16 %v6048_v10 }
 0x867   : > { %v3057_v50 = vpack.c.bf16 %v3047_v3, %v3046_v46  ;;  %v3340_v39 = vunpack.c.h.b16 %v6069_v23  ;;  %v3028_v56 = vmul.f32 %v4549_v25, %v6021_v60  ;;  %v3036_v43 = vpack.c.bf16 %v3025_v26, %v3025_v26 }
 0x868   : > { %3291 = vrot.lane.b32.xlu0 %v3285_v19, %s6541_s20  ;;  %3293 = vrot.lane.b32.xlu1 %v3286_v48, %s6541_s20  ;;  %v2989_v36 = vmul.f32 %v4641_v13, %v6053_v30  ;;  %v2990_v11 = vmul.f32 %v6058_v34, %v4649_v27  ;;  %v2992_v59 = vmul.f32 %v4641_v13, %v6061_v33  ;;  %v6135_v49 = vsel %vm532_vm4, %v6039_v44, 0 }
 0x869   : > { %v2993_v53 = vmul.f32 %v6064_v37, %v4649_v27  ;;  %v2969_v7 = vmul.f32 %v4624_v0, %v6053_v30  ;;  %v3343_v57 = vunpack.c.h.b16 %v3057_v50  ;;  %v3005_v13 = vmul.f32 %v4593_v42, %v6018_v18 }
 0x86a   : > { %v6093_v27 = vpack.c.bf16 %v2990_v11, %v2989_v36  ;;  %v2970_v48 = vmul.f32 %v6058_v34, %v4632_v5  ;;  %v2972_v4 = vmul.f32 %v4624_v0, %v6061_v33  ;;  %v2973_v55 = vmul.f32 %v6064_v37, %v4632_v5 }
 0x86b   : > { %v6095_v19 = vpack.c.bf16 %v2993_v53, %v2992_v59  ;;  %v6103_v8 = vpack.c.b16 %v3343_v57, %v3340_v39  ;;  %v3038_v20 = vpack.c.bf16 %v3028_v56, %v3028_v56  ;;  %v6109_v41 = vunpack.c.l.b16 %v3036_v43 }
 0x86c   : > { %v3008_v0 = vmul.f32 %v4593_v42, %v6021_v60  ;;  %v3016_v52 = vpack.c.bf16 %v3005_v13, %v3005_v13  ;;  %v3167_v5 = vunpack.c.l.b16 %v6093_v27  ;;  %v6117_v38 = vpack.c.bf16 %v2970_v48, %v2969_v7 }
 0x86d   : > { %v6111_v62 = vunpack.c.l.b16 %v3038_v20  ;;  %v3170_v2 = vunpack.c.l.b16 %v6095_v19  ;;  %v6127_v3 = vmul.f32 %v4531_v14, %v5973_v9  ;;  %v3009_v9 = vmul.f32 %v4598_v47, %v6053_v30 }
 0x86e   : > { %3135 = vrot.lane.b32.xlu2 %v3128_v21, %s6540_s1  ;;  %v6119_v21 = vpack.c.bf16 %v2973_v55, %v2972_v4  ;;  %v3018_v31 = vpack.c.bf16 %v3008_v0, %v3008_v0  ;;  %v3122_v36 = vunpack.c.h.b16 %v6117_v38  ;;  %v3010_v28 = vmul.f32 %v6058_v34, %v4609_v51 }
 0x86f   : > { %v3176_v46 = vpack.c.b16 %v3170_v2, %v3167_v5  ;;  %v3339_v53 = vunpack.c.l.b16 %v6069_v23  ;;  %v3012_v44 = vmul.f32 %v4598_v47, %v6061_v33  ;;  %v3013_v39 = vmul.f32 %v6064_v37, %v4609_v51 }
 0x870   : > { %3247 = vrot.lane.b32.xlu0 %v3240_v16, %s6536_s25  ;;  %3183 = vrot.lane.b32.xlu1 %v3175_v61, %s6545_s29  ;;  %v3287_v16 = vpack.c.b16 %v6111_v62, %v6109_v41  ;;  %v6123_v61 = vunpack.c.l.b16 %v3016_v52  ;;  %v6140_v11 = vunpack.c.l.b16 %v3018_v31  ;;  %v3125_v59 = vunpack.c.h.b16 %v6119_v21 }
 0x871   : > { %v3342_v26 = vunpack.c.l.b16 %v3057_v50  ;;  %v6158_v56 = vunpack.c.l.bf16 %v6135_v49  ;;  %v3168_v23 = vunpack.c.h.b16 %v6093_v27  ;;  %v3171_v7 = vunpack.c.h.b16 %v6095_v19 }
 0x872   : > { %v3049_v57 = vmul.f32 %v4547_v24, %v6053_v30  ;;  %v3121_v13 = vunpack.c.l.b16 %v6117_v38  ;;  %v3050_v51 = vmul.f32 %v6058_v34, %v4565_v32  ;;  %v3052_v50 = vmul.f32 %v4547_v24, %v6061_v33 }
 0x873   : > { %v6165_v47 = vpack.c.b16 %v3342_v26, %v3339_v53  ;;  %v3131_v48 = vpack.c.b16 %v3125_v59, %v3122_v36  ;;  %v3124_v4 = vunpack.c.l.b16 %v6119_v21  ;;  %v6172_v55 = vpack.c.bf16 %v3010_v28, %v3009_v9 }
 0x874   : > { %v3053_v27 = vmul.f32 %v6064_v37, %v4565_v32  ;;  %v6176_v19 = vpack.c.bf16 %v3013_v39, %v3012_v44  ;;  %v3059_v43 = vpack.c.bf16 %v3050_v51, %v3049_v57  ;;  %v3045_v20 = vmul.f32 %v4545_v22, %v6018_v18 }
 0x875   : > { %v3048_v0 = vmul.f32 %v4545_v22, %v6021_v60  ;;  %v3029_v24 = vmul.f32 %v4555_v29, %v6053_v30  ;;  %v3030_v52 = vmul.f32 %v6058_v34, %v4583_v35  ;;  %v3032_v5 = vmul.f32 %v4555_v29, %v6061_v33 }
 0x876   : > { %3245 = vrot.lane.b32.xlu2 %v3239_v63, %s6536_s25  ;;  %v3241_v63 = vpack.c.b16 %v6140_v11, %v6123_v61  ;;  %v3061_v2 = vpack.c.bf16 %v3053_v27, %v3052_v50  ;;  %v3345_v32 = vunpack.c.l.b16 %v3059_v43  ;;  %v3346_v38 = vunpack.c.h.b16 %v3059_v43 }
 0x877   : > { %v3056_v21 = vpack.c.bf16 %v3045_v20, %v3045_v20  ;;  %v3058_v31 = vpack.c.bf16 %v3048_v0, %v3048_v0  ;;  %v3033_v36 = vmul.f32 %v6064_v37, %v4583_v35  ;;  %v3236_v29 = vunpack.c.l.b16 %v6176_v19 }
 0x878   : > { %3317 = vrot.lane.b32.xlu0 %v6044_v6, %s6544_s26  ;;  %3319 = vrot.lane.b32.xlu1 %v6048_v10, %s6544_s26  ;;  %v3348_v59 = vunpack.c.l.b16 %v3061_v2  ;;  %v3349_v9 = vunpack.c.h.b16 %v3061_v2  ;;  %v2951_v53 = vmul.f32 %v4531_v14, %v6053_v30  ;;  %v2952_v35 = vmul.f32 %v4533_v15, %v6058_v34 }
 0x879   : > { %v6197_v28 = vunpack.c.l.b16 %v3056_v21  ;;  %v6212_v26 = vunpack.c.h.bf16 %v6135_v49  ;;  %v2954_v51 = vmul.f32 %v4533_v15, %v6064_v37  ;;  %v2948_v30 = vmul.f32 %v4533_v15, %v5981_v17 }
 0x87a   : > { %v6203_v44 = vpack.c.b16 %v3348_v59, %v3345_v32  ;;  %v6205_v39 = vpack.c.b16 %v3349_v9, %v3346_v38  ;;  %v3177_v50 = vpack.c.b16 %v3171_v7, %v3168_v23  ;;  %v2957_v27 = vpack.c.bf16 %v2952_v35, %v2951_v53 }
 0x87b   : > { %v2950_v34 = vmul.f32 %v4533_v15, %v5984_v40  ;;  %v3039_v43 = vpack.c.bf16 %v3030_v52, %v3029_v24  ;;  %v2955_v20 = vpack.c.bf16 %v2948_v30, %v6127_v3  ;;  %v3234_v53 = vunpack.c.h.b16 %v6172_v55 }
 0x87c   : > { %v3071_v2 = vunpack.c.l.b16 %v2957_v27  ;;  %v3072_v38 = vunpack.c.h.b16 %v2957_v27  ;;  %v3237_v35 = vunpack.c.h.b16 %v6176_v19  ;;  %v3054_v41 = vmul.f32 %v4545_v22, %v6212_v26 }
 0x87d   : > { %v2956_v32 = vpack.c.bf16 %v2950_v34, %v6131_v45  ;;  %v3067_v17 = vunpack.c.l.b16 %v2955_v20  ;;  %v3068_v7 = vunpack.c.h.b16 %v2955_v20  ;;  %v3279_v15 = vunpack.c.l.b16 %v3039_v43 }
 0x87e   : > { %3093 = vrot.lane.b32.xlu2 %v6044_v6, %s6543_s30  ;;  %v3243_v27 = vpack.c.b16 %v3237_v35, %v3234_v53  ;;  %vm3592_vm4 = vcmask 1041408  }
 0x880   : > { %3095 = vrot.lane.b32.xlu0 %v6048_v10, %s6543_s30  ;;  %3185 = vrot.lane.b32.xlu1 %v3176_v46, %s6545_s29  ;;  %v3233_v46 = vunpack.c.l.b16 %v6172_v55 }
 0x882   : > { %v3242_v0 = vpack.c.b16 %v3236_v29, %v3233_v46  ;;  %v2994_v46 = vmul.f32 %v4639_v12, %v6212_v26 }
 0x884   : > { %v3002_v29 = vpack.c.bf16 %v2994_v46, %v2994_v46 }
 0x886   : > { %3205 = vrot.lane.b32.xlu2 %v6044_v6, %s6542_s27  ;;  %v6199_v6 = vunpack.c.l.b16 %v3058_v31  ;;  %v2991_v31 = vmul.f32 %v4639_v12, %v6158_v56  ;;  %v2968_v12 = vmul.f32 %v4616_v58, %v6021_v60  ;;  %v3172_v30 = vunpack.c.l.b16 %v3002_v29 }
 0x888   : > { %3207 = vrot.lane.b32.xlu0 %v6048_v10, %s6542_s27  ;;  %3141 = vrot.lane.b32.xlu1 %v3131_v48, %s6540_s1  ;;  %v2953_v10 = vmul.f32 %v4531_v14, %v6061_v33  ;;  %v3353_v57 = vpack.c.b16 %v6199_v6, %v6197_v28  ;;  %v3130_v48 = vpack.c.b16 %v3124_v4, %v3121_v13  ;;  %v3069_v13 = vunpack.c.l.b16 %v2956_v32 }
 0x889   : > { %v3041_v14 = vpack.c.bf16 %v3033_v36, %v3032_v5  ;;  %v3070_v4 = vunpack.c.h.b16 %v2956_v32  ;;  %v3280_v5 = vunpack.c.h.b16 %v3039_v43  ;;  %v3000_v9 = vpack.c.bf16 %v2991_v31, %v2991_v31 }
 0x88a   : > { %v2958_v33 = vpack.c.bf16 %v2954_v51, %v2953_v10  ;;  %v6231_v45 = vpack.c.b16 %v3069_v13, %v3067_v17  ;;  %v2965_v10 = vmul.f32 %v4616_v58, %v6018_v18  ;;  %v2978_v19 = vpack.c.bf16 %v2968_v12, %v2968_v12 }
 0x88b   : > { %v3282_v40 = vunpack.c.l.b16 %v3041_v14  ;;  %v6233_v52 = vpack.c.b16 %v3070_v4, %v3068_v7  ;;  %v3283_v21 = vunpack.c.h.b16 %v3041_v14  ;;  %v3169_v51 = vunpack.c.l.b16 %v3000_v9 }
 0x88c   : > { %v3073_v37 = vunpack.c.l.b16 %v2958_v33  ;;  %v3074_v23 = vunpack.c.h.b16 %v2958_v33  ;;  %v2976_v34 = vpack.c.bf16 %v2965_v10, %v2965_v10  ;;  %v3120_v60 = vunpack.c.l.b16 %v2978_v19 }
 0x88d   : > { %v3288_v36 = vpack.c.b16 %v3282_v40, %v3279_v15  ;;  %v3289_v59 = vpack.c.b16 %v3283_v21, %v3280_v5  ;;  %v3178_v55 = vpack.c.b16 %v3172_v30, %v3169_v51  ;;  %v3011_v7 = vmul.f32 %v4593_v42, %v6158_v56 }
 0x88e   : > { %3187 = vrot.lane.b32.xlu2 %v3177_v50, %s6545_s29  ;;  %v6227_v3 = vpack.c.b16 %v3073_v37, %v3071_v2  ;;  %v6229_v24 = vpack.c.b16 %v3074_v23, %v3072_v38  ;;  %v2971_v50 = vmul.f32 %v4616_v58, %v6158_v56  ;;  %v3117_v18 = vunpack.c.l.b16 %v2976_v34 }
 0x88f   : > { %v3031_v2 = vmul.f32 %v4549_v25, %v6158_v56  ;;  %v3062_v21 = vpack.c.bf16 %v3054_v41, %v3054_v41 }
 0x890   : > { %3139 = vrot.lane.b32.xlu0 %v3130_v48, %s6540_s1  ;;  %3251 = vrot.lane.b32.xlu1 %v3242_v0, %s6536_s25  ;;  %v2974_v48 = vmul.f32 %v4616_v58, %v6212_v26  ;;  %v2980_v43 = vpack.c.bf16 %v2971_v50, %v2971_v50  ;;  %v3129_v58 = vpack.c.b16 %v3120_v60, %v3117_v18 }
 0x891   : > { %v3040_v32 = vpack.c.bf16 %v3031_v2, %v3031_v2  ;;  %v3350_v31 = vunpack.c.l.b16 %v3062_v21 }
 0x892   : > { %v2982_v14 = vpack.c.bf16 %v2974_v48, %v2974_v48  ;;  %v3123_v33 = vunpack.c.l.b16 %v2980_v43 }
 0x893   : > { %v3281_v17 = vunpack.c.l.b16 %v3040_v32 }
 0x894   : > { %v3126_v20 = vunpack.c.l.b16 %v2982_v14 }
 0x896   : > { %3297 = vrot.lane.b32.xlu2 %v3288_v36, %s6541_s20  ;;  %v3132_v0 = vpack.c.b16 %v3126_v20, %v3123_v33  ;;  %v3384_v36 = vld [vmem:[%s6495_s10 + $0x8] sm:$0xff] }
 0x898   : > { %3299 = vrot.lane.b32.xlu0 %v3289_v59, %s6541_s20  ;;  %3315 = vrot.lane.b32.xlu1 %v6011_v54, %s6544_s26  ;;  %v3385_v59 = vld [vmem:[%s6495_s10 + $0x10] sm:$0xff] }
 0x89e   : > { %3253 = vrot.lane.b32.xlu2 %v3243_v27, %s6536_s25 }
 0x8a0   : > { %3201 = vrot.lane.b32.xlu0 %v5978_v1, %s6542_s27  ;;  %3189 = vrot.lane.b32.xlu1 %v3178_v55, %s6545_s29  ;;  %v3034_v1 = vmul.f32 %v4549_v25, %v6212_v26  ;;  %v3014_v25 = vmul.f32 %v4593_v42, %v6212_v26  ;;  %v3051_v42 = vmul.f32 %v4545_v22, %v6158_v56  ;;  %s3730_s29 = scalar_lea.sflag [#allocation4], %s4515_s16 }
 0x8a2   : > { %v3042_v38 = vpack.c.bf16 %v3034_v1, %v3034_v1  ;;  %v3022_v4 = vpack.c.bf16 %v3014_v25, %v3014_v25 }
 0x8a4   : > { %v3284_v23 = vunpack.c.l.b16 %v3042_v38  ;;  %v3238_v5 = vunpack.c.l.b16 %v3022_v4  ;;  %v4021_v4 = vld [vmem:[#allocation7 + $0x8] sm:$0xf0] }
 0x8a6   : > { %3321 = vrot.lane.b32.xlu2 %v6135_v49, %s6544_s26  ;;  %v3290_v13 = vpack.c.b16 %v3284_v23, %v3281_v17 }
 0x8a8   : > { %3137 = vrot.lane.b32.xlu0 %v3129_v58, %s6540_s1  ;;  %3143 = vrot.lane.b32.xlu1 %v3132_v0, %s6540_s1 }
 0x8ae   : > { %3097 = vrot.lane.b32.xlu2 %v6135_v49, %s6543_s30 }
 0x8b0   : > { %3359 = vrot.lane.b32.xlu0 %v6103_v8, %s6535_s13  ;;  %3091 = vrot.lane.b32.xlu1 %v6011_v54, %s6543_s30  ;;  %v6271_v37 = vpop.permute.xlu2 %3313  ;;  %v3020_v8 = vpack.c.bf16 %v3011_v7, %v3011_v7  ;;  %v3312_v11 = vpop.permute.xlu1 %3311 }
 0x8b1   : > { %v3323_v51 = vsel %vm729_vm12, %v3312_v11, %v6271_v37  ;;  %v3983_v11 = vld [vmem:[#allocation7 + $0xc] sm:$0xf0] }
 0x8b2   : > { %v3235_v40 = vunpack.c.l.b16 %v3020_v8  ;;  %v3981_v8 = vld [vmem:[#allocation7] sm:$0xf] }
 0x8b4   : > { %v3244_v62 = vpack.c.b16 %v3238_v5, %v3235_v40  ;;  %v3982_v5 = vor.u32 %v4021_v4, %v3981_v8 }
 0x8b6   : > { %3295 = vrot.lane.b32.xlu2 %v3287_v16, %s6541_s20  ;;  %v3060_v16 = vpack.c.bf16 %v3051_v42, %v3051_v42 }
 0x8b8   : > { %3301 = vrot.lane.b32.xlu0 %v3290_v13, %s6541_s20  ;;  %3249 = vrot.lane.b32.xlu1 %v3241_v63, %s6536_s25  ;;  %v6286_v15 = vpop.permute.xlu2 %3199  ;;  %v3347_v63 = vunpack.c.l.b16 %v3060_v16 }
 0x8ba   : > { %v3356_v56 = vpack.c.b16 %v3350_v31, %v3347_v63 }
 0x8be   : > { %3357 = vrot.lane.b32.xlu2 %v6165_v47, %s6535_s13  ;;  %v3088_v47 = vpop.permute.xlu0 %3087 }
 0x8c0   : > { %3255 = vrot.lane.b32.xlu0 %v3244_v62, %s6536_s25  ;;  %3209 = vrot.lane.b32.xlu1 %v6135_v49, %s6542_s27  ;;  %v3180_v61 = vpop.permute.xlu2 %3179  ;;  %v3383_v49 = vld [vmem:[%s6495_s10] sm:$0xff] }
 0x8c6   : > { %3363 = vrot.lane.b32.xlu2 %v6203_v44, %s6535_s13 }
 0x8c8   : > { %3365 = vrot.lane.b32.xlu0 %v6205_v39, %s6535_s13  ;;  %3367 = vrot.lane.b32.xlu1 %v3356_v56, %s6535_s13  ;;  %v6302_v22 = vpop.permute.xlu2 %3135  ;;  %v6304_v26 = vpop.permute.xlu1 %3089 }
 0x8c9   : > { %v3099_v32 = vsel %vm643_vm2, %v3088_v47, %v6304_v26 }
 0x8ce   : > { %3203 = vrot.lane.b32.xlu2 %v6011_v54, %s6542_s27 }
 0x8d0   : > { %3361 = vrot.lane.b32.xlu0 %v3353_v57, %s6535_s13  ;;  %3388 = vperm.xlu1 %4148, %v3383_v49   ;;  %v3246_v44 = vpop.permute.xlu2 %3245  ;;  %v3381_v49 = vld [vmem:[#allocation7 + $0x18] sm:$0xff]  ;;  %s4033_s13 = smul.u32 48, %s4515_s16 }
 0x8d2   : > { %v3182_v39 = vpop.permute.xlu0 %3181  ;;  %v3134_v46 = vpop.permute.xlu1 %3133  ;;  %s6405_s27 = scalar_lea.vmem [#allocation8], %s4033_s13 }
 0x8d3   : > { %v3191_v34 = vsel %vm677_vm1, %v3180_v61, %v3182_v39  ;;  %v3145_v33 = vsel %vm660_vm0, %v3134_v46, %v6302_v22  ;;  %s3745_s30 = sshll.u32 %s6405_s27, 4  ;;  %s3746_s30 = int_to_ptr.vmem [resolvable:$true] %s3745_s30 }
 0x8d6   : > { %3393 = vperm.xlu2 %4149, %v3384_v36  }
 0x8d8   : > { %3398 = vperm.xlu0 %4150, %v3385_v59   ;;  %v3094_v54 = vpop.permute.xlu2 %3093 }
 0x8da   : > { %v3292_v9 = vpop.permute.xlu0 %3291  ;;  %v6321_v29 = vpop.permute.xlu1 %3293 }
 0x8db   : > { %v3303_v38 = vsel %vm720_vm13, %v3292_v9, %v6321_v29 }
 0x8e0   : > { %v3206_v28 = vpop.permute.xlu2 %3205 }
 0x8e2   : > { %v6323_v6 = vpop.permute.xlu0 %3247  ;;  %v3184_v57 = vpop.permute.xlu1 %3183 }
 0x8e3   : > { %v3257_v40 = vsel %vm703_vm15, %v3246_v44, %v6323_v6  ;;  %v3192_v41 = vsel %vm677_vm1, %v3182_v39, %v3184_v57  ;;  %v3413_v39 = vunpack.c.l.b16 %v3381_v49 }
 0x8e5   : > { %v3419_v59 = vpack.c.b16 %v3413_v39, %v3413_v39 }
 0x8e8   : > { %v3188_v10 = vpop.permute.xlu2 %3187 }
 0x8ea   : > { %v3318_v53 = vpop.permute.xlu0 %3317  ;;  %v3320_v35 = vpop.permute.xlu1 %3319 }
 0x8eb   : > { %v3325_v12 = vsel %vm729_vm12, %v3318_v53, %v3320_v35 }
 0x8ec   : > { %3450 = vmatpush.bf16.msrb.mxu1 %v3325_v12 }
 0x8f0   : > { %3451 = vmatpush.bf16.msrb.mxu1 %v3323_v51  ;;  %v3298_v27 = vpop.permute.xlu2 %3297 }
 0x8f2   : > { %v6328_v30 = vpop.permute.xlu0 %3095  ;;  %v3186_v50 = vpop.permute.xlu1 %3185 }
 0x8f3   : > { %v3193_v48 = vsel %vm677_vm1, %v3186_v50, %v3188_v10  ;;  %v3101_v2 = vsel %vm643_vm2, %v3094_v54, %v6328_v30 }
 0x8f4   : > { %3432 = vmatpush.bf16.msrb.mxu0 %v3193_v48 }
 0x8f8   : > { %3433 = vmatpush.bf16.msrb.mxu0 %v3191_v34  ;;  %v6334_v43 = vpop.permute.xlu2 %3253  ;;  %v4022_v34 = vld [vmem:[#allocation7 + $0x10] sm:$0xf0] }
 0x8fa   : > { %v6332_v55 = vpop.permute.xlu0 %3207  ;;  %v3142_v19 = vpop.permute.xlu1 %3141 }
 0x8fb   : > { %v3213_v16 = vsel %vm686_vm14, %v3206_v28, %v6332_v55  ;;  %v3414_v28 = vunpack.c.h.b16 %v3381_v49 }
 0x8fd   : > { %v3420_v53 = vpack.c.b16 %v3414_v28, %v3414_v28 }
 0x900   : > { %v3322_v20 = vpop.permute.xlu2 %3321 }
 0x901   : > { %v6355_v42 = vsel %vm729_vm12, %v3320_v35, %v3322_v20 }
 0x902   : > { %v3140_v14 = vpop.permute.xlu0 %3139  ;;  %v3252_v18 = vpop.permute.xlu1 %3251 }
 0x903   : > { %v3147_v60 = vsel %vm660_vm0, %v3140_v14, %v3142_v19  ;;  %v3259_v13 = vsel %vm703_vm15, %v3252_v18, %v6334_v43  ;;  %v3382_v18 = vld [vmem:[#allocation7 + $0x20] sm:$0xf] }
 0x904   : > { %3434 = vmatpush.bf16.msrb.mxu0 %v3147_v60  ;;  %v3415_v60 = vunpack.c.l.b16 %v3382_v18 }
 0x908   : > { %3435 = vmatpush.bf16.msrb.mxu0 %v3145_v33  ;;  %v3098_v7 = vpop.permute.xlu2 %3097  ;;  %v3421_v33 = vpack.c.b16 %v3415_v60, %v3415_v60 }
 0x909   : > { %v3102_v46 = vsel %vm643_vm2, %v6328_v30, %v3098_v7 }
 0x90a   : > { %v3300_v58 = vpop.permute.xlu0 %3299  ;;  %v3316_v0 = vpop.permute.xlu1 %3315 }
 0x90b   : > { %v3305_v1 = vsel %vm720_vm13, %v3298_v27, %v3300_v58  ;;  %v6365_v61 = vsel %vm729_vm12, %v6271_v37, %v3316_v0  ;;  %v3989_v27 = vld [vmem:[#allocation7 + $0x8] sm:$0xf] }
 0x90c   : > { %3436 = vmatpush.bf16.msrb.mxu0 %v3101_v2  ;;  %3452 = vmatpush.bf16.msrb.mxu1 %v3305_v1 }
 0x910   : > { %3437 = vmatpush.bf16.msrb.mxu0 %v3099_v32  ;;  %3453 = vmatpush.bf16.msrb.mxu1 %v3303_v38  ;;  %v3296_v63 = vpop.permute.xlu2 %3295 }
 0x911   : > { %v3304_v57 = vsel %vm720_vm13, %v6321_v29, %v3296_v63 }
 0x912   : > { %v6346_v17 = vpop.permute.xlu0 %3201  ;;  %v3190_v23 = vpop.permute.xlu1 %3189 }
 0x913   : > { %v3194_v25 = vsel %vm677_vm1, %v3188_v10, %v3190_v23  ;;  %v3211_v31 = vsel %vm686_vm14, %v6286_v15, %v6346_v17 }
 0x914   : > { %3438 = vmatpush.bf16.msrb.mxu0 %v6227_v3  ;;  %3454 = vmatpush.bf16.msrb.mxu1 %v3259_v13 }
 0x915   : > { %3486 = vmatpush.bf16.msrb.mxu3 %v3194_v25 }
 0x918   : > { %3439 = vmatpush.bf16.msrb.mxu0 %v6231_v45  ;;  %3455 = vmatpush.bf16.msrb.mxu1 %v3257_v40  ;;  %v4020_v45 = vld [vmem:[#allocation7 + $0x4] sm:$0xf]  ;;  %v3358_v36 = vpop.permute.xlu2 %3357 }
 0x919   : > { %3487 = vmatpush.bf16.msrb.mxu3 %v3192_v41  ;;  %v3986_v56 = vor.u32 %v4020_v45, %v3983_v11  ;;  %v4164_v45 = vld [vmem:[%s4519_s19] sm:$0xff] }
 0x91a   : > { %v3138_v3 = vpop.permute.xlu0 %3137  ;;  %v3144_v62 = vpop.permute.xlu1 %3143  ;;  %v3546_v11 = vmul.f32 %v4164_v45, %v4164_v45 }
 0x91b   : > { %3440 = vmatmul.bf16.vlgmr.msrb.gmra.mxu0 %v3982_v5  ;;  %v3148_v21 = vsel %vm660_vm0, %v3142_v19, %v3144_v62  ;;  %v3146_v47 = vsel %vm660_vm0, %v6302_v22, %v3138_v3  ;;  %v4163_v3 = vld [vmem:[%s4519_s19 + $0x8] sm:$0xff]  ;;  %s4034_s19 = smul.u32 48, %s4439_s28 }
 0x91c   : > { %3504 = vmatpush.bf16.msra.mxu0 %v6355_v42  ;;  %3456 = vmatpush.bf16.msrb.mxu1 %v3213_v16  ;;  %v3547_v62 = vmul.f32 %v4163_v3, %v4163_v3 }
 0x91d   : > { %3488 = vmatpush.bf16.msrb.mxu3 %v3148_v21  ;;  %s3744_s14 = scalar_lea.hbm %s6497_s12, %s4034_s19 }
 0x91e   : > { %s3747_s26 = sshll.u32 %s3744_s14, 4  ;;  %s3748_s26 = int_to_ptr.hbm [resolvable:$true] %s3747_s26 }
 0x91f   : > { %s4269_s25 = sshra.s32 %s3748_s26, 4  ;;  %s4270_s25 = int_to_ptr.hbm [resolvable:$true] %s4269_s25 }
 0x920   : > { %3505 = vmatpush.bf16.msra.mxu0 %v6365_v61  ;;  %3457 = vmatpush.bf16.msrb.mxu1 %v3211_v31  ;;  %v3364_v35 = vpop.permute.xlu2 %3363  ;;  %s4271_s1 = scalar_lea.hbm %s4270_s25, 48  ;;  %p4276_p12 = scmp.lt.s32.totalorder %s4270_s25, %s6497_s12 }
 0x921   : > { %3489 = vmatpush.bf16.msrb.mxu3 %v3146_v47  ;;  %v3549_v47 = vsub.f32 %v3547_v62, %v4163_v3  ;;  %p4272_p1 = scmp.ne.s32.totalorder %s4270_s25, %s4271_s1  ;;  %p4277_p7 = scmp.lt.s32.totalorder %s4275_s17, %s4271_s1 }
 0x922   : > { %v3360_v44 = vpop.permute.xlu0 %3359  ;;  %v3092_v37 = vpop.permute.xlu1 %3091 }
 0x923   : > { %3458 = vmatmul.bf16.vlgmr.msrb.gmra.mxu1 %v3986_v56  ;;  %v3100_v15 = vsel %vm643_vm2, %v6304_v26, %v3092_v37  ;;  %v3369_v19 = vsel %vm746_vm10, %v3358_v36, %v3360_v44  ;;  %v3548_v37 = vsub.f32 %v3546_v11, %v4164_v45  ;;  %p4273_p3 = pnand %p4272_p1, %p4484_p4  ;;  %p4278_p8 = por %p4277_p7, %p4276_p12 }
 0x925   : > { %3490 = vmatpush.bf16.msrb.mxu3 %v3102_v46  ;;  %p4274_p5 = pneg %p4273_p3 }
 0x927   : > { %p4279_p9 = pnand %p4278_p8, %p4274_p5 }
 0x928   : > { %v3204_v48 = vpop.permute.xlu2 %3203 }
 0x929   : > { %3491 = vmatpush.bf16.msrb.mxu3 %v3100_v15 }
 0x92a   : > { %v3302_v54 = vpop.permute.xlu0 %3301  ;;  %v3250_v9 = vpop.permute.xlu1 %3249 }
 0x92b   : > { %3445 = vmatmul.bf16.gmra.mxu0 %v3419_v59  ;;  %v3306_v22 = vsel %vm720_vm13, %v3300_v58, %v3302_v54  ;;  %v3258_v51 = vsel %vm703_vm15, %v6323_v6, %v3250_v9  ;;  %v3212_v6 = vsel %vm686_vm14, %v6346_v17, %v3204_v48 }
 0x92c   : > { %3506 = vmatpush.bf16.msra.mxu0 %v3306_v22 }
 0x92d   : > { %3492 = vmatpush.bf16.msrb.mxu3 %v6229_v24 }
 0x930   : > { %3507 = vmatpush.bf16.msra.mxu0 %v3304_v57  ;;  %v3394_v21 = vpop.permute.xlu2 %3393 }
 0x931   : > { %3493 = vmatpush.bf16.msrb.mxu3 %v6233_v52 }
 0x932   : > { %v3256_v10 = vpop.permute.xlu0 %3255  ;;  %v3210_v26 = vpop.permute.xlu1 %3209 }
 0x933   : > { %3463 = vmatmul.bf16.gmra.mxu1 %v3420_v53  ;;  %v3260_v12 = vsel %vm703_vm15, %v6334_v43, %v3256_v10  ;;  %v3214_v52 = vsel %vm686_vm14, %v6332_v55, %v3210_v26  ;;  %v3990_v43 = vor.u32 %v4022_v34, %v3989_v27 }
 0x934   : > { %3494 = vmatmul.bf16.vlgmr.msrb.gmra.mxu3 %v3982_v5  ;;  %3508 = vmatpush.bf16.msra.mxu0 %v3260_v12 }
 0x938   : > { %3509 = vmatpush.bf16.msra.mxu0 %v3258_v51 }
 0x93a   : > { %v3366_v24 = vpop.permute.xlu0 %3365  ;;  %v3368_v30 = vpop.permute.xlu1 %3367 }
 0x93b   : > { %v3371_v29 = vsel %vm746_vm10, %v3364_v35, %v3366_v24  ;;  %v3372_v50 = vsel %vm746_vm10, %v3366_v24, %v3368_v30 }
 0x93c   : > { %3474 = vmatpush.bf16.msrb.mxu2 %v3371_v29  ;;  %3510 = vmatpush.bf16.msra.mxu0 %v3214_v52 }
 0x93d   : > { %3528 = vmatpush.bf16.msra.mxu1 %v3372_v50  ;;  %4031 = vmatpush.bf16.msra.mxu3 %v3372_v50 }
 0x940   : > { %3475 = vmatpush.bf16.msrb.mxu2 %v3369_v19  ;;  %3511 = vmatpush.bf16.msra.mxu0 %v3212_v6 }
 0x942   : > { %v3362_v14 = vpop.permute.xlu0 %3361  ;;  %v3389_v25 = vpop.permute.xlu1 %3388 }
 0x943   : > { %3991 = vmatmul.msk.bf16.vlgmr.msrb.gmra.mxu2 %vm603_vm6, %v3990_v43  ;;  %3512 = vmatmul.bf16.vlgmr.msra.gmra.mxu0 %v3986_v56  ;;  %v3370_v55 = vsel %vm746_vm10, %v3360_v44, %v3362_v14 }
 0x944   : > { %4023 = vmatpush.bf16.msra.mxu2 %v6355_v42  ;;  %3499 = vmatmul.bf16.gmra.mxu3 %v3419_v59 }
 0x945   : > { %3529 = vmatpush.bf16.msra.mxu1 %v3370_v55  ;;  %4032 = vmatpush.bf16.msra.mxu3 %v3370_v55 }
 0x948   : > { %4024 = vmatpush.bf16.msra.mxu2 %v6365_v61  ;;  %3993 = vmatmul.msk.bf16.vlgmr.msra.gmra.mxu1 %vm603_vm6, %v3990_v43 }
 0x94a   : > { %v3399_v35 = vpop.permute.xlu0 %3398 }
 0x94c   : > { %4025 = vmatpush.bf16.msra.mxu2 %v3306_v22 }
 0x950   : > { %4026 = vmatpush.bf16.msra.mxu2 %v3304_v57 }
 0x953   : > { %3992 = vmatmul.msk.bf16.gmra.mxu2 %vm603_vm6, %v3421_v33 }
 0x954   : > { %4027 = vmatpush.bf16.msra.mxu2 %v3260_v12  ;;  %3994 = vmatmul.msk.bf16.vlgmr.msra.gmra.mxu3 %vm603_vm6, %v3421_v33 }
 0x958   : > { %4028 = vmatpush.bf16.msra.mxu2 %v3258_v51 }
 0x95c   : > { %4029 = vmatpush.bf16.msra.mxu2 %v3214_v52 }
 0x960   : > { %4030 = vmatpush.bf16.msra.mxu2 %v3212_v6 }
 0x963   : > { %3517 = vmatmul.bf16.vlgmr.msra.gmra.mxu2 %v3420_v53 }
 0x998   : > { %v3441_v20 = vpop.f32.mrf.mxu0 }
 0x999   : > { %v3442_v4 = vadd.f32 %v3441_v20, %v3389_v25 }
 0x9a0   : > { %v3443_v58 = vpop.f32.mrf.mxu0  ;;  %v3459_v0 = vpop.f32.mrf.mxu1 }
 0x9a1   : > { %v3460_v42 = vadd.f32 %v3459_v0, %v3442_v4  ;;  %v3444_v49 = vadd.f32 %v3443_v58, %v3394_v21 }
 0x9a8   : > { %v3446_v2 = vpop.f32.mrf.mxu0  ;;  %v3461_v1 = vpop.f32.mrf.mxu1 }
 0x9a9   : > { %v3462_v36 = vadd.f32 %v3461_v1, %v3444_v49  ;;  %v3447_v12 = vadd.f32 %v3446_v2, %v3399_v35 }
 0x9b0   : > { %v3464_v32 = vpop.f32.mrf.mxu1  ;;  %v3448_v38 = vpop.f32.mrf.mxu0 }
 0x9b1   : > { %v3465_v29 = vadd.f32 %v3464_v32, %v3447_v12 }
 0x9b7   : > { %v3495_v17 = vpop.f32.mrf.mxu3 }
 0x9b8   : > { %v3466_v23 = vpop.f32.mrf.mxu1  ;;  %v3496_v8 = vadd.f32 %v3495_v17, %v3389_v25 }
 0x9bf   : > { %v3497_v7 = vpop.f32.mrf.mxu3 }
 0x9c0   : > { %v3513_v13 = vpop.f32.mrf.mxu0  ;;  %v3498_v56 = vadd.f32 %v3497_v7, %v3394_v21 }
 0x9c1   : > { %v3514_v40 = vadd.f32 %v3513_v13, %v3496_v8 }
 0x9c5   : > { %v3531_v5 = vpop.f32.mrf.mxu1 }
 0x9c6   : > { %v3532_v41 = vadd.f32 %v3531_v5, %v3514_v40  ;;  %v3477_v16 = vpop.f32.mrf.mxu2 }
 0x9c7   : > { %v3478_v61 = vadd.f32 %v3477_v16, %v3460_v42  ;;  %v6403_v63 = vpop.f32.mrf.mxu3 }
 0x9c8   : > { %4151 = vtanh.f32 %v3532_v41  ;;  %v3515_v31 = vpop.f32.mrf.mxu0 }
 0x9c9   : > { %4153 = vtanh.f32 %v3478_v61  ;;  %v3516_v44 = vadd.f32 %v3515_v31, %v3498_v56 }
 0x9cd   : > { %v3533_v39 = vpop.f32.mrf.mxu1 }
 0x9ce   : > { %v4152_v46 = vpop.eup %4151  ;;  %v3534_v59 = vadd.f32 %v3533_v39, %v3516_v44  ;;  %v3479_v54 = vpop.f32.mrf.mxu2 }
 0x9cf   : > { %v3551_v15 = vmul.f32 %v4152_v46, %v3549_v47  ;;  %3719 = vst [vmem:[%s6405_s27 + $0x8] sm:$0xff] %v4152_v46  ;;  %v4154_v9 = vpop.eup %4153  ;;  %v3480_v22 = vadd.f32 %v3479_v54, %v3462_v36  ;;  %v3502_v53 = vpop.f32.mrf.mxu3 }
 0x9d0   : > { %4155 = vtanh.f32 %v3534_v59  ;;  %v3550_v57 = vmul.f32 %v4154_v9, %v3548_v37  ;;  %3718 = vst [vmem:[%s6405_s27] sm:$0xff] %v4154_v9 }
 0x9d1   : > { %v3553_v28 = vadd.f32 %v4163_v3, %v3551_v15  ;;  %4157 = vtanh.f32 %v3480_v22 }
 0x9d2   : > { %v3552_v26 = vadd.f32 %v4164_v45, %v3550_v57  ;;  %v3501_v45 = vadd.f32 %v6403_v63, %v3399_v35 }
 0x9d3   : > { %v3555_v10 = vmul.f32 %v3553_v28, %v3553_v28 }
 0x9d4   : > { %v3554_v24 = vmul.f32 %v3552_v26, %v3552_v26 }
 0x9d5   : > { %v3557_v51 = vsub.f32 %v3555_v10, %v3553_v28 }
 0x9d6   : > { %v6409_v30 = vpop.eup %4155  ;;  %v3556_v50 = vsub.f32 %v3554_v24, %v3552_v26  ;;  %v3482_v52 = vpop.f32.mrf.mxu2 }
 0x9d7   : > { %3721 = vst [vmem:[%s6405_s27 + $0x18] sm:$0xff] %v6409_v30  ;;  %v6413_v48 = vpop.eup %4157  ;;  %v3561_v27 = vrot.slane %v3557_v51, 5  ;;  %v3483_v34 = vadd.f32 %v3482_v52, %v3465_v29  ;;  %v3536_v49 = vpop.f32.mrf.mxu3 }
 0x9d8   : > { %v3560_v19 = vrot.slane %v3556_v50, 5  ;;  %3720 = vst [vmem:[%s6405_s27 + $0x10] sm:$0xff] %v6413_v48 }
 0x9d9   : > { %4159 = vtanh.f32 %v3483_v34  ;;  %v3565_v43 = vmul.f32 %v4152_v46, %v3561_v27 }
 0x9da   : > { %v3564_v6 = vmul.f32 %v4154_v9, %v3560_v19 }
 0x9db   : > { %v3569_v33 = vrot.slane %v3565_v43, 3 }
 0x9dc   : > { %v3568_v14 = vrot.slane %v3564_v6, 3 }
 0x9dd   : > { %v3573_v0 = vadd.f32 %v3569_v33, %v3553_v28 }
 0x9de   : > { %v3572_v55 = vadd.f32 %v3568_v14, %v3552_v26  ;;  %v3484_v18 = vpop.f32.mrf.mxu2 }
 0x9df   : > { %v6417_v60 = vpop.eup %4159  ;;  %v3575_v38 = vmul.f32 %v3573_v0, %v3573_v0  ;;  %v3538_v28 = vpop.f32.mrf.mxu3 }
 0x9e0   : > { %v3574_v20 = vmul.f32 %v3572_v55, %v3572_v55  ;;  %3722 = vst [vmem:[%s6405_s27 + $0x20] sm:$0xff] %v6417_v60 }
 0x9e1   : > { %v3577_v25 = vsub.f32 %v3575_v38, %v3573_v0 }
 0x9e2   : > { %v3576_v58 = vsub.f32 %v3574_v20, %v3572_v55 }
 0x9e3   : > { %v3581_v4 = vrot.slane %v3577_v25, 2 }
 0x9e4   : > { %v3580_v2 = vrot.slane %v3576_v58, 2 }
 0x9e5   : > { %v3585_v42 = vmul.f32 %v4152_v46, %v3581_v4  ;;  %v3587_v41 = vmul.f32 %v6409_v30, %v3581_v4 }
 0x9e6   : > { %v3584_v1 = vmul.f32 %v4154_v9, %v3580_v2  ;;  %v3586_v32 = vmul.f32 %v6413_v48, %v3580_v2  ;;  %v3518_v31 = vpop.f32.mrf.mxu2 }
 0x9e7   : > { %v3596_v16 = vrot.slane %v3585_v42, 6  ;;  %v3597_v21 = vrot.slane %v3587_v41, 6  ;;  %v3519_v56 = vadd.f32 %v3518_v31, %v3501_v45 }
 0x9e8   : > { %v3593_v17 = vrot.slane %v3584_v1, 6  ;;  %v3594_v23 = vrot.slane %v3586_v32, 6 }
 0x9e9   : > { %v3598_v44 = vsel %vm3592_vm4, %v3596_v16, %v3597_v21  ;;  %v3537_v37 = vadd.f32 %v3536_v49, %v3519_v56 }
 0x9ea   : > { %v3595_v7 = vsel %vm3592_vm4, %v3593_v17, %v3594_v23  ;;  %v3602_v39 = vadd.f32 %v3598_v44, %v3573_v0 }
 0x9eb   : > { %v3601_v13 = vadd.f32 %v3595_v7, %v3572_v55  ;;  %4161 = vtanh.f32 %v3537_v37 }
 0x9ec   : > { %v3604_v36 = vmul.f32 %v3602_v39, %v3602_v39 }
 0x9ed   : > { %v3603_v8 = vmul.f32 %v3601_v13, %v3601_v13 }
 0x9ee   : > { %v3606_v59 = vsub.f32 %v3604_v36, %v3602_v39  ;;  %v3520_v54 = vpop.f32.mrf.mxu2 }
 0x9ef   : > { %v3605_v40 = vsub.f32 %v3603_v8, %v3601_v13 }
 0x9f0   : > { %v3610_v9 = vrot.slane %v3606_v59, 7 }
 0x9f1   : > { %v3609_v5 = vrot.slane %v3605_v40, 7  ;;  %v6433_v57 = vpop.eup %4161 }
 0x9f2   : > { %v3614_v53 = vmul.f32 %v6409_v30, %v3610_v9  ;;  %3723 = vst [vmem:[%s6405_s27 + $0x28] sm:$0xff] %v6433_v57 }
 0x9f3   : > { %v3613_v3 = vmul.f32 %v6413_v48, %v3609_v5 }
 0x9f4   : > { %v3618_v10 = vrot.slane %v3614_v53, 1 }
 0x9f5   : > { %v3617_v62 = vrot.slane %v3613_v3, 1 }
 0x9f7   : > { %v3621_v61 = vadd.f32 %v3617_v62, %v3601_v13 }
 0x9f9   : > { %v3623_v11 = vmul.f32 %v3621_v61, %v3621_v61 }
 0x9fb   : > { %v3625_v47 = vsub.f32 %v3623_v11, %v3621_v61 }
 0x9fd   : > { %v3629_v46 = vrot.slane %v3625_v47, 4 }
 0x9ff   : > { %v3633_v63 = vmul.f32 %v6413_v48, %v3629_v46 }
 0xa01   : > { %v3637_v15 = vrot.slane %v3633_v63, 4 }
 0xa03   : > { %v3641_v22 = vadd.f32 %v3637_v15, %v3621_v61 }
 0xa05   : > { %v3643_v35 = vmul.f32 %v3641_v22, %v3641_v22 }
 0xa06   : > { %4282 = shalt.err (!%p4279_p9)
}
 0xa07   : > { %s4349_s16 = smov 256   ;;  %s6546_s27 = smov 16   ;;  %v3645_v26 = vsub.f32 %v3643_v35, %v3641_v22  ;;  %v3622_v12 = vadd.f32 %v3618_v10, %v3602_v39  ;;  %vm3661_vm5 = vcmask 1040384  }
 0xa08   : > { %4045 = dma.vmem_to_hbm [thread:$0]  (%p4484_p4), %s3746_s30, 768, %s3748_s26, %s3730_s29, %s4349_s16, %s4349_s16, %s6546_s27  }
 0xa09   : > { %v3649_v51 = vrot.slane %v3645_v26, 1  ;;  %v3624_v24 = vmul.f32 %v3622_v12, %v3622_v12  ;;  %p473_p4 = scmp.lt.s32.totalorder %s4439_s28, 1 }
 0xa0b   : > { %v3653_v29 = vmul.f32 %v6413_v48, %v3649_v51  ;;  %v3655_v50 = vmul.f32 %v6417_v60, %v3649_v51  ;;  %v3626_v52 = vsub.f32 %v3624_v24, %v3622_v12  ;;  %s6556_s28 = smov (!%p473_p4, %s4439_s28), 1 }
 0xa0c   : > { %s3999_s18 = sshll.u32 %s6556_s28, 3 }
 0xa0d   : > { %v3662_v27 = vrot.slane %v3653_v29, 7  ;;  %v3663_v34 = vrot.slane %v3655_v50, 7  ;;  %v3630_v19 = vrot.slane %v3626_v52, 4  ;;  %s477_s9 = scalar_lea.vmem %s6496_s11, %s3999_s18 }
 0xa0f   : > { %v3664_v6 = vsel %vm3661_vm5, %v3662_v27, %v3663_v34  ;;  %v3634_v14 = vmul.f32 %v6409_v30, %v3630_v19 }
 0xa10   : > { %v3670_v43 = vadd.f32 %v3664_v6, %v3641_v22 }
 0xa11   : > { %v3638_v18 = vrot.slane %v3634_v14, 4 }
 0xa12   : > { %v3672_v55 = vmul.f32 %v3670_v43, %v3670_v43 }
 0xa13   : > { %v3642_v20 = vadd.f32 %v3638_v18, %v3622_v12 }
 0xa14   : > { %v3674_v33 = vsub.f32 %v3672_v55, %v3670_v43 }
 0xa15   : > { %v3644_v0 = vmul.f32 %v3642_v20, %v3642_v20 }
 0xa16   : > { %v3678_v58 = vrot.slane %v3674_v33, 6 }
 0xa17   : > { %v3646_v2 = vsub.f32 %v3644_v0, %v3642_v20 }
 0xa18   : > { %v3682_v48 = vmul.f32 %v6417_v60, %v3678_v58 }
 0xa19   : > { %v3650_v1 = vrot.slane %v3646_v2, 1 }
 0xa1a   : > { %v3686_v17 = vrot.slane %v3682_v48, 2 }
 0xa1b   : > { %v3654_v32 = vmul.f32 %v6409_v30, %v3650_v1  ;;  %v3656_v38 = vmul.f32 %v6433_v57, %v3650_v1 }
 0xa1c   : > { %v3690_v13 = vadd.f32 %v3686_v17, %v3670_v43 }
 0xa1d   : > { %v3665_v23 = vrot.slane %v3654_v32, 7  ;;  %v3666_v7 = vrot.slane %v3656_v38, 7 }
 0xa1e   : > { %v3692_v40 = vmul.f32 %v3690_v13, %v3690_v13 }
 0xa1f   : > { %v3667_v25 = vsel %vm3661_vm5, %v3665_v23, %v3666_v7 }
 0xa20   : > { %v3671_v8 = vadd.f32 %v3667_v25, %v3642_v20  ;;  %v3694_v41 = vsub.f32 %v3692_v40, %v3690_v13 }
 0xa22   : > { %v3673_v4 = vmul.f32 %v3671_v8, %v3671_v8  ;;  %v3698_v30 = vrot.slane %v3694_v41, 3 }
 0xa24   : > { %v3675_v5 = vsub.f32 %v3673_v4, %v3671_v8  ;;  %v3702_v61 = vmul.f32 %v6417_v60, %v3698_v30 }
 0xa26   : > { %v3679_v42 = vrot.slane %v3675_v5, 6  ;;  %v3706_v31 = vrot.slane %v3702_v61, 5 }
 0xa28   : > { %v3683_v3 = vmul.f32 %v6433_v57, %v3679_v42  ;;  %v3710_v49 = vadd.f32 %v3706_v31, %v3690_v13 }
 0xa2a   : > { %v3687_v62 = vrot.slane %v3683_v3, 2 }
 0xa2c   : > { %v3691_v16 = vadd.f32 %v3687_v62, %v3671_v8 }
 0xa2e   : > { %v3693_v21 = vmul.f32 %v3691_v16, %v3691_v16 }
 0xa30   : > { %v3695_v45 = vsub.f32 %v3693_v21, %v3691_v16 }
 0xa32   : > { %v3699_v11 = vrot.slane %v3695_v45, 3 }
 0xa34   : > { %v3703_v56 = vmul.f32 %v6433_v57, %v3699_v11 }
 0xa36   : > { %v3707_v47 = vrot.slane %v3703_v56, 5 }
 0xa38   : > { %v3711_v44 = vadd.f32 %v3707_v47, %v3691_v16 }
 0xa3a   : > { %v3714_v37 = vrot.slane %v3711_v44, 4 }
 0xa3c   : > { %v3715_v39 = vsel %vm749_vm11, %v3710_v49, %v3714_v37 }
 0xa3d   : > { %3717 = vst [vmem:[%s477_s9] sm:$0x77] %v3715_v39 }
 0xa3e PF: > { %s6547_s14 = sld [smem:[#allocation12_spill]]  ;;  %p6549_p10 = scmp.ge.s32.totalorder %s4325_s24, 2 }
 0xa40   : > { %p4059_p13 = pnand %p6549_p10, %p4488_p6 }
 0xa42   : > { %p4060_p11 = pneg %p4059_p13 }
 0xa44   : > { %s3770_s26 = sand.u32 1, %s6547_s14  }
 0xa45   : > { %s3771_s28 = scalar_lea.sflag [#allocation4], %s3770_s26 }
 0xa46   : > { %4308 = dma.done.wait (%p4060_p11), %s3771_s28, 768  }
 0xa47   : > { %4310 = vsyncadd (%p4060_p11), %s3771_s28, 4294966528  ;;  %s6550_s24 = sld [smem:[#allocation14_spill]]  ;;  %s6553_s21 = smov %s4317_s22 }
 0xa48   : > { %s6551_s29 = sld [smem:[#allocation13_spill]] }
 0xa49   : > { %s6552_s23 = sld [smem:[#allocation15_spill]] }
 0xa4d   : > { %p27_p0 = scmp.ge.s32.totalorder %s6550_s24, 4  }
 0xa4e   : > { %s6554_s22 = smov %s6551_s29 }
 0xa4f   :  { %29 = sbr.rel (!%p27_p0) target bundleno = 9 (0x9), region = 129 }
 0xa54   :  { %3777 = vsyncpa [#allocation3], 1 }
 0xa55   :  { %3779 = vsyncpa [#allocation3 + $0x1], 1 }
 0xa56   :  { %3780 = vsyncpa [#allocation6], 1 }
 0xa57   :  { %3781 = vsyncpa [#allocation4], 1 }
 0xa58   :  { %3783 = vsyncpa [#allocation4 + $0x1], 1 }

</bundles_post_ra>
